<compile_context>
chip_gen: v5e
topology: v5e:2x2
jax: 0.10.0
libtpu: 0.0.40
codegen_flags: <defaults>
</compile_context>

<pallas_src>
import functools
import math

import jax
import jax.numpy as jnp
import numpy as np
from jax import lax
from jax.experimental import pallas as pl
from jax.experimental.pallas import tpu as pltpu

_MASK_VALUE = -1e30


# ------------------------------- helpers --------------------------------------
def _round_up(n, m):
    return ((n + m - 1) // m) * m


def _erf(x):
    # Abramowitz & Stegun 7.1.26 (|err| < 1.5e-7).  Uses only exp / mul / add /
    # abs / select, which always lower on Mosaic (lax.erf has no guaranteed
    # Pallas-TPU lowering).  Numerically indistinguishable from exact GELU here.
    a1, a2, a3, a4, a5 = 0.254829592, -0.284496736, 1.421413741, -1.453152027, 1.061405429
    p = 0.3275911
    ax = jnp.abs(x)
    t = 1.0 / (1.0 + p * ax)
    y = 1.0 - ((((a5 * t + a4) * t + a3) * t + a2) * t + a1) * t * jnp.exp(-ax * ax)
    return jnp.where(x < 0.0, -y, y)


# ------------------------------- kernel ---------------------------------------
def _ee_branch_kernel(
    x_ref,                          # (T_pad, E_in)     full (padded) sequence
    wp_ref, bp_ref,                 # input_proj (x@W): (E_in, EE), (1, EE)
    wq_ref, bq_ref,                 # q proj, scale folded: (EE, EE), (1, EE)
    wkT_ref, bk_ref,                # k proj, PyTorch (out,in) layout: (EE, EE), (EE, 1)
    wv_ref, bv_ref,                 # v proj: (EE, EE), (1, EE)
    wo_ref, bo_ref,                 # attn out_proj: (EE, EE), (1, EE)
    g1_ref, be1_ref,                # attn_norm: (1, EE), (1, EE)
    w1_ref, b1_ref,                 # ffn[0]: (EE, FFHp), (1, FFHp)
    w2_ref, b2_ref,                 # ffn[2]: (FFHp, EE), (1, EE)
    g2_ref, be2_ref,                # ffn_norm: (1, EE), (1, EE)
    wout_ref, bout_ref,             # output_linear: (EE, Vp), (1, Vp)
    out_ref,                        # (TQ, Vp)
    h_scr, k_scr, v_scr, q_scr, attn_scr,   # VMEM scratch
    *, num_heads, head_dim, head_group, t_real, t_pad, tq, eps, compute_dtype):
    cdt = compute_dtype
    f32 = jnp.float32

    def layer_norm(h, g, b):
        mu = jnp.mean(h, axis=-1, keepdims=True)
        var = jnp.mean((h - mu) * (h - mu), axis=-1, keepdims=True)
        return (h - mu) * lax.rsqrt(var + eps) * g + b

    # ---- once per batch element: input_proj + K^T / V for the whole sequence --
    @pl.when(pl.program_id(1) == 0)
    def _():
        xf = x_ref[...].astype(cdt)                                        # (T_pad, E_in)
        hf = jnp.dot(xf, wp_ref[...], preferred_element_type=f32) + bp_ref[...]
        h_scr[...] = hf                                                    # cached (f32)
        # K^T = Wk @ hf^T + bk[:, None]   (PyTorch layout -> no per-head transpose;
        # scratch last dim is T_pad -> lane-dense).
        hf_t = hf.T.astype(cdt)                                            # (EE, T_pad)
        kT = jnp.dot(wkT_ref[...], hf_t, preferred_element_type=f32) + bk_ref[...]
        for hd in range(num_heads):
            k_scr[hd] = kT[hd * head_dim:(hd + 1) * head_dim, :].astype(cdt)
        vf = jnp.dot(hf.astype(cdt), wv_ref[...], preferred_element_type=f32) + bv_ref[...]
        for hd in range(num_heads):
            v_scr[hd] = vf[:, hd * head_dim:(hd + 1) * head_dim].astype(cdt)

    # ---- query tile: slice cached input projection (no per-tile input_proj) ---
    row0 = pl.multiple_of(pl.program_id(1) * tq, tq)
    h = h_scr[pl.ds(row0, tq), :]                                          # (TQ, EE) f32
    res = h

    q = jnp.dot(h.astype(cdt), wq_ref[...], preferred_element_type=f32) + bq_ref[...]
    for hd in range(num_heads):
        q_scr[hd] = q[:, hd * head_dim:(hd + 1) * head_dim].astype(cdt)

    # ---- head-grouped attention (1/sqrt(Dh) already folded into wq / bq) ------
    for g0 in range(0, num_heads, head_group):
        s = jnp.einsum('gqd,gdk->gqk',
                       q_scr[g0:g0 + head_group], k_scr[g0:g0 + head_group],
                       preferred_element_type=f32)                         # (G, TQ, T_pad)
        if t_pad > t_real:                     # static: mask padded key columns
            col = lax.broadcasted_iota(jnp.int32, s.shape, 2)
            s = jnp.where(col < t_real, s, _MASK_VALUE)
        s = s - jnp.max(s, axis=-1, keepdims=True)
        p = jnp.exp(s)
        p = p * pl.reciprocal(jnp.sum(p, axis=-1, keepdims=True), approx=True)
        ctx = jnp.einsum('gqk,gkd->gqd',
                         p.astype(cdt), v_scr[g0:g0 + head_group],
                         preferred_element_type=f32)                       # (G, TQ, Dh)
        for i in range(head_group):
            hd = g0 + i
            attn_scr[:, hd * head_dim:(hd + 1) * head_dim] = ctx[i].astype(attn_scr.dtype)

    attn = jnp.dot(attn_scr[...], wo_ref[...], preferred_element_type=f32) + bo_ref[...]

    # ---- residual + attn_norm --------------------------------------------------
    h = layer_norm(res + attn, g1_ref[...], be1_ref[...])
    res = h

    # ---- FFN: Linear -> GELU(erf) -> Linear (ff_hidden is 128-padded) ---------
    f = jnp.dot(h.astype(cdt), w1_ref[...], preferred_element_type=f32) + b1_ref[...]
    f = 0.5 * f * (1.0 + _erf(f * 0.7071067811865476))
    f = jnp.dot(f.astype(cdt), w2_ref[...], preferred_element_type=f32) + b2_ref[...]

    # ---- residual + ffn_norm ----------------------------------------------------
    h = layer_norm(res + f, g2_ref[...], be2_ref[...])

    # ---- output_linear (vocab 128-padded -> lane-dense writeback) --------------
    logits = jnp.dot(h.astype(cdt), wout_ref[...], preferred_element_type=f32) + bout_ref[...]
    out_ref[...] = logits.astype(out_ref.dtype)


# ------------------------------- wrapper --------------------------------------
def _physical_vmem_bytes():
    try:
        return int(pltpu.get_tpu_info().vmem_capacity_bytes)
    except Exception:
        return 128 * 1024 * 1024   # conservative v5e/v6e default


def _default_q_tile():
    # v7x (64 MiB VMEM per TC) -> smaller query tile; v5e/v6e -> 256.
    return 128 if _physical_vmem_bytes() <= 64 * 1024 * 1024 else 256


def _pick_head_group(num_heads, tq, t_pad, budget_bytes=4 * 1024 * 1024):
    per_head = 2 * tq * _round_up(t_pad, 128) * 4      # f32 scores + exp temporaries
    g = max(1, min(num_heads, budget_bytes // max(per_head, 1)))
    while num_heads % g:
        g -= 1
    return g


def _vmem_bytes(shape, dtype):
    s = [int(d) for d in shape]
    s[-1] = _round_up(s[-1], 128)
    if len(s) >= 2:
        s[-2] = _round_up(s[-2], 8)
    n = 1
    for d in s:
        n *= d
    return n * jnp.dtype(dtype).itemsize


def early_exit_branch(x, params, *, ee_dim, num_heads, eps=1e-5,
                      compute_dtype=jnp.bfloat16, q_tile=None):
    """x: (B, T, embed_dim) -> logits (B, T, vocab_size).

    params use the PyTorch layout: weights (out, in), biases (out,).
    compute_dtype: dtype of MXU operands (default bf16); accumulation and all
    elementwise math (layernorm / softmax / GELU / residuals) stay float32.
    """
    B, T, E_in = x.shape
    V = params["wout"].shape[0]
    FFH = params["w1"].shape[0]
    assert ee_dim % num_heads == 0
    head_dim = ee_dim // num_heads
    f32 = jnp.float32
    cdt = jnp.dtype(compute_dtype) if compute_dtype is not None else jnp.dtype(x.dtype)

    if q_tile is None:
        q_tile = _default_q_tile()
    TQ = min(_round_up(q_tile, 8), _round_up(T, 8))
    T_pad = _round_up(T, TQ)                 # pad queries/keys; padded keys masked
    V_pad = _round_up(V, 128)                # lane-dense logits writeback
    FFH_pad = _round_up(FFH, 128)            # lane-dense FFN hidden dim
    G = _pick_head_group(num_heads, TQ, T_pad)
    scale = 1.0 / math.sqrt(head_dim)

    def row(b):
        return jnp.asarray(b, f32).reshape(1, -1)

    def col(b):
        return jnp.asarray(b, f32).reshape(-1, 1)

    def wt(w):   # PyTorch (out, in) -> (in, out), cast once for the MXU
        return jnp.asarray(w, f32).T.astype(cdt)

    # Split the fused in_proj into q / k / v; fold the attention scale into q.
    win = jnp.asarray(params["win"], f32)
    bin_ = jnp.asarray(params["bin"], f32).reshape(-1)
    wq_pt, wk_pt, wv_pt = win[:ee_dim], win[ee_dim:2 * ee_dim], win[2 * ee_dim:]
    bq_, bk_, bv_ = bin_[:ee_dim], bin_[ee_dim:2 * ee_dim], bin_[2 * ee_dim:]

    param_list = [
        wt(params["wp"]), row(params["bp"]),
        (wq_pt * scale).T.astype(cdt), row(bq_ * scale),
        wk_pt.astype(cdt), col(bk_),                       # K kept in (out,in) layout
        wv_pt.T.astype(cdt), row(bv_),
        wt(params["wo"]), row(params["bo"]),
        row(params["g1"]), row(params["be1"]),
        jnp.pad(wt(params["w1"]), ((0, 0), (0, FFH_pad - FFH))),
        jnp.pad(row(params["b1"]), ((0, 0), (0, FFH_pad - FFH))),
        jnp.pad(wt(params["w2"]), ((0, FFH_pad - FFH), (0, 0))),
        row(params["b2"]),
        row(params["g2"]), row(params["be2"]),
        jnp.pad(wt(params["wout"]), ((0, 0), (0, V_pad - V))),
        jnp.pad(row(params["bout"]), ((0, 0), (0, V_pad - V))),
    ]

    x_pad = x if T_pad == T else jnp.pad(x, ((0, 0), (0, T_pad - T), (0, 0)))

    scratch_shapes = [
        pltpu.VMEM((T_pad, ee_dim), f32),                 # input_proj cache (residual src)
        pltpu.VMEM((num_heads, head_dim, T_pad), cdt),    # K^T heads (lane-dense)
        pltpu.VMEM((num_heads, T_pad, head_dim), cdt),    # V heads
        pltpu.VMEM((num_heads, TQ, head_dim), cdt),       # Q heads (per tile)
        pltpu.VMEM((TQ, ee_dim), cdt),                    # merged attention heads
    ]

    # Explicit VMEM budget, clamped by the physical VMEM of this TPU generation.
    weight_bytes = sum(_vmem_bytes(p.shape, p.dtype) for p in param_list)
    scr_bytes = (_vmem_bytes((T_pad, ee_dim), f32)
                 + num_heads * _vmem_bytes((head_dim, T_pad), cdt)
                 + num_heads * _vmem_bytes((T_pad, head_dim), cdt)
                 + num_heads * _vmem_bytes((TQ, head_dim), cdt)
                 + _vmem_bytes((TQ, ee_dim), cdt))
    io_bytes = 2 * (_vmem_bytes((T_pad, E_in), x.dtype) + _vmem_bytes((TQ, V_pad), x.dtype))
    tmp_bytes = (3 * _vmem_bytes((T_pad, ee_dim), f32)
                 + 2 * G * _vmem_bytes((TQ, T_pad), f32)
                 + _vmem_bytes((TQ, FFH_pad), f32)
                 + _vmem_bytes((TQ, V_pad), f32)
                 + 4 * _vmem_bytes((TQ, ee_dim), f32))
    est = 2 * weight_bytes + scr_bytes + io_bytes + tmp_bytes   # 2x weights: worst case
    cap = int(_physical_vmem_bytes() * 0.9)
    vmem_limit = int(min(max(int(est * 1.5), 48 * 1024 * 1024), cap))

    kernel = functools.partial(
        _ee_branch_kernel, num_heads=num_heads, head_dim=head_dim, head_group=G,
        t_real=T, t_pad=T_pad, tq=TQ, eps=eps, compute_dtype=cdt)

    def run(weight_mode):
        def wspec(a):
            nd = a.ndim
            if weight_mode is None:
                return pl.BlockSpec(a.shape, lambda b, qi: (0,) * nd)
            return pl.BlockSpec(a.shape, lambda b, qi: (0,) * nd,
                                pipeline_mode=weight_mode)

        in_specs = ([pl.BlockSpec((None, T_pad, E_in), lambda b, qi: (b, 0, 0))]
                    + [wspec(p) for p in param_list])
        out_specs = pl.BlockSpec((None, TQ, V_pad), lambda b, qi: (b, qi, 0))
        return pl.pallas_call(
            kernel,
            out_shape=jax.ShapeDtypeStruct((B, T_pad, V_pad), x.dtype),
            grid_spec=pltpu.PrefetchScalarGridSpec(
                num_scalar_prefetch=0,
                grid=(B, T_pad // TQ),
                in_specs=in_specs,
                out_specs=out_specs,
                scratch_shapes=scratch_shapes),
            compiler_params=pltpu.CompilerParams(
                dimension_semantics=("parallel", "arbitrary"),
                vmem_limit_bytes=vmem_limit),
        )(x_pad, *param_list)

    try:
        # Invariant weights: single-buffer them (halves resident weight VMEM).
        logits_pad = run(pl.Buffered(buffer_count=1))
    except Exception:
        # Fallback: default (double-buffered) pipelining if Buffered(1) is rejected.
        logits_pad = run(None)

    return logits_pad[:, :T, :V]


# --------------------------- reference (pure JAX) ------------------------------
def ref_forward(x, p, *, ee_dim, num_heads, eps=1e-5):
    head_dim = ee_dim // num_heads
    B, T, _ = x.shape
    h = x @ p["wp"].T + p["bp"]
    res = h
    qkv = h @ p["win"].T + p["bin"]
    q, k, v = jnp.split(qkv, 3, axis=-1)
    q = q.reshape(B, T, num_heads, head_dim).transpose(0, 2, 1, 3)
    k = k.reshape(B, T, num_heads, head_dim).transpose(0, 2, 1, 3)
    v = v.reshape(B, T, num_heads, head_dim).transpose(0, 2, 1, 3)
    scores = (q / math.sqrt(head_dim)) @ k.transpose(0, 1, 3, 2)
    attn = jax.nn.softmax(scores, axis=-1) @ v
    attn = attn.transpose(0, 2, 1, 3).reshape(B, T, ee_dim)
    attn = attn @ p["wo"].T + p["bo"]
    h = res + attn

    def ln(y, g, b):
        mu = jnp.mean(y, -1, keepdims=True)
        var = jnp.mean((y - mu) ** 2, -1, keepdims=True)
        return (y - mu) / jnp.sqrt(var + eps) * g + b

    h = ln(h, p["g1"], p["be1"])
    res = h
    f = h @ p["w1"].T + p["b1"]
    f = jax.nn.gelu(f, approximate=False)     # exact (erf) GELU, as nn.GELU()
    f = f @ p["w2"].T + p["b2"]
    h = ln(res + f, p["g2"], p["be2"])
    return h @ p["wout"].T + p["bout"]


# ----------------------------------- main --------------------------------------
if __name__ == "__main__":
    # Small, forward-consistent sizes (real config: 1024/1024/50/16/2048).
    # T=20 is deliberately not a multiple of the tile -> exercises the sequence
    # padding + key-mask path.
    B, T = 2, 20
    embed_dim, ee_dim, vocab_size = 64, 64, 16
    num_heads, ff_hidden = 4, 128

    key = jax.random.PRNGKey(0)
    ks = jax.random.split(key, 13)
    s = 0.05  # small init keeps softmax / layernorm well-conditioned

    params = {
        "wp":   s * jax.random.normal(ks[0], (ee_dim, embed_dim), jnp.float32),
        "bp":   s * jax.random.normal(ks[1], (ee_dim,), jnp.float32),
        "win":  s * jax.random.normal(ks[2], (3 * ee_dim, ee_dim), jnp.float32),
        "bin":  s * jax.random.normal(ks[3], (3 * ee_dim,), jnp.float32),
        "wo":   s * jax.random.normal(ks[4], (ee_dim, ee_dim), jnp.float32),
        "bo":   s * jax.random.normal(ks[5], (ee_dim,), jnp.float32),
        "g1":   jnp.ones((ee_dim,), jnp.float32),
        "be1":  jnp.zeros((ee_dim,), jnp.float32),
        "w1":   s * jax.random.normal(ks[6], (ff_hidden, ee_dim), jnp.float32),
        "b1":   s * jax.random.normal(ks[7], (ff_hidden,), jnp.float32),
        "w2":   s * jax.random.normal(ks[8], (ee_dim, ff_hidden), jnp.float32),
        "b2":   s * jax.random.normal(ks[9], (ee_dim,), jnp.float32),
        "g2":   jnp.ones((ee_dim,), jnp.float32),
        "be2":  jnp.zeros((ee_dim,), jnp.float32),
        "wout": s * jax.random.normal(ks[10], (vocab_size, ee_dim), jnp.float32),
        "bout": s * jax.random.normal(ks[11], (vocab_size,), jnp.float32),
    }

    x = jax.random.normal(ks[12], (B, T, embed_dim), jnp.float32)
    ref = ref_forward(x, params, ee_dim=ee_dim, num_heads=num_heads)

    # Default path: bf16 MXU operands, f32 accumulation / elementwise.
    out_bf16 = early_exit_branch(x, params, ee_dim=ee_dim, num_heads=num_heads)
    out_bf16 = jax.block_until_ready(out_bf16)
    np.testing.assert_allclose(np.asarray(out_bf16), np.asarray(ref),
                               rtol=5e-2, atol=5e-2)

    # f32 MXU path with a tiny query tile -> exercises multi-tile K/V reuse and
    # the padded-key mask; only the approx softmax reciprocal / erf poly differ.
    out_f32 = early_exit_branch(x, params, ee_dim=ee_dim, num_heads=num_heads,
                                compute_dtype=jnp.float32, q_tile=8)
    out_f32 = jax.block_until_ready(out_f32)
    np.testing.assert_allclose(np.asarray(out_f32), np.asarray(ref),
                               rtol=5e-3, atol=5e-3)

    print("KERNEL_OK")
</pallas_src>

<mosaic_0001>
module attributes {stable_mosaic.version = 11 : i64} {
  func.func @_ee_branch_kernel(%arg0: i32, %arg1: i32, %arg2: memref<1x24x64xf32, #tpu.memory_space<vmem>>, %arg3: memref<64x64xbf16, #tpu.memory_space<vmem>>, %arg4: memref<1x64xf32, #tpu.memory_space<vmem>>, %arg5: memref<64x64xbf16, #tpu.memory_space<vmem>>, %arg6: memref<1x64xf32, #tpu.memory_space<vmem>>, %arg7: memref<64x64xbf16, #tpu.memory_space<vmem>>, %arg8: memref<64x1xf32, #tpu.memory_space<vmem>>, %arg9: memref<64x64xbf16, #tpu.memory_space<vmem>>, %arg10: memref<1x64xf32, #tpu.memory_space<vmem>>, %arg11: memref<64x64xbf16, #tpu.memory_space<vmem>>, %arg12: memref<1x64xf32, #tpu.memory_space<vmem>>, %arg13: memref<1x64xf32, #tpu.memory_space<vmem>>, %arg14: memref<1x64xf32, #tpu.memory_space<vmem>>, %arg15: memref<64x128xbf16, #tpu.memory_space<vmem>>, %arg16: memref<1x128xf32, #tpu.memory_space<vmem>>, %arg17: memref<128x64xbf16, #tpu.memory_space<vmem>>, %arg18: memref<1x64xf32, #tpu.memory_space<vmem>>, %arg19: memref<1x64xf32, #tpu.memory_space<vmem>>, %arg20: memref<1x64xf32, #tpu.memory_space<vmem>>, %arg21: memref<64x128xbf16, #tpu.memory_space<vmem>>, %arg22: memref<1x128xf32, #tpu.memory_space<vmem>>, %arg23: memref<1x24x128xf32, #tpu.memory_space<vmem>>, %arg24: memref<24x64xf32, #tpu.memory_space<vmem>>, %arg25: memref<4x16x24xbf16, #tpu.memory_space<vmem>>, %arg26: memref<4x24x16xbf16, #tpu.memory_space<vmem>>, %arg27: memref<4x24x16xbf16, #tpu.memory_space<vmem>>, %arg28: memref<24x64xbf16, #tpu.memory_space<vmem>>) attributes {dimension_semantics = [#tpu.dimension_semantics<parallel>, #tpu.dimension_semantics<arbitrary>], iteration_bounds = array<i64: 2, 1>, scalar_prefetch = 0 : i64, scratch_operands = 5 : i64, tpu.core_type = #tpu.core_type<tc>, window_params = [{transform_indices = @transform_0, window_bounds = array<i64: 1, 24, 64>}, {pipeline_mode = #tpu.pipeline_mode<synchronous>, transform_indices = @transform_1, window_bounds = array<i64: 64, 64>}, {pipeline_mode = #tpu.pipeline_mode<synchronous>, transform_indices = @transform_2, window_bounds = array<i64: 1, 64>}, {pipeline_mode = #tpu.pipeline_mode<synchronous>, transform_indices = @transform_3, window_bounds = array<i64: 64, 64>}, {pipeline_mode = #tpu.pipeline_mode<synchronous>, transform_indices = @transform_4, window_bounds = array<i64: 1, 64>}, {pipeline_mode = #tpu.pipeline_mode<synchronous>, transform_indices = @transform_5, window_bounds = array<i64: 64, 64>}, {pipeline_mode = #tpu.pipeline_mode<synchronous>, transform_indices = @transform_6, window_bounds = array<i64: 64, 1>}, {pipeline_mode = #tpu.pipeline_mode<synchronous>, transform_indices = @transform_7, window_bounds = array<i64: 64, 64>}, {pipeline_mode = #tpu.pipeline_mode<synchronous>, transform_indices = @transform_8, window_bounds = array<i64: 1, 64>}, {pipeline_mode = #tpu.pipeline_mode<synchronous>, transform_indices = @transform_9, window_bounds = array<i64: 64, 64>}, {pipeline_mode = #tpu.pipeline_mode<synchronous>, transform_indices = @transform_10, window_bounds = array<i64: 1, 64>}, {pipeline_mode = #tpu.pipeline_mode<synchronous>, transform_indices = @transform_11, window_bounds = array<i64: 1, 64>}, {pipeline_mode = #tpu.pipeline_mode<synchronous>, transform_indices = @transform_12, window_bounds = array<i64: 1, 64>}, {pipeline_mode = #tpu.pipeline_mode<synchronous>, transform_indices = @transform_13, window_bounds = array<i64: 64, 128>}, {pipeline_mode = #tpu.pipeline_mode<synchronous>, transform_indices = @transform_14, window_bounds = array<i64: 1, 128>}, {pipeline_mode = #tpu.pipeline_mode<synchronous>, transform_indices = @transform_15, window_bounds = array<i64: 128, 64>}, {pipeline_mode = #tpu.pipeline_mode<synchronous>, transform_indices = @transform_16, window_bounds = array<i64: 1, 64>}, {pipeline_mode = #tpu.pipeline_mode<synchronous>, transform_indices = @transform_17, window_bounds = array<i64: 1, 64>}, {pipeline_mode = #tpu.pipeline_mode<synchronous>, transform_indices = @transform_18, window_bounds = array<i64: 1, 64>}, {pipeline_mode = #tpu.pipeline_mode<synchronous>, transform_indices = @transform_19, window_bounds = array<i64: 64, 128>}, {pipeline_mode = #tpu.pipeline_mode<synchronous>, transform_indices = @transform_20, window_bounds = array<i64: 1, 128>}, {transform_indices = @transform_21, window_bounds = array<i64: 1, 24, 128>}]} {
    %c0_i32 = arith.constant 0 : i32
    %0 = arith.cmpi eq, %arg1, %c0_i32 : i32
    %1 = arith.extui %0 : i1 to i32
    %c0_i32_0 = arith.constant 0 : i32
    %2 = arith.cmpi ne, %1, %c0_i32_0 : i32
    scf.if %2 {
      %c0_91 = arith.constant 0 : index
      %c0_92 = arith.constant 0 : index
      %c0_93 = arith.constant 0 : index
      %191 = vector.load %arg2[%c0_91, %c0_92, %c0_93] : memref<1x24x64xf32, #tpu.memory_space<vmem>>, vector<1x24x64xf32>
      %192 = vector.shape_cast %191 : vector<1x24x64xf32> to vector<24x64xf32>
      %193 = arith.truncf %192 : vector<24x64xf32> to vector<24x64xbf16>
      %c0_94 = arith.constant 0 : index
      %c0_95 = arith.constant 0 : index
      %194 = vector.load %arg3[%c0_94, %c0_95] : memref<64x64xbf16, #tpu.memory_space<vmem>>, vector<64x64xbf16>
      %cst_96 = arith.constant dense<0.000000e+00> : vector<24x64xf32>
      %195 = tpu.matmul %193, %194, %cst_96 {dimension_numbers = #tpu.dot_dimension_numbers<[1], [0], [0], [1], [0, 0, 1, 1], [], []>} : vector<24x64xbf16>, vector<64x64xbf16>, vector<24x64xf32> -> vector<24x64xf32>
      %c0_97 = arith.constant 0 : index
      %c0_98 = arith.constant 0 : index
      %196 = vector.load %arg4[%c0_97, %c0_98] : memref<1x64xf32, #tpu.memory_space<vmem>>, vector<1x64xf32>
      %197 = vector.broadcast %196 : vector<1x64xf32> to vector<24x64xf32>
      %198 = arith.addf %195, %197 : vector<24x64xf32>
      %c0_99 = arith.constant 0 : index
      %c0_100 = arith.constant 0 : index
      %199 = vector.load %arg24[%c0_99, %c0_100] : memref<24x64xf32, #tpu.memory_space<vmem>>, vector<24x64xf32>
      tpu.vector_store %arg24[%c0_99, %c0_100], %198 {strides = array<i32>} : memref<24x64xf32, #tpu.memory_space<vmem>>, vector<24x64xf32>,
      %200 = tpu.transpose %198, [1, 0] : vector<24x64xf32> -> vector<64x24xf32>
      %201 = arith.truncf %200 : vector<64x24xf32> to vector<64x24xbf16>
      %c0_101 = arith.constant 0 : index
      %c0_102 = arith.constant 0 : index
      %202 = vector.load %arg7[%c0_101, %c0_102] : memref<64x64xbf16, #tpu.memory_space<vmem>>, vector<64x64xbf16>
      %cst_103 = arith.constant dense<0.000000e+00> : vector<64x24xf32>
      %203 = tpu.matmul %202, %201, %cst_103 {dimension_numbers = #tpu.dot_dimension_numbers<[1], [0], [0], [1], [0, 0, 1, 1], [], []>} : vector<64x64xbf16>, vector<64x24xbf16>, vector<64x24xf32> -> vector<64x24xf32>
      %c0_104 = arith.constant 0 : index
      %c0_105 = arith.constant 0 : index
      %204 = vector.load %arg8[%c0_104, %c0_105] : memref<64x1xf32, #tpu.memory_space<vmem>>, vector<64x1xf32>
      %205 = vector.broadcast %204 : vector<64x1xf32> to vector<64x24xf32>
      %206 = arith.addf %203, %205 : vector<64x24xf32>
      %207 = vector.extract_strided_slice %206 {offsets = [0, 0], sizes = [16, 24], strides = [1, 1]} : vector<64x24xf32> to vector<16x24xf32>
      %208 = arith.truncf %207 : vector<16x24xf32> to vector<16x24xbf16>
      %c0_106 = arith.constant 0 : index
      %c0_107 = arith.constant 0 : index
      %c0_108 = arith.constant 0 : index
      %209 = vector.load %arg25[%c0_106, %c0_107, %c0_108] : memref<4x16x24xbf16, #tpu.memory_space<vmem>>, vector<1x16x24xbf16>
      %210 = vector.shape_cast %209 : vector<1x16x24xbf16> to vector<16x24xbf16>
      %211 = vector.shape_cast %208 : vector<16x24xbf16> to vector<1x16x24xbf16>
      tpu.vector_store %arg25[%c0_106, %c0_107, %c0_108], %211 {strides = array<i32>} : memref<4x16x24xbf16, #tpu.memory_space<vmem>>, vector<1x16x24xbf16>,
      %212 = vector.extract_strided_slice %206 {offsets = [16, 0], sizes = [16, 24], strides = [1, 1]} : vector<64x24xf32> to vector<16x24xf32>
      %213 = arith.truncf %212 : vector<16x24xf32> to vector<16x24xbf16>
      %c1_109 = arith.constant 1 : index
      %c0_110 = arith.constant 0 : index
      %c0_111 = arith.constant 0 : index
      %214 = vector.load %arg25[%c1_109, %c0_110, %c0_111] : memref<4x16x24xbf16, #tpu.memory_space<vmem>>, vector<1x16x24xbf16>
      %215 = vector.shape_cast %214 : vector<1x16x24xbf16> to vector<16x24xbf16>
      %216 = vector.shape_cast %213 : vector<16x24xbf16> to vector<1x16x24xbf16>
      tpu.vector_store %arg25[%c1_109, %c0_110, %c0_111], %216 {strides = array<i32>} : memref<4x16x24xbf16, #tpu.memory_space<vmem>>, vector<1x16x24xbf16>,
      %217 = vector.extract_strided_slice %206 {offsets = [32, 0], sizes = [16, 24], strides = [1, 1]} : vector<64x24xf32> to vector<16x24xf32>
      %218 = arith.truncf %217 : vector<16x24xf32> to vector<16x24xbf16>
      %c2_112 = arith.constant 2 : index
      %c0_113 = arith.constant 0 : index
      %c0_114 = arith.constant 0 : index
      %219 = vector.load %arg25[%c2_112, %c0_113, %c0_114] : memref<4x16x24xbf16, #tpu.memory_space<vmem>>, vector<1x16x24xbf16>
      %220 = vector.shape_cast %219 : vector<1x16x24xbf16> to vector<16x24xbf16>
      %221 = vector.shape_cast %218 : vector<16x24xbf16> to vector<1x16x24xbf16>
      tpu.vector_store %arg25[%c2_112, %c0_113, %c0_114], %221 {strides = array<i32>} : memref<4x16x24xbf16, #tpu.memory_space<vmem>>, vector<1x16x24xbf16>,
      %222 = vector.extract_strided_slice %206 {offsets = [48, 0], sizes = [16, 24], strides = [1, 1]} : vector<64x24xf32> to vector<16x24xf32>
      %223 = arith.truncf %222 : vector<16x24xf32> to vector<16x24xbf16>
      %c3_115 = arith.constant 3 : index
      %c0_116 = arith.constant 0 : index
      %c0_117 = arith.constant 0 : index
      %224 = vector.load %arg25[%c3_115, %c0_116, %c0_117] : memref<4x16x24xbf16, #tpu.memory_space<vmem>>, vector<1x16x24xbf16>
      %225 = vector.shape_cast %224 : vector<1x16x24xbf16> to vector<16x24xbf16>
      %226 = vector.shape_cast %223 : vector<16x24xbf16> to vector<1x16x24xbf16>
      tpu.vector_store %arg25[%c3_115, %c0_116, %c0_117], %226 {strides = array<i32>} : memref<4x16x24xbf16, #tpu.memory_space<vmem>>, vector<1x16x24xbf16>,
      %227 = arith.truncf %198 : vector<24x64xf32> to vector<24x64xbf16>
      %c0_118 = arith.constant 0 : index
      %c0_119 = arith.constant 0 : index
      %228 = vector.load %arg9[%c0_118, %c0_119] : memref<64x64xbf16, #tpu.memory_space<vmem>>, vector<64x64xbf16>
      %cst_120 = arith.constant dense<0.000000e+00> : vector<24x64xf32>
      %229 = tpu.matmul %227, %228, %cst_120 {dimension_numbers = #tpu.dot_dimension_numbers<[1], [0], [0], [1], [0, 0, 1, 1], [], []>} : vector<24x64xbf16>, vector<64x64xbf16>, vector<24x64xf32> -> vector<24x64xf32>
      %c0_121 = arith.constant 0 : index
      %c0_122 = arith.constant 0 : index
      %230 = vector.load %arg10[%c0_121, %c0_122] : memref<1x64xf32, #tpu.memory_space<vmem>>, vector<1x64xf32>
      %231 = vector.broadcast %230 : vector<1x64xf32> to vector<24x64xf32>
      %232 = arith.addf %229, %231 : vector<24x64xf32>
      %233 = vector.extract_strided_slice %232 {offsets = [0, 0], sizes = [24, 16], strides = [1, 1]} : vector<24x64xf32> to vector<24x16xf32>
      %234 = arith.truncf %233 : vector<24x16xf32> to vector<24x16xbf16>
      %c0_123 = arith.constant 0 : index
      %c0_124 = arith.constant 0 : index
      %c0_125 = arith.constant 0 : index
      %235 = vector.load %arg26[%c0_123, %c0_124, %c0_125] : memref<4x24x16xbf16, #tpu.memory_space<vmem>>, vector<1x24x16xbf16>
      %236 = vector.shape_cast %235 : vector<1x24x16xbf16> to vector<24x16xbf16>
      %237 = vector.shape_cast %234 : vector<24x16xbf16> to vector<1x24x16xbf16>
      tpu.vector_store %arg26[%c0_123, %c0_124, %c0_125], %237 {strides = array<i32>} : memref<4x24x16xbf16, #tpu.memory_space<vmem>>, vector<1x24x16xbf16>,
      %238 = vector.extract_strided_slice %232 {offsets = [0, 16], sizes = [24, 16], strides = [1, 1]} : vector<24x64xf32> to vector<24x16xf32>
      %239 = arith.truncf %238 : vector<24x16xf32> to vector<24x16xbf16>
      %c1_126 = arith.constant 1 : index
      %c0_127 = arith.constant 0 : index
      %c0_128 = arith.constant 0 : index
      %240 = vector.load %arg26[%c1_126, %c0_127, %c0_128] : memref<4x24x16xbf16, #tpu.memory_space<vmem>>, vector<1x24x16xbf16>
      %241 = vector.shape_cast %240 : vector<1x24x16xbf16> to vector<24x16xbf16>
      %242 = vector.shape_cast %239 : vector<24x16xbf16> to vector<1x24x16xbf16>
      tpu.vector_store %arg26[%c1_126, %c0_127, %c0_128], %242 {strides = array<i32>} : memref<4x24x16xbf16, #tpu.memory_space<vmem>>, vector<1x24x16xbf16>,
      %243 = vector.extract_strided_slice %232 {offsets = [0, 32], sizes = [24, 16], strides = [1, 1]} : vector<24x64xf32> to vector<24x16xf32>
      %244 = arith.truncf %243 : vector<24x16xf32> to vector<24x16xbf16>
      %c2_129 = arith.constant 2 : index
      %c0_130 = arith.constant 0 : index
      %c0_131 = arith.constant 0 : index
      %245 = vector.load %arg26[%c2_129, %c0_130, %c0_131] : memref<4x24x16xbf16, #tpu.memory_space<vmem>>, vector<1x24x16xbf16>
      %246 = vector.shape_cast %245 : vector<1x24x16xbf16> to vector<24x16xbf16>
      %247 = vector.shape_cast %244 : vector<24x16xbf16> to vector<1x24x16xbf16>
      tpu.vector_store %arg26[%c2_129, %c0_130, %c0_131], %247 {strides = array<i32>} : memref<4x24x16xbf16, #tpu.memory_space<vmem>>, vector<1x24x16xbf16>,
      %248 = vector.extract_strided_slice %232 {offsets = [0, 48], sizes = [24, 16], strides = [1, 1]} : vector<24x64xf32> to vector<24x16xf32>
      %249 = arith.truncf %248 : vector<24x16xf32> to vector<24x16xbf16>
      %c3_132 = arith.constant 3 : index
      %c0_133 = arith.constant 0 : index
      %c0_134 = arith.constant 0 : index
      %250 = vector.load %arg26[%c3_132, %c0_133, %c0_134] : memref<4x24x16xbf16, #tpu.memory_space<vmem>>, vector<1x24x16xbf16>
      %251 = vector.shape_cast %250 : vector<1x24x16xbf16> to vector<24x16xbf16>
      %252 = vector.shape_cast %249 : vector<24x16xbf16> to vector<1x24x16xbf16>
      tpu.vector_store %arg26[%c3_132, %c0_133, %c0_134], %252 {strides = array<i32>} : memref<4x24x16xbf16, #tpu.memory_space<vmem>>, vector<1x24x16xbf16>,
    } else {
    }
    %c24_i32 = arith.constant 24 : i32
    %3 = arith.muli %arg1, %c24_i32 : i32
    %4 = tpu.assume_multiple %3, 24 : i32
    %5 = arith.index_cast %4 : i32 to index
    %c0 = arith.constant 0 : index
    %6 = vector.load %arg24[%5, %c0] : memref<24x64xf32, #tpu.memory_space<vmem>>, vector<24x64xf32>
    %7 = arith.truncf %6 : vector<24x64xf32> to vector<24x64xbf16>
    %c0_1 = arith.constant 0 : index
    %c0_2 = arith.constant 0 : index
    %8 = vector.load %arg5[%c0_1, %c0_2] : memref<64x64xbf16, #tpu.memory_space<vmem>>, vector<64x64xbf16>
    %cst = arith.constant dense<0.000000e+00> : vector<24x64xf32>
    %9 = tpu.matmul %7, %8, %cst {dimension_numbers = #tpu.dot_dimension_numbers<[1], [0], [0], [1], [0, 0, 1, 1], [], []>} : vector<24x64xbf16>, vector<64x64xbf16>, vector<24x64xf32> -> vector<24x64xf32>
    %c0_3 = arith.constant 0 : index
    %c0_4 = arith.constant 0 : index
    %10 = vector.load %arg6[%c0_3, %c0_4] : memref<1x64xf32, #tpu.memory_space<vmem>>, vector<1x64xf32>
    %11 = vector.broadcast %10 : vector<1x64xf32> to vector<24x64xf32>
    %12 = arith.addf %9, %11 : vector<24x64xf32>
    %13 = vector.extract_strided_slice %12 {offsets = [0, 0], sizes = [24, 16], strides = [1, 1]} : vector<24x64xf32> to vector<24x16xf32>
    %14 = arith.truncf %13 : vector<24x16xf32> to vector<24x16xbf16>
    %c0_5 = arith.constant 0 : index
    %c0_6 = arith.constant 0 : index
    %c0_7 = arith.constant 0 : index
    %15 = vector.load %arg27[%c0_5, %c0_6, %c0_7] : memref<4x24x16xbf16, #tpu.memory_space<vmem>>, vector<1x24x16xbf16>
    %16 = vector.shape_cast %15 : vector<1x24x16xbf16> to vector<24x16xbf16>
    %17 = vector.shape_cast %14 : vector<24x16xbf16> to vector<1x24x16xbf16>
    tpu.vector_store %arg27[%c0_5, %c0_6, %c0_7], %17 {strides = array<i32>} : memref<4x24x16xbf16, #tpu.memory_space<vmem>>, vector<1x24x16xbf16>,
    %18 = vector.extract_strided_slice %12 {offsets = [0, 16], sizes = [24, 16], strides = [1, 1]} : vector<24x64xf32> to vector<24x16xf32>
    %19 = arith.truncf %18 : vector<24x16xf32> to vector<24x16xbf16>
    %c1 = arith.constant 1 : index
    %c0_8 = arith.constant 0 : index
    %c0_9 = arith.constant 0 : index
    %20 = vector.load %arg27[%c1, %c0_8, %c0_9] : memref<4x24x16xbf16, #tpu.memory_space<vmem>>, vector<1x24x16xbf16>
    %21 = vector.shape_cast %20 : vector<1x24x16xbf16> to vector<24x16xbf16>
    %22 = vector.shape_cast %19 : vector<24x16xbf16> to vector<1x24x16xbf16>
    tpu.vector_store %arg27[%c1, %c0_8, %c0_9], %22 {strides = array<i32>} : memref<4x24x16xbf16, #tpu.memory_space<vmem>>, vector<1x24x16xbf16>,
    %23 = vector.extract_strided_slice %12 {offsets = [0, 32], sizes = [24, 16], strides = [1, 1]} : vector<24x64xf32> to vector<24x16xf32>
    %24 = arith.truncf %23 : vector<24x16xf32> to vector<24x16xbf16>
    %c2 = arith.constant 2 : index
    %c0_10 = arith.constant 0 : index
    %c0_11 = arith.constant 0 : index
    %25 = vector.load %arg27[%c2, %c0_10, %c0_11] : memref<4x24x16xbf16, #tpu.memory_space<vmem>>, vector<1x24x16xbf16>
    %26 = vector.shape_cast %25 : vector<1x24x16xbf16> to vector<24x16xbf16>
    %27 = vector.shape_cast %24 : vector<24x16xbf16> to vector<1x24x16xbf16>
    tpu.vector_store %arg27[%c2, %c0_10, %c0_11], %27 {strides = array<i32>} : memref<4x24x16xbf16, #tpu.memory_space<vmem>>, vector<1x24x16xbf16>,
    %28 = vector.extract_strided_slice %12 {offsets = [0, 48], sizes = [24, 16], strides = [1, 1]} : vector<24x64xf32> to vector<24x16xf32>
    %29 = arith.truncf %28 : vector<24x16xf32> to vector<24x16xbf16>
    %c3 = arith.constant 3 : index
    %c0_12 = arith.constant 0 : index
    %c0_13 = arith.constant 0 : index
    %30 = vector.load %arg27[%c3, %c0_12, %c0_13] : memref<4x24x16xbf16, #tpu.memory_space<vmem>>, vector<1x24x16xbf16>
    %31 = vector.shape_cast %30 : vector<1x24x16xbf16> to vector<24x16xbf16>
    %32 = vector.shape_cast %29 : vector<24x16xbf16> to vector<1x24x16xbf16>
    tpu.vector_store %arg27[%c3, %c0_12, %c0_13], %32 {strides = array<i32>} : memref<4x24x16xbf16, #tpu.memory_space<vmem>>, vector<1x24x16xbf16>,
    %c0_14 = arith.constant 0 : index
    %c0_15 = arith.constant 0 : index
    %c0_16 = arith.constant 0 : index
    %33 = vector.load %arg27[%c0_14, %c0_15, %c0_16] : memref<4x24x16xbf16, #tpu.memory_space<vmem>>, vector<4x24x16xbf16>
    %c0_17 = arith.constant 0 : index
    %c0_18 = arith.constant 0 : index
    %c0_19 = arith.constant 0 : index
    %34 = vector.load %arg25[%c0_17, %c0_18, %c0_19] : memref<4x16x24xbf16, #tpu.memory_space<vmem>>, vector<4x16x24xbf16>
    "tpu.trace_start"() <{level = 10 : i32, message = "gqd,gdk->gqk"}> : () -> ()
    %cst_20 = arith.constant dense<0.000000e+00> : vector<4x24x24xf32>
    %35 = tpu.matmul %33, %34, %cst_20 {dimension_numbers = #tpu.dot_dimension_numbers<[2], [1], [1], [2], [0, 0, 0, 1, 1, 2], [0], [0]>} : vector<4x24x16xbf16>, vector<4x16x24xbf16>, vector<4x24x24xf32> -> vector<4x24x24xf32>
    "tpu.trace_stop"() : () -> ()
    %36 = tpu.iota {dimensions = array<i32: 2>} : vector<4x24x24xi32>
    %c20_i32 = arith.constant 20 : i32
    %37 = vector.broadcast %c20_i32 : i32 to vector<4x24x24xi32>
    %38 = arith.cmpi slt, %36, %37 : vector<4x24x24xi32>
    %cst_21 = arith.constant -1.000000e+30 : f32
    %39 = vector.broadcast %cst_21 : f32 to vector<4x24x24xf32>
    %40 = arith.select %38, %35, %39 : vector<4x24x24xi1>, vector<4x24x24xf32>
    %cst_22 = arith.constant dense<0xFF800000> : vector<4x24xf32>
    %41 = vector.multi_reduction <maximumf>, %40, %cst_22 [2] : vector<4x24x24xf32> to vector<4x24xf32>
    %42 = vector.shape_cast %41 : vector<4x24xf32> to vector<4x24x1xf32>
    %43 = vector.broadcast %42 : vector<4x24x1xf32> to vector<4x24x24xf32>
    %44 = arith.subf %40, %43 : vector<4x24x24xf32>
    %45 = math.exp %44 : vector<4x24x24xf32>
    %cst_23 = arith.constant dense<0.000000e+00> : vector<4x24xf32>
    %46 = vector.multi_reduction <add>, %45, %cst_23 [2] : vector<4x24x24xf32> to vector<4x24xf32>
    %47 = vector.shape_cast %46 : vector<4x24xf32> to vector<4x24x1xf32>
    %48 = tpu.reciprocal %47 {approx = true} : vector<4x24x1xf32> -> vector<4x24x1xf32>
    %49 = vector.broadcast %48 : vector<4x24x1xf32> to vector<4x24x24xf32>
    %50 = arith.mulf %45, %49 : vector<4x24x24xf32>
    %51 = arith.truncf %50 : vector<4x24x24xf32> to vector<4x24x24xbf16>
    %c0_24 = arith.constant 0 : index
    %c0_25 = arith.constant 0 : index
    %c0_26 = arith.constant 0 : index
    %52 = vector.load %arg26[%c0_24, %c0_25, %c0_26] : memref<4x24x16xbf16, #tpu.memory_space<vmem>>, vector<4x24x16xbf16>
    "tpu.trace_start"() <{level = 10 : i32, message = "gqk,gkd->gqd"}> : () -> ()
    %cst_27 = arith.constant dense<0.000000e+00> : vector<4x24x16xf32>
    %53 = tpu.matmul %51, %52, %cst_27 {dimension_numbers = #tpu.dot_dimension_numbers<[2], [1], [1], [2], [0, 0, 0, 1, 1, 2], [0], [0]>} : vector<4x24x24xbf16>, vector<4x24x16xbf16>, vector<4x24x16xf32> -> vector<4x24x16xf32>
    "tpu.trace_stop"() : () -> ()
    %54 = vector.extract_strided_slice %53 {offsets = [0, 0, 0], sizes = [1, 24, 16], strides = [1, 1, 1]} : vector<4x24x16xf32> to vector<1x24x16xf32>
    %55 = vector.shape_cast %54 : vector<1x24x16xf32> to vector<24x16xf32>
    %56 = arith.truncf %55 : vector<24x16xf32> to vector<24x16xbf16>
    %c0_28 = arith.constant 0 : index
    %c0_29 = arith.constant 0 : index
    %57 = vector.load %arg28[%c0_28, %c0_29] : memref<24x64xbf16, #tpu.memory_space<vmem>>, vector<24x16xbf16>
    tpu.vector_store %arg28[%c0_28, %c0_29], %56 {strides = array<i32>} : memref<24x64xbf16, #tpu.memory_space<vmem>>, vector<24x16xbf16>,
    %58 = vector.extract_strided_slice %53 {offsets = [1, 0, 0], sizes = [1, 24, 16], strides = [1, 1, 1]} : vector<4x24x16xf32> to vector<1x24x16xf32>
    %59 = vector.shape_cast %58 : vector<1x24x16xf32> to vector<24x16xf32>
    %60 = arith.truncf %59 : vector<24x16xf32> to vector<24x16xbf16>
    %c0_30 = arith.constant 0 : index
    %c16 = arith.constant 16 : index
    %61 = vector.load %arg28[%c0_30, %c16] : memref<24x64xbf16, #tpu.memory_space<vmem>>, vector<24x16xbf16>
    tpu.vector_store %arg28[%c0_30, %c16], %60 {strides = array<i32>} : memref<24x64xbf16, #tpu.memory_space<vmem>>, vector<24x16xbf16>,
    %62 = vector.extract_strided_slice %53 {offsets = [2, 0, 0], sizes = [1, 24, 16], strides = [1, 1, 1]} : vector<4x24x16xf32> to vector<1x24x16xf32>
    %63 = vector.shape_cast %62 : vector<1x24x16xf32> to vector<24x16xf32>
    %64 = arith.truncf %63 : vector<24x16xf32> to vector<24x16xbf16>
    %c0_31 = arith.constant 0 : index
    %c32 = arith.constant 32 : index
    %65 = vector.load %arg28[%c0_31, %c32] : memref<24x64xbf16, #tpu.memory_space<vmem>>, vector<24x16xbf16>
    tpu.vector_store %arg28[%c0_31, %c32], %64 {strides = array<i32>} : memref<24x64xbf16, #tpu.memory_space<vmem>>, vector<24x16xbf16>,
    %66 = vector.extract_strided_slice %53 {offsets = [3, 0, 0], sizes = [1, 24, 16], strides = [1, 1, 1]} : vector<4x24x16xf32> to vector<1x24x16xf32>
    %67 = vector.shape_cast %66 : vector<1x24x16xf32> to vector<24x16xf32>
    %68 = arith.truncf %67 : vector<24x16xf32> to vector<24x16xbf16>
    %c0_32 = arith.constant 0 : index
    %c48 = arith.constant 48 : index
    %69 = vector.load %arg28[%c0_32, %c48] : memref<24x64xbf16, #tpu.memory_space<vmem>>, vector<24x16xbf16>
    tpu.vector_store %arg28[%c0_32, %c48], %68 {strides = array<i32>} : memref<24x64xbf16, #tpu.memory_space<vmem>>, vector<24x16xbf16>,
    %c0_33 = arith.constant 0 : index
    %c0_34 = arith.constant 0 : index
    %70 = vector.load %arg28[%c0_33, %c0_34] : memref<24x64xbf16, #tpu.memory_space<vmem>>, vector<24x64xbf16>
    %c0_35 = arith.constant 0 : index
    %c0_36 = arith.constant 0 : index
    %71 = vector.load %arg11[%c0_35, %c0_36] : memref<64x64xbf16, #tpu.memory_space<vmem>>, vector<64x64xbf16>
    %cst_37 = arith.constant dense<0.000000e+00> : vector<24x64xf32>
    %72 = tpu.matmul %70, %71, %cst_37 {dimension_numbers = #tpu.dot_dimension_numbers<[1], [0], [0], [1], [0, 0, 1, 1], [], []>} : vector<24x64xbf16>, vector<64x64xbf16>, vector<24x64xf32> -> vector<24x64xf32>
    %c0_38 = arith.constant 0 : index
    %c0_39 = arith.constant 0 : index
    %73 = vector.load %arg12[%c0_38, %c0_39] : memref<1x64xf32, #tpu.memory_space<vmem>>, vector<1x64xf32>
    %74 = vector.broadcast %73 : vector<1x64xf32> to vector<24x64xf32>
    %75 = arith.addf %72, %74 : vector<24x64xf32>
    %76 = arith.addf %6, %75 : vector<24x64xf32>
    %c0_40 = arith.constant 0 : index
    %c0_41 = arith.constant 0 : index
    %77 = vector.load %arg13[%c0_40, %c0_41] : memref<1x64xf32, #tpu.memory_space<vmem>>, vector<1x64xf32>
    %c0_42 = arith.constant 0 : index
    %c0_43 = arith.constant 0 : index
    %78 = vector.load %arg14[%c0_42, %c0_43] : memref<1x64xf32, #tpu.memory_space<vmem>>, vector<1x64xf32>
    %cst_44 = arith.constant dense<0.000000e+00> : vector<24xf32>
    %79 = vector.multi_reduction <add>, %76, %cst_44 [1] : vector<24x64xf32> to vector<24xf32>
    %80 = vector.shape_cast %79 : vector<24xf32> to vector<24x1xf32>
    %cst_45 = arith.constant 6.400000e+01 : f32
    %81 = vector.broadcast %cst_45 : f32 to vector<24x1xf32>
    %82 = arith.divf %80, %81 : vector<24x1xf32>
    %83 = vector.broadcast %82 : vector<24x1xf32> to vector<24x64xf32>
    %84 = arith.subf %76, %83 : vector<24x64xf32>
    %85 = vector.broadcast %82 : vector<24x1xf32> to vector<24x64xf32>
    %86 = arith.subf %76, %85 : vector<24x64xf32>
    %87 = arith.mulf %84, %86 : vector<24x64xf32>
    %cst_46 = arith.constant dense<0.000000e+00> : vector<24xf32>
    %88 = vector.multi_reduction <add>, %87, %cst_46 [1] : vector<24x64xf32> to vector<24xf32>
    %89 = vector.shape_cast %88 : vector<24xf32> to vector<24x1xf32>
    %cst_47 = arith.constant 6.400000e+01 : f32
    %90 = vector.broadcast %cst_47 : f32 to vector<24x1xf32>
    %91 = arith.divf %89, %90 : vector<24x1xf32>
    %92 = vector.broadcast %82 : vector<24x1xf32> to vector<24x64xf32>
    %93 = arith.subf %76, %92 : vector<24x64xf32>
    %cst_48 = arith.constant 9.99999974E-6 : f32
    %94 = vector.broadcast %cst_48 : f32 to vector<24x1xf32>
    %95 = arith.addf %91, %94 : vector<24x1xf32>
    %96 = math.rsqrt %95 : vector<24x1xf32>
    %97 = vector.broadcast %96 : vector<24x1xf32> to vector<24x64xf32>
    %98 = arith.mulf %93, %97 : vector<24x64xf32>
    %99 = vector.broadcast %77 : vector<1x64xf32> to vector<24x64xf32>
    %100 = arith.mulf %98, %99 : vector<24x64xf32>
    %101 = vector.broadcast %78 : vector<1x64xf32> to vector<24x64xf32>
    %102 = arith.addf %100, %101 : vector<24x64xf32>
    %103 = arith.truncf %102 : vector<24x64xf32> to vector<24x64xbf16>
    %c0_49 = arith.constant 0 : index
    %c0_50 = arith.constant 0 : index
    %104 = vector.load %arg15[%c0_49, %c0_50] : memref<64x128xbf16, #tpu.memory_space<vmem>>, vector<64x128xbf16>
    %cst_51 = arith.constant dense<0.000000e+00> : vector<24x128xf32>
    %105 = tpu.matmul %103, %104, %cst_51 {dimension_numbers = #tpu.dot_dimension_numbers<[1], [0], [0], [1], [0, 0, 1, 1], [], []>} : vector<24x64xbf16>, vector<64x128xbf16>, vector<24x128xf32> -> vector<24x128xf32>
    %c0_52 = arith.constant 0 : index
    %c0_53 = arith.constant 0 : index
    %106 = vector.load %arg16[%c0_52, %c0_53] : memref<1x128xf32, #tpu.memory_space<vmem>>, vector<1x128xf32>
    %107 = vector.broadcast %106 : vector<1x128xf32> to vector<24x128xf32>
    %108 = arith.addf %105, %107 : vector<24x128xf32>
    %cst_54 = arith.constant 5.000000e-01 : f32
    %109 = vector.broadcast %cst_54 : f32 to vector<24x128xf32>
    %110 = arith.mulf %109, %108 : vector<24x128xf32>
    %cst_55 = arith.constant 0.707106769 : f32
    %111 = vector.broadcast %cst_55 : f32 to vector<24x128xf32>
    %112 = arith.mulf %108, %111 : vector<24x128xf32>
    %113 = math.absf %112 : vector<24x128xf32>
    %cst_56 = arith.constant 0.327591091 : f32
    %114 = vector.broadcast %cst_56 : f32 to vector<24x128xf32>
    %115 = arith.mulf %114, %113 : vector<24x128xf32>
    %cst_57 = arith.constant 1.000000e+00 : f32
    %116 = vector.broadcast %cst_57 : f32 to vector<24x128xf32>
    %117 = arith.addf %116, %115 : vector<24x128xf32>
    %cst_58 = arith.constant 1.000000e+00 : f32
    %118 = vector.broadcast %cst_58 : f32 to vector<24x128xf32>
    %119 = arith.divf %118, %117 : vector<24x128xf32>
    %cst_59 = arith.constant 1.06140542 : f32
    %120 = vector.broadcast %cst_59 : f32 to vector<24x128xf32>
    %121 = arith.mulf %120, %119 : vector<24x128xf32>
    %cst_60 = arith.constant -1.45315206 : f32
    %122 = vector.broadcast %cst_60 : f32 to vector<24x128xf32>
    %123 = arith.addf %121, %122 : vector<24x128xf32>
    %124 = arith.mulf %123, %119 : vector<24x128xf32>
    %cst_61 = arith.constant 1.42141378 : f32
    %125 = vector.broadcast %cst_61 : f32 to vector<24x128xf32>
    %126 = arith.addf %124, %125 : vector<24x128xf32>
    %127 = arith.mulf %126, %119 : vector<24x128xf32>
    %cst_62 = arith.constant -0.284496725 : f32
    %128 = vector.broadcast %cst_62 : f32 to vector<24x128xf32>
    %129 = arith.addf %127, %128 : vector<24x128xf32>
    %130 = arith.mulf %129, %119 : vector<24x128xf32>
    %cst_63 = arith.constant 0.254829586 : f32
    %131 = vector.broadcast %cst_63 : f32 to vector<24x128xf32>
    %132 = arith.addf %130, %131 : vector<24x128xf32>
    %133 = arith.mulf %132, %119 : vector<24x128xf32>
    %cst_64 = arith.constant 0.000000e+00 : f32
    %134 = vector.broadcast %cst_64 : f32 to vector<24x128xf32>
    %135 = arith.subf %134, %113 : vector<24x128xf32>
    %136 = arith.mulf %135, %113 : vector<24x128xf32>
    %137 = math.exp %136 : vector<24x128xf32>
    %138 = arith.mulf %133, %137 : vector<24x128xf32>
    %cst_65 = arith.constant 1.000000e+00 : f32
    %139 = vector.broadcast %cst_65 : f32 to vector<24x128xf32>
    %140 = arith.subf %139, %138 : vector<24x128xf32>
    %cst_66 = arith.constant 0.000000e+00 : f32
    %141 = vector.broadcast %cst_66 : f32 to vector<24x128xf32>
    %142 = arith.cmpf olt, %112, %141 : vector<24x128xf32>
    %cst_67 = arith.constant 0.000000e+00 : f32
    %143 = vector.broadcast %cst_67 : f32 to vector<24x128xf32>
    %144 = arith.subf %143, %140 : vector<24x128xf32>
    %145 = arith.select %142, %144, %140 : vector<24x128xi1>, vector<24x128xf32>
    %cst_68 = arith.constant 1.000000e+00 : f32
    %146 = vector.broadcast %cst_68 : f32 to vector<24x128xf32>
    %147 = arith.addf %146, %145 : vector<24x128xf32>
    %148 = arith.mulf %110, %147 : vector<24x128xf32>
    %149 = arith.truncf %148 : vector<24x128xf32> to vector<24x128xbf16>
    %c0_69 = arith.constant 0 : index
    %c0_70 = arith.constant 0 : index
    %150 = vector.load %arg17[%c0_69, %c0_70] : memref<128x64xbf16, #tpu.memory_space<vmem>>, vector<128x64xbf16>
    %cst_71 = arith.constant dense<0.000000e+00> : vector<24x64xf32>
    %151 = tpu.matmul %149, %150, %cst_71 {dimension_numbers = #tpu.dot_dimension_numbers<[1], [0], [0], [1], [0, 0, 1, 1], [], []>} : vector<24x128xbf16>, vector<128x64xbf16>, vector<24x64xf32> -> vector<24x64xf32>
    %c0_72 = arith.constant 0 : index
    %c0_73 = arith.constant 0 : index
    %152 = vector.load %arg18[%c0_72, %c0_73] : memref<1x64xf32, #tpu.memory_space<vmem>>, vector<1x64xf32>
    %153 = vector.broadcast %152 : vector<1x64xf32> to vector<24x64xf32>
    %154 = arith.addf %151, %153 : vector<24x64xf32>
    %155 = arith.addf %102, %154 : vector<24x64xf32>
    %c0_74 = arith.constant 0 : index
    %c0_75 = arith.constant 0 : index
    %156 = vector.load %arg19[%c0_74, %c0_75] : memref<1x64xf32, #tpu.memory_space<vmem>>, vector<1x64xf32>
    %c0_76 = arith.constant 0 : index
    %c0_77 = arith.constant 0 : index
    %157 = vector.load %arg20[%c0_76, %c0_77] : memref<1x64xf32, #tpu.memory_space<vmem>>, vector<1x64xf32>
    %cst_78 = arith.constant dense<0.000000e+00> : vector<24xf32>
    %158 = vector.multi_reduction <add>, %155, %cst_78 [1] : vector<24x64xf32> to vector<24xf32>
    %159 = vector.shape_cast %158 : vector<24xf32> to vector<24x1xf32>
    %cst_79 = arith.constant 6.400000e+01 : f32
    %160 = vector.broadcast %cst_79 : f32 to vector<24x1xf32>
    %161 = arith.divf %159, %160 : vector<24x1xf32>
    %162 = vector.broadcast %161 : vector<24x1xf32> to vector<24x64xf32>
    %163 = arith.subf %155, %162 : vector<24x64xf32>
    %164 = vector.broadcast %161 : vector<24x1xf32> to vector<24x64xf32>
    %165 = arith.subf %155, %164 : vector<24x64xf32>
    %166 = arith.mulf %163, %165 : vector<24x64xf32>
    %cst_80 = arith.constant dense<0.000000e+00> : vector<24xf32>
    %167 = vector.multi_reduction <add>, %166, %cst_80 [1] : vector<24x64xf32> to vector<24xf32>
    %168 = vector.shape_cast %167 : vector<24xf32> to vector<24x1xf32>
    %cst_81 = arith.constant 6.400000e+01 : f32
    %169 = vector.broadcast %cst_81 : f32 to vector<24x1xf32>
    %170 = arith.divf %168, %169 : vector<24x1xf32>
    %171 = vector.broadcast %161 : vector<24x1xf32> to vector<24x64xf32>
    %172 = arith.subf %155, %171 : vector<24x64xf32>
    %cst_82 = arith.constant 9.99999974E-6 : f32
    %173 = vector.broadcast %cst_82 : f32 to vector<24x1xf32>
    %174 = arith.addf %170, %173 : vector<24x1xf32>
    %175 = math.rsqrt %174 : vector<24x1xf32>
    %176 = vector.broadcast %175 : vector<24x1xf32> to vector<24x64xf32>
    %177 = arith.mulf %172, %176 : vector<24x64xf32>
    %178 = vector.broadcast %156 : vector<1x64xf32> to vector<24x64xf32>
    %179 = arith.mulf %177, %178 : vector<24x64xf32>
    %180 = vector.broadcast %157 : vector<1x64xf32> to vector<24x64xf32>
    %181 = arith.addf %179, %180 : vector<24x64xf32>
    %182 = arith.truncf %181 : vector<24x64xf32> to vector<24x64xbf16>
    %c0_83 = arith.constant 0 : index
    %c0_84 = arith.constant 0 : index
    %183 = vector.load %arg21[%c0_83, %c0_84] : memref<64x128xbf16, #tpu.memory_space<vmem>>, vector<64x128xbf16>
    %cst_85 = arith.constant dense<0.000000e+00> : vector<24x128xf32>
    %184 = tpu.matmul %182, %183, %cst_85 {dimension_numbers = #tpu.dot_dimension_numbers<[1], [0], [0], [1], [0, 0, 1, 1], [], []>} : vector<24x64xbf16>, vector<64x128xbf16>, vector<24x128xf32> -> vector<24x128xf32>
    %c0_86 = arith.constant 0 : index
    %c0_87 = arith.constant 0 : index
    %185 = vector.load %arg22[%c0_86, %c0_87] : memref<1x128xf32, #tpu.memory_space<vmem>>, vector<1x128xf32>
    %186 = vector.broadcast %185 : vector<1x128xf32> to vector<24x128xf32>
    %187 = arith.addf %184, %186 : vector<24x128xf32>
    %c0_88 = arith.constant 0 : index
    %c0_89 = arith.constant 0 : index
    %c0_90 = arith.constant 0 : index
    %188 = vector.load %arg23[%c0_88, %c0_89, %c0_90] : memref<1x24x128xf32, #tpu.memory_space<vmem>>, vector<1x24x128xf32>
    %189 = vector.shape_cast %188 : vector<1x24x128xf32> to vector<24x128xf32>
    %190 = vector.shape_cast %187 : vector<24x128xf32> to vector<1x24x128xf32>
    tpu.vector_store %arg23[%c0_88, %c0_89, %c0_90], %190 {strides = array<i32>} : memref<1x24x128xf32, #tpu.memory_space<vmem>>, vector<1x24x128xf32>,
    return
  }
  func.func @transform_0(%arg0: i32, %arg1: i32) -> (i32, i32, i32) {
    %c0_i32 = arith.constant 0 : i32
    %c0_i32_0 = arith.constant 0 : i32
    %c0_i32_1 = arith.constant 0 : i32
    return %arg0, %c0_i32, %c0_i32_0 : i32, i32, i32
  }
  func.func @transform_1(%arg0: i32, %arg1: i32) -> (i32, i32) {
    %c0_i32 = arith.constant 0 : i32
    %c0_i32_0 = arith.constant 0 : i32
    %c0_i32_1 = arith.constant 0 : i32
    return %c0_i32, %c0_i32_0 : i32, i32
  }
  func.func @transform_2(%arg0: i32, %arg1: i32) -> (i32, i32) {
    %c0_i32 = arith.constant 0 : i32
    %c0_i32_0 = arith.constant 0 : i32
    %c0_i32_1 = arith.constant 0 : i32
    return %c0_i32, %c0_i32_0 : i32, i32
  }
  func.func @transform_3(%arg0: i32, %arg1: i32) -> (i32, i32) {
    %c0_i32 = arith.constant 0 : i32
    %c0_i32_0 = arith.constant 0 : i32
    %c0_i32_1 = arith.constant 0 : i32
    return %c0_i32, %c0_i32_0 : i32, i32
  }
  func.func @transform_4(%arg0: i32, %arg1: i32) -> (i32, i32) {
    %c0_i32 = arith.constant 0 : i32
    %c0_i32_0 = arith.constant 0 : i32
    %c0_i32_1 = arith.constant 0 : i32
    return %c0_i32, %c0_i32_0 : i32, i32
  }
  func.func @transform_5(%arg0: i32, %arg1: i32) -> (i32, i32) {
    %c0_i32 = arith.constant 0 : i32
    %c0_i32_0 = arith.constant 0 : i32
    %c0_i32_1 = arith.constant 0 : i32
    return %c0_i32, %c0_i32_0 : i32, i32
  }
  func.func @transform_6(%arg0: i32, %arg1: i32) -> (i32, i32) {
    %c0_i32 = arith.constant 0 : i32
    %c0_i32_0 = arith.constant 0 : i32
    %c0_i32_1 = arith.constant 0 : i32
    return %c0_i32, %c0_i32_0 : i32, i32
  }
  func.func @transform_7(%arg0: i32, %arg1: i32) -> (i32, i32) {
    %c0_i32 = arith.constant 0 : i32
    %c0_i32_0 = arith.constant 0 : i32
    %c0_i32_1 = arith.constant 0 : i32
    return %c0_i32, %c0_i32_0 : i32, i32
  }
  func.func @transform_8(%arg0: i32, %arg1: i32) -> (i32, i32) {
    %c0_i32 = arith.constant 0 : i32
    %c0_i32_0 = arith.constant 0 : i32
    %c0_i32_1 = arith.constant 0 : i32
    return %c0_i32, %c0_i32_0 : i32, i32
  }
  func.func @transform_9(%arg0: i32, %arg1: i32) -> (i32, i32) {
    %c0_i32 = arith.constant 0 : i32
    %c0_i32_0 = arith.constant 0 : i32
    %c0_i32_1 = arith.constant 0 : i32
    return %c0_i32, %c0_i32_0 : i32, i32
  }
  func.func @transform_10(%arg0: i32, %arg1: i32) -> (i32, i32) {
    %c0_i32 = arith.constant 0 : i32
    %c0_i32_0 = arith.constant 0 : i32
    %c0_i32_1 = arith.constant 0 : i32
    return %c0_i32, %c0_i32_0 : i32, i32
  }
  func.func @transform_11(%arg0: i32, %arg1: i32) -> (i32, i32) {
    %c0_i32 = arith.constant 0 : i32
    %c0_i32_0 = arith.constant 0 : i32
    %c0_i32_1 = arith.constant 0 : i32
    return %c0_i32, %c0_i32_0 : i32, i32
  }
  func.func @transform_12(%arg0: i32, %arg1: i32) -> (i32, i32) {
    %c0_i32 = arith.constant 0 : i32
    %c0_i32_0 = arith.constant 0 : i32
    %c0_i32_1 = arith.constant 0 : i32
    return %c0_i32, %c0_i32_0 : i32, i32
  }
  func.func @transform_13(%arg0: i32, %arg1: i32) -> (i32, i32) {
    %c0_i32 = arith.constant 0 : i32
    %c0_i32_0 = arith.constant 0 : i32
    %c0_i32_1 = arith.constant 0 : i32
    return %c0_i32, %c0_i32_0 : i32, i32
  }
  func.func @transform_14(%arg0: i32, %arg1: i32) -> (i32, i32) {
    %c0_i32 = arith.constant 0 : i32
    %c0_i32_0 = arith.constant 0 : i32
    %c0_i32_1 = arith.constant 0 : i32
    return %c0_i32, %c0_i32_0 : i32, i32
  }
  func.func @transform_15(%arg0: i32, %arg1: i32) -> (i32, i32) {
    %c0_i32 = arith.constant 0 : i32
    %c0_i32_0 = arith.constant 0 : i32
    %c0_i32_1 = arith.constant 0 : i32
    return %c0_i32, %c0_i32_0 : i32, i32
  }
  func.func @transform_16(%arg0: i32, %arg1: i32) -> (i32, i32) {
    %c0_i32 = arith.constant 0 : i32
    %c0_i32_0 = arith.constant 0 : i32
    %c0_i32_1 = arith.constant 0 : i32
    return %c0_i32, %c0_i32_0 : i32, i32
  }
  func.func @transform_17(%arg0: i32, %arg1: i32) -> (i32, i32) {
    %c0_i32 = arith.constant 0 : i32
    %c0_i32_0 = arith.constant 0 : i32
    %c0_i32_1 = arith.constant 0 : i32
    return %c0_i32, %c0_i32_0 : i32, i32
  }
  func.func @transform_18(%arg0: i32, %arg1: i32) -> (i32, i32) {
    %c0_i32 = arith.constant 0 : i32
    %c0_i32_0 = arith.constant 0 : i32
    %c0_i32_1 = arith.constant 0 : i32
    return %c0_i32, %c0_i32_0 : i32, i32
  }
  func.func @transform_19(%arg0: i32, %arg1: i32) -> (i32, i32) {
    %c0_i32 = arith.constant 0 : i32
    %c0_i32_0 = arith.constant 0 : i32
    %c0_i32_1 = arith.constant 0 : i32
    return %c0_i32, %c0_i32_0 : i32, i32
  }
  func.func @transform_20(%arg0: i32, %arg1: i32) -> (i32, i32) {
    %c0_i32 = arith.constant 0 : i32
    %c0_i32_0 = arith.constant 0 : i32
    %c0_i32_1 = arith.constant 0 : i32
    return %c0_i32, %c0_i32_0 : i32, i32
  }
  func.func @transform_21(%arg0: i32, %arg1: i32) -> (i32, i32, i32) {
    %c0_i32 = arith.constant 0 : i32
    %c0_i32_0 = arith.constant 0 : i32
    return %arg0, %arg1, %c0_i32 : i32, i32, i32
  }
}

module attributes {stable_mosaic.version = 11 : i64} {
  func.func @_ee_branch_kernel(%arg0: i32, %arg1: i32, %arg2: memref<1x24x64xf32, #tpu.memory_space<vmem>>, %arg3: memref<64x64xbf16, #tpu.memory_space<vmem>>, %arg4: memref<1x64xf32, #tpu.memory_space<vmem>>, %arg5: memref<64x64xbf16, #tpu.memory_space<vmem>>, %arg6: memref<1x64xf32, #tpu.memory_space<vmem>>, %arg7: memref<64x64xbf16, #tpu.memory_space<vmem>>, %arg8: memref<64x1xf32, #tpu.memory_space<vmem>>, %arg9: memref<64x64xbf16, #tpu.memory_space<vmem>>, %arg10: memref<1x64xf32, #tpu.memory_space<vmem>>, %arg11: memref<64x64xbf16, #tpu.memory_space<vmem>>, %arg12: memref<1x64xf32, #tpu.memory_space<vmem>>, %arg13: memref<1x64xf32, #tpu.memory_space<vmem>>, %arg14: memref<1x64xf32, #tpu.memory_space<vmem>>, %arg15: memref<64x128xbf16, #tpu.memory_space<vmem>>, %arg16: memref<1x128xf32, #tpu.memory_space<vmem>>, %arg17: memref<128x64xbf16, #tpu.memory_space<vmem>>, %arg18: memref<1x64xf32, #tpu.memory_space<vmem>>, %arg19: memref<1x64xf32, #tpu.memory_space<vmem>>, %arg20: memref<1x64xf32, #tpu.memory_space<vmem>>, %arg21: memref<64x128xbf16, #tpu.memory_space<vmem>>, %arg22: memref<1x128xf32, #tpu.memory_space<vmem>>, %arg23: memref<1x24x128xf32, #tpu.memory_space<vmem>>, %arg24: memref<24x64xf32, #tpu.memory_space<vmem>>, %arg25: memref<4x16x24xbf16, #tpu.memory_space<vmem>>, %arg26: memref<4x24x16xbf16, #tpu.memory_space<vmem>>, %arg27: memref<4x24x16xbf16, #tpu.memory_space<vmem>>, %arg28: memref<24x64xbf16, #tpu.memory_space<vmem>>) attributes {dimension_semantics = [#tpu.dimension_semantics<parallel>, #tpu.dimension_semantics<arbitrary>], iteration_bounds = array<i64: 2, 1>, scalar_prefetch = 0 : i64, scratch_operands = 5 : i64, tpu.core_type = #tpu.core_type<tc>, window_params = [{transform_indices = @transform_0, window_bounds = array<i64: 1, 24, 64>}, {pipeline_mode = #tpu.pipeline_mode<synchronous>, transform_indices = @transform_1, window_bounds = array<i64: 64, 64>}, {pipeline_mode = #tpu.pipeline_mode<synchronous>, transform_indices = @transform_2, window_bounds = array<i64: 1, 64>}, {pipeline_mode = #tpu.pipeline_mode<synchronous>, transform_indices = @transform_3, window_bounds = array<i64: 64, 64>}, {pipeline_mode = #tpu.pipeline_mode<synchronous>, transform_indices = @transform_4, window_bounds = array<i64: 1, 64>}, {pipeline_mode = #tpu.pipeline_mode<synchronous>, transform_indices = @transform_5, window_bounds = array<i64: 64, 64>}, {pipeline_mode = #tpu.pipeline_mode<synchronous>, transform_indices = @transform_6, window_bounds = array<i64: 64, 1>}, {pipeline_mode = #tpu.pipeline_mode<synchronous>, transform_indices = @transform_7, window_bounds = array<i64: 64, 64>}, {pipeline_mode = #tpu.pipeline_mode<synchronous>, transform_indices = @transform_8, window_bounds = array<i64: 1, 64>}, {pipeline_mode = #tpu.pipeline_mode<synchronous>, transform_indices = @transform_9, window_bounds = array<i64: 64, 64>}, {pipeline_mode = #tpu.pipeline_mode<synchronous>, transform_indices = @transform_10, window_bounds = array<i64: 1, 64>}, {pipeline_mode = #tpu.pipeline_mode<synchronous>, transform_indices = @transform_11, window_bounds = array<i64: 1, 64>}, {pipeline_mode = #tpu.pipeline_mode<synchronous>, transform_indices = @transform_12, window_bounds = array<i64: 1, 64>}, {pipeline_mode = #tpu.pipeline_mode<synchronous>, transform_indices = @transform_13, window_bounds = array<i64: 64, 128>}, {pipeline_mode = #tpu.pipeline_mode<synchronous>, transform_indices = @transform_14, window_bounds = array<i64: 1, 128>}, {pipeline_mode = #tpu.pipeline_mode<synchronous>, transform_indices = @transform_15, window_bounds = array<i64: 128, 64>}, {pipeline_mode = #tpu.pipeline_mode<synchronous>, transform_indices = @transform_16, window_bounds = array<i64: 1, 64>}, {pipeline_mode = #tpu.pipeline_mode<synchronous>, transform_indices = @transform_17, window_bounds = array<i64: 1, 64>}, {pipeline_mode = #tpu.pipeline_mode<synchronous>, transform_indices = @transform_18, window_bounds = array<i64: 1, 64>}, {pipeline_mode = #tpu.pipeline_mode<synchronous>, transform_indices = @transform_19, window_bounds = array<i64: 64, 128>}, {pipeline_mode = #tpu.pipeline_mode<synchronous>, transform_indices = @transform_20, window_bounds = array<i64: 1, 128>}, {transform_indices = @transform_21, window_bounds = array<i64: 1, 24, 128>}]} {
    %c0_i32 = arith.constant 0 : i32
    %0 = arith.cmpi eq, %arg1, %c0_i32 : i32
    %1 = arith.extui %0 : i1 to i32
    %c0_i32_0 = arith.constant 0 : i32
    %2 = arith.cmpi ne, %1, %c0_i32_0 : i32
    scf.if %2 {
      %c0_91 = arith.constant 0 : index
      %c0_92 = arith.constant 0 : index
      %c0_93 = arith.constant 0 : index
      %191 = vector.load %arg2[%c0_91, %c0_92, %c0_93] : memref<1x24x64xf32, #tpu.memory_space<vmem>>, vector<1x24x64xf32>
      %192 = vector.shape_cast %191 : vector<1x24x64xf32> to vector<24x64xf32>
      %193 = arith.truncf %192 : vector<24x64xf32> to vector<24x64xbf16>
      %c0_94 = arith.constant 0 : index
      %c0_95 = arith.constant 0 : index
      %194 = vector.load %arg3[%c0_94, %c0_95] : memref<64x64xbf16, #tpu.memory_space<vmem>>, vector<64x64xbf16>
      %cst_96 = arith.constant dense<0.000000e+00> : vector<24x64xf32>
      %195 = tpu.matmul %193, %194, %cst_96 {dimension_numbers = #tpu.dot_dimension_numbers<[1], [0], [0], [1], [0, 0, 1, 1], [], []>} : vector<24x64xbf16>, vector<64x64xbf16>, vector<24x64xf32> -> vector<24x64xf32>
      %c0_97 = arith.constant 0 : index
      %c0_98 = arith.constant 0 : index
      %196 = vector.load %arg4[%c0_97, %c0_98] : memref<1x64xf32, #tpu.memory_space<vmem>>, vector<1x64xf32>
      %197 = vector.broadcast %196 : vector<1x64xf32> to vector<24x64xf32>
      %198 = arith.addf %195, %197 : vector<24x64xf32>
      %c0_99 = arith.constant 0 : index
      %c0_100 = arith.constant 0 : index
      %199 = vector.load %arg24[%c0_99, %c0_100] : memref<24x64xf32, #tpu.memory_space<vmem>>, vector<24x64xf32>
      tpu.vector_store %arg24[%c0_99, %c0_100], %198 {strides = array<i32>} : memref<24x64xf32, #tpu.memory_space<vmem>>, vector<24x64xf32>,
      %200 = tpu.transpose %198, [1, 0] : vector<24x64xf32> -> vector<64x24xf32>
      %201 = arith.truncf %200 : vector<64x24xf32> to vector<64x24xbf16>
      %c0_101 = arith.constant 0 : index
      %c0_102 = arith.constant 0 : index
      %202 = vector.load %arg7[%c0_101, %c0_102] : memref<64x64xbf16, #tpu.memory_space<vmem>>, vector<64x64xbf16>
      %cst_103 = arith.constant dense<0.000000e+00> : vector<64x24xf32>
      %203 = tpu.matmul %202, %201, %cst_103 {dimension_numbers = #tpu.dot_dimension_numbers<[1], [0], [0], [1], [0, 0, 1, 1], [], []>} : vector<64x64xbf16>, vector<64x24xbf16>, vector<64x24xf32> -> vector<64x24xf32>
      %c0_104 = arith.constant 0 : index
      %c0_105 = arith.constant 0 : index
      %204 = vector.load %arg8[%c0_104, %c0_105] : memref<64x1xf32, #tpu.memory_space<vmem>>, vector<64x1xf32>
      %205 = vector.broadcast %204 : vector<64x1xf32> to vector<64x24xf32>
      %206 = arith.addf %203, %205 : vector<64x24xf32>
      %207 = vector.extract_strided_slice %206 {offsets = [0, 0], sizes = [16, 24], strides = [1, 1]} : vector<64x24xf32> to vector<16x24xf32>
      %208 = arith.truncf %207 : vector<16x24xf32> to vector<16x24xbf16>
      %c0_106 = arith.constant 0 : index
      %c0_107 = arith.constant 0 : index
      %c0_108 = arith.constant 0 : index
      %209 = vector.load %arg25[%c0_106, %c0_107, %c0_108] : memref<4x16x24xbf16, #tpu.memory_space<vmem>>, vector<1x16x24xbf16>
      %210 = vector.shape_cast %209 : vector<1x16x24xbf16> to vector<16x24xbf16>
      %211 = vector.shape_cast %208 : vector<16x24xbf16> to vector<1x16x24xbf16>
      tpu.vector_store %arg25[%c0_106, %c0_107, %c0_108], %211 {strides = array<i32>} : memref<4x16x24xbf16, #tpu.memory_space<vmem>>, vector<1x16x24xbf16>,
      %212 = vector.extract_strided_slice %206 {offsets = [16, 0], sizes = [16, 24], strides = [1, 1]} : vector<64x24xf32> to vector<16x24xf32>
      %213 = arith.truncf %212 : vector<16x24xf32> to vector<16x24xbf16>
      %c1_109 = arith.constant 1 : index
      %c0_110 = arith.constant 0 : index
      %c0_111 = arith.constant 0 : index
      %214 = vector.load %arg25[%c1_109, %c0_110, %c0_111] : memref<4x16x24xbf16, #tpu.memory_space<vmem>>, vector<1x16x24xbf16>
      %215 = vector.shape_cast %214 : vector<1x16x24xbf16> to vector<16x24xbf16>
      %216 = vector.shape_cast %213 : vector<16x24xbf16> to vector<1x16x24xbf16>
      tpu.vector_store %arg25[%c1_109, %c0_110, %c0_111], %216 {strides = array<i32>} : memref<4x16x24xbf16, #tpu.memory_space<vmem>>, vector<1x16x24xbf16>,
      %217 = vector.extract_strided_slice %206 {offsets = [32, 0], sizes = [16, 24], strides = [1, 1]} : vector<64x24xf32> to vector<16x24xf32>
      %218 = arith.truncf %217 : vector<16x24xf32> to vector<16x24xbf16>
      %c2_112 = arith.constant 2 : index
      %c0_113 = arith.constant 0 : index
      %c0_114 = arith.constant 0 : index
      %219 = vector.load %arg25[%c2_112, %c0_113, %c0_114] : memref<4x16x24xbf16, #tpu.memory_space<vmem>>, vector<1x16x24xbf16>
      %220 = vector.shape_cast %219 : vector<1x16x24xbf16> to vector<16x24xbf16>
      %221 = vector.shape_cast %218 : vector<16x24xbf16> to vector<1x16x24xbf16>
      tpu.vector_store %arg25[%c2_112, %c0_113, %c0_114], %221 {strides = array<i32>} : memref<4x16x24xbf16, #tpu.memory_space<vmem>>, vector<1x16x24xbf16>,
      %222 = vector.extract_strided_slice %206 {offsets = [48, 0], sizes = [16, 24], strides = [1, 1]} : vector<64x24xf32> to vector<16x24xf32>
      %223 = arith.truncf %222 : vector<16x24xf32> to vector<16x24xbf16>
      %c3_115 = arith.constant 3 : index
      %c0_116 = arith.constant 0 : index
      %c0_117 = arith.constant 0 : index
      %224 = vector.load %arg25[%c3_115, %c0_116, %c0_117] : memref<4x16x24xbf16, #tpu.memory_space<vmem>>, vector<1x16x24xbf16>
      %225 = vector.shape_cast %224 : vector<1x16x24xbf16> to vector<16x24xbf16>
      %226 = vector.shape_cast %223 : vector<16x24xbf16> to vector<1x16x24xbf16>
      tpu.vector_store %arg25[%c3_115, %c0_116, %c0_117], %226 {strides = array<i32>} : memref<4x16x24xbf16, #tpu.memory_space<vmem>>, vector<1x16x24xbf16>,
      %227 = arith.truncf %198 : vector<24x64xf32> to vector<24x64xbf16>
      %c0_118 = arith.constant 0 : index
      %c0_119 = arith.constant 0 : index
      %228 = vector.load %arg9[%c0_118, %c0_119] : memref<64x64xbf16, #tpu.memory_space<vmem>>, vector<64x64xbf16>
      %cst_120 = arith.constant dense<0.000000e+00> : vector<24x64xf32>
      %229 = tpu.matmul %227, %228, %cst_120 {dimension_numbers = #tpu.dot_dimension_numbers<[1], [0], [0], [1], [0, 0, 1, 1], [], []>} : vector<24x64xbf16>, vector<64x64xbf16>, vector<24x64xf32> -> vector<24x64xf32>
      %c0_121 = arith.constant 0 : index
      %c0_122 = arith.constant 0 : index
      %230 = vector.load %arg10[%c0_121, %c0_122] : memref<1x64xf32, #tpu.memory_space<vmem>>, vector<1x64xf32>
      %231 = vector.broadcast %230 : vector<1x64xf32> to vector<24x64xf32>
      %232 = arith.addf %229, %231 : vector<24x64xf32>
      %233 = vector.extract_strided_slice %232 {offsets = [0, 0], sizes = [24, 16], strides = [1, 1]} : vector<24x64xf32> to vector<24x16xf32>
      %234 = arith.truncf %233 : vector<24x16xf32> to vector<24x16xbf16>
      %c0_123 = arith.constant 0 : index
      %c0_124 = arith.constant 0 : index
      %c0_125 = arith.constant 0 : index
      %235 = vector.load %arg26[%c0_123, %c0_124, %c0_125] : memref<4x24x16xbf16, #tpu.memory_space<vmem>>, vector<1x24x16xbf16>
      %236 = vector.shape_cast %235 : vector<1x24x16xbf16> to vector<24x16xbf16>
      %237 = vector.shape_cast %234 : vector<24x16xbf16> to vector<1x24x16xbf16>
      tpu.vector_store %arg26[%c0_123, %c0_124, %c0_125], %237 {strides = array<i32>} : memref<4x24x16xbf16, #tpu.memory_space<vmem>>, vector<1x24x16xbf16>,
      %238 = vector.extract_strided_slice %232 {offsets = [0, 16], sizes = [24, 16], strides = [1, 1]} : vector<24x64xf32> to vector<24x16xf32>
      %239 = arith.truncf %238 : vector<24x16xf32> to vector<24x16xbf16>
      %c1_126 = arith.constant 1 : index
      %c0_127 = arith.constant 0 : index
      %c0_128 = arith.constant 0 : index
      %240 = vector.load %arg26[%c1_126, %c0_127, %c0_128] : memref<4x24x16xbf16, #tpu.memory_space<vmem>>, vector<1x24x16xbf16>
      %241 = vector.shape_cast %240 : vector<1x24x16xbf16> to vector<24x16xbf16>
      %242 = vector.shape_cast %239 : vector<24x16xbf16> to vector<1x24x16xbf16>
      tpu.vector_store %arg26[%c1_126, %c0_127, %c0_128], %242 {strides = array<i32>} : memref<4x24x16xbf16, #tpu.memory_space<vmem>>, vector<1x24x16xbf16>,
      %243 = vector.extract_strided_slice %232 {offsets = [0, 32], sizes = [24, 16], strides = [1, 1]} : vector<24x64xf32> to vector<24x16xf32>
      %244 = arith.truncf %243 : vector<24x16xf32> to vector<24x16xbf16>
      %c2_129 = arith.constant 2 : index
      %c0_130 = arith.constant 0 : index
      %c0_131 = arith.constant 0 : index
      %245 = vector.load %arg26[%c2_129, %c0_130, %c0_131] : memref<4x24x16xbf16, #tpu.memory_space<vmem>>, vector<1x24x16xbf16>
      %246 = vector.shape_cast %245 : vector<1x24x16xbf16> to vector<24x16xbf16>
      %247 = vector.shape_cast %244 : vector<24x16xbf16> to vector<1x24x16xbf16>
      tpu.vector_store %arg26[%c2_129, %c0_130, %c0_131], %247 {strides = array<i32>} : memref<4x24x16xbf16, #tpu.memory_space<vmem>>, vector<1x24x16xbf16>,
      %248 = vector.extract_strided_slice %232 {offsets = [0, 48], sizes = [24, 16], strides = [1, 1]} : vector<24x64xf32> to vector<24x16xf32>
      %249 = arith.truncf %248 : vector<24x16xf32> to vector<24x16xbf16>
      %c3_132 = arith.constant 3 : index
      %c0_133 = arith.constant 0 : index
      %c0_134 = arith.constant 0 : index
      %250 = vector.load %arg26[%c3_132, %c0_133, %c0_134] : memref<4x24x16xbf16, #tpu.memory_space<vmem>>, vector<1x24x16xbf16>
      %251 = vector.shape_cast %250 : vector<1x24x16xbf16> to vector<24x16xbf16>
      %252 = vector.shape_cast %249 : vector<24x16xbf16> to vector<1x24x16xbf16>
      tpu.vector_store %arg26[%c3_132, %c0_133, %c0_134], %252 {strides = array<i32>} : memref<4x24x16xbf16, #tpu.memory_space<vmem>>, vector<1x24x16xbf16>,
    } else {
    }
    %c24_i32 = arith.constant 24 : i32
    %3 = arith.muli %arg1, %c24_i32 : i32
    %4 = tpu.assume_multiple %3, 24 : i32
    %5 = arith.index_cast %4 : i32 to index
    %c0 = arith.constant 0 : index
    %6 = vector.load %arg24[%5, %c0] : memref<24x64xf32, #tpu.memory_space<vmem>>, vector<24x64xf32>
    %7 = arith.truncf %6 : vector<24x64xf32> to vector<24x64xbf16>
    %c0_1 = arith.constant 0 : index
    %c0_2 = arith.constant 0 : index
    %8 = vector.load %arg5[%c0_1, %c0_2] : memref<64x64xbf16, #tpu.memory_space<vmem>>, vector<64x64xbf16>
    %cst = arith.constant dense<0.000000e+00> : vector<24x64xf32>
    %9 = tpu.matmul %7, %8, %cst {dimension_numbers = #tpu.dot_dimension_numbers<[1], [0], [0], [1], [0, 0, 1, 1], [], []>} : vector<24x64xbf16>, vector<64x64xbf16>, vector<24x64xf32> -> vector<24x64xf32>
    %c0_3 = arith.constant 0 : index
    %c0_4 = arith.constant 0 : index
    %10 = vector.load %arg6[%c0_3, %c0_4] : memref<1x64xf32, #tpu.memory_space<vmem>>, vector<1x64xf32>
    %11 = vector.broadcast %10 : vector<1x64xf32> to vector<24x64xf32>
    %12 = arith.addf %9, %11 : vector<24x64xf32>
    %13 = vector.extract_strided_slice %12 {offsets = [0, 0], sizes = [24, 16], strides = [1, 1]} : vector<24x64xf32> to vector<24x16xf32>
    %14 = arith.truncf %13 : vector<24x16xf32> to vector<24x16xbf16>
    %c0_5 = arith.constant 0 : index
    %c0_6 = arith.constant 0 : index
    %c0_7 = arith.constant 0 : index
    %15 = vector.load %arg27[%c0_5, %c0_6, %c0_7] : memref<4x24x16xbf16, #tpu.memory_space<vmem>>, vector<1x24x16xbf16>
    %16 = vector.shape_cast %15 : vector<1x24x16xbf16> to vector<24x16xbf16>
    %17 = vector.shape_cast %14 : vector<24x16xbf16> to vector<1x24x16xbf16>
    tpu.vector_store %arg27[%c0_5, %c0_6, %c0_7], %17 {strides = array<i32>} : memref<4x24x16xbf16, #tpu.memory_space<vmem>>, vector<1x24x16xbf16>,
    %18 = vector.extract_strided_slice %12 {offsets = [0, 16], sizes = [24, 16], strides = [1, 1]} : vector<24x64xf32> to vector<24x16xf32>
    %19 = arith.truncf %18 : vector<24x16xf32> to vector<24x16xbf16>
    %c1 = arith.constant 1 : index
    %c0_8 = arith.constant 0 : index
    %c0_9 = arith.constant 0 : index
    %20 = vector.load %arg27[%c1, %c0_8, %c0_9] : memref<4x24x16xbf16, #tpu.memory_space<vmem>>, vector<1x24x16xbf16>
    %21 = vector.shape_cast %20 : vector<1x24x16xbf16> to vector<24x16xbf16>
    %22 = vector.shape_cast %19 : vector<24x16xbf16> to vector<1x24x16xbf16>
    tpu.vector_store %arg27[%c1, %c0_8, %c0_9], %22 {strides = array<i32>} : memref<4x24x16xbf16, #tpu.memory_space<vmem>>, vector<1x24x16xbf16>,
    %23 = vector.extract_strided_slice %12 {offsets = [0, 32], sizes = [24, 16], strides = [1, 1]} : vector<24x64xf32> to vector<24x16xf32>
    %24 = arith.truncf %23 : vector<24x16xf32> to vector<24x16xbf16>
    %c2 = arith.constant 2 : index
    %c0_10 = arith.constant 0 : index
    %c0_11 = arith.constant 0 : index
    %25 = vector.load %arg27[%c2, %c0_10, %c0_11] : memref<4x24x16xbf16, #tpu.memory_space<vmem>>, vector<1x24x16xbf16>
    %26 = vector.shape_cast %25 : vector<1x24x16xbf16> to vector<24x16xbf16>
    %27 = vector.shape_cast %24 : vector<24x16xbf16> to vector<1x24x16xbf16>
    tpu.vector_store %arg27[%c2, %c0_10, %c0_11], %27 {strides = array<i32>} : memref<4x24x16xbf16, #tpu.memory_space<vmem>>, vector<1x24x16xbf16>,
    %28 = vector.extract_strided_slice %12 {offsets = [0, 48], sizes = [24, 16], strides = [1, 1]} : vector<24x64xf32> to vector<24x16xf32>
    %29 = arith.truncf %28 : vector<24x16xf32> to vector<24x16xbf16>
    %c3 = arith.constant 3 : index
    %c0_12 = arith.constant 0 : index
    %c0_13 = arith.constant 0 : index
    %30 = vector.load %arg27[%c3, %c0_12, %c0_13] : memref<4x24x16xbf16, #tpu.memory_space<vmem>>, vector<1x24x16xbf16>
    %31 = vector.shape_cast %30 : vector<1x24x16xbf16> to vector<24x16xbf16>
    %32 = vector.shape_cast %29 : vector<24x16xbf16> to vector<1x24x16xbf16>
    tpu.vector_store %arg27[%c3, %c0_12, %c0_13], %32 {strides = array<i32>} : memref<4x24x16xbf16, #tpu.memory_space<vmem>>, vector<1x24x16xbf16>,
    %c0_14 = arith.constant 0 : index
    %c0_15 = arith.constant 0 : index
    %c0_16 = arith.constant 0 : index
    %33 = vector.load %arg27[%c0_14, %c0_15, %c0_16] : memref<4x24x16xbf16, #tpu.memory_space<vmem>>, vector<4x24x16xbf16>
    %c0_17 = arith.constant 0 : index
    %c0_18 = arith.constant 0 : index
    %c0_19 = arith.constant 0 : index
    %34 = vector.load %arg25[%c0_17, %c0_18, %c0_19] : memref<4x16x24xbf16, #tpu.memory_space<vmem>>, vector<4x16x24xbf16>
    "tpu.trace_start"() <{level = 10 : i32, message = "gqd,gdk->gqk"}> : () -> ()
    %cst_20 = arith.constant dense<0.000000e+00> : vector<4x24x24xf32>
    %35 = tpu.matmul %33, %34, %cst_20 {dimension_numbers = #tpu.dot_dimension_numbers<[2], [1], [1], [2], [0, 0, 0, 1, 1, 2], [0], [0]>} : vector<4x24x16xbf16>, vector<4x16x24xbf16>, vector<4x24x24xf32> -> vector<4x24x24xf32>
    "tpu.trace_stop"() : () -> ()
    %36 = tpu.iota {dimensions = array<i32: 2>} : vector<4x24x24xi32>
    %c20_i32 = arith.constant 20 : i32
    %37 = vector.broadcast %c20_i32 : i32 to vector<4x24x24xi32>
    %38 = arith.cmpi slt, %36, %37 : vector<4x24x24xi32>
    %cst_21 = arith.constant -1.000000e+30 : f32
    %39 = vector.broadcast %cst_21 : f32 to vector<4x24x24xf32>
    %40 = arith.select %38, %35, %39 : vector<4x24x24xi1>, vector<4x24x24xf32>
    %cst_22 = arith.constant dense<0xFF800000> : vector<4x24xf32>
    %41 = vector.multi_reduction <maximumf>, %40, %cst_22 [2] : vector<4x24x24xf32> to vector<4x24xf32>
    %42 = vector.shape_cast %41 : vector<4x24xf32> to vector<4x24x1xf32>
    %43 = vector.broadcast %42 : vector<4x24x1xf32> to vector<4x24x24xf32>
    %44 = arith.subf %40, %43 : vector<4x24x24xf32>
    %45 = math.exp %44 : vector<4x24x24xf32>
    %cst_23 = arith.constant dense<0.000000e+00> : vector<4x24xf32>
    %46 = vector.multi_reduction <add>, %45, %cst_23 [2] : vector<4x24x24xf32> to vector<4x24xf32>
    %47 = vector.shape_cast %46 : vector<4x24xf32> to vector<4x24x1xf32>
    %48 = tpu.reciprocal %47 {approx = true} : vector<4x24x1xf32> -> vector<4x24x1xf32>
    %49 = vector.broadcast %48 : vector<4x24x1xf32> to vector<4x24x24xf32>
    %50 = arith.mulf %45, %49 : vector<4x24x24xf32>
    %51 = arith.truncf %50 : vector<4x24x24xf32> to vector<4x24x24xbf16>
    %c0_24 = arith.constant 0 : index
    %c0_25 = arith.constant 0 : index
    %c0_26 = arith.constant 0 : index
    %52 = vector.load %arg26[%c0_24, %c0_25, %c0_26] : memref<4x24x16xbf16, #tpu.memory_space<vmem>>, vector<4x24x16xbf16>
    "tpu.trace_start"() <{level = 10 : i32, message = "gqk,gkd->gqd"}> : () -> ()
    %cst_27 = arith.constant dense<0.000000e+00> : vector<4x24x16xf32>
    %53 = tpu.matmul %51, %52, %cst_27 {dimension_numbers = #tpu.dot_dimension_numbers<[2], [1], [1], [2], [0, 0, 0, 1, 1, 2], [0], [0]>} : vector<4x24x24xbf16>, vector<4x24x16xbf16>, vector<4x24x16xf32> -> vector<4x24x16xf32>
    "tpu.trace_stop"() : () -> ()
    %54 = vector.extract_strided_slice %53 {offsets = [0, 0, 0], sizes = [1, 24, 16], strides = [1, 1, 1]} : vector<4x24x16xf32> to vector<1x24x16xf32>
    %55 = vector.shape_cast %54 : vector<1x24x16xf32> to vector<24x16xf32>
    %56 = arith.truncf %55 : vector<24x16xf32> to vector<24x16xbf16>
    %c0_28 = arith.constant 0 : index
    %c0_29 = arith.constant 0 : index
    %57 = vector.load %arg28[%c0_28, %c0_29] : memref<24x64xbf16, #tpu.memory_space<vmem>>, vector<24x16xbf16>
    tpu.vector_store %arg28[%c0_28, %c0_29], %56 {strides = array<i32>} : memref<24x64xbf16, #tpu.memory_space<vmem>>, vector<24x16xbf16>,
    %58 = vector.extract_strided_slice %53 {offsets = [1, 0, 0], sizes = [1, 24, 16], strides = [1, 1, 1]} : vector<4x24x16xf32> to vector<1x24x16xf32>
    %59 = vector.shape_cast %58 : vector<1x24x16xf32> to vector<24x16xf32>
    %60 = arith.truncf %59 : vector<24x16xf32> to vector<24x16xbf16>
    %c0_30 = arith.constant 0 : index
    %c16 = arith.constant 16 : index
    %61 = vector.load %arg28[%c0_30, %c16] : memref<24x64xbf16, #tpu.memory_space<vmem>>, vector<24x16xbf16>
    tpu.vector_store %arg28[%c0_30, %c16], %60 {strides = array<i32>} : memref<24x64xbf16, #tpu.memory_space<vmem>>, vector<24x16xbf16>,
    %62 = vector.extract_strided_slice %53 {offsets = [2, 0, 0], sizes = [1, 24, 16], strides = [1, 1, 1]} : vector<4x24x16xf32> to vector<1x24x16xf32>
    %63 = vector.shape_cast %62 : vector<1x24x16xf32> to vector<24x16xf32>
    %64 = arith.truncf %63 : vector<24x16xf32> to vector<24x16xbf16>
    %c0_31 = arith.constant 0 : index
    %c32 = arith.constant 32 : index
    %65 = vector.load %arg28[%c0_31, %c32] : memref<24x64xbf16, #tpu.memory_space<vmem>>, vector<24x16xbf16>
    tpu.vector_store %arg28[%c0_31, %c32], %64 {strides = array<i32>} : memref<24x64xbf16, #tpu.memory_space<vmem>>, vector<24x16xbf16>,
    %66 = vector.extract_strided_slice %53 {offsets = [3, 0, 0], sizes = [1, 24, 16], strides = [1, 1, 1]} : vector<4x24x16xf32> to vector<1x24x16xf32>
    %67 = vector.shape_cast %66 : vector<1x24x16xf32> to vector<24x16xf32>
    %68 = arith.truncf %67 : vector<24x16xf32> to vector<24x16xbf16>
    %c0_32 = arith.constant 0 : index
    %c48 = arith.constant 48 : index
    %69 = vector.load %arg28[%c0_32, %c48] : memref<24x64xbf16, #tpu.memory_space<vmem>>, vector<24x16xbf16>
    tpu.vector_store %arg28[%c0_32, %c48], %68 {strides = array<i32>} : memref<24x64xbf16, #tpu.memory_space<vmem>>, vector<24x16xbf16>,
    %c0_33 = arith.constant 0 : index
    %c0_34 = arith.constant 0 : index
    %70 = vector.load %arg28[%c0_33, %c0_34] : memref<24x64xbf16, #tpu.memory_space<vmem>>, vector<24x64xbf16>
    %c0_35 = arith.constant 0 : index
    %c0_36 = arith.constant 0 : index
    %71 = vector.load %arg11[%c0_35, %c0_36] : memref<64x64xbf16, #tpu.memory_space<vmem>>, vector<64x64xbf16>
    %cst_37 = arith.constant dense<0.000000e+00> : vector<24x64xf32>
    %72 = tpu.matmul %70, %71, %cst_37 {dimension_numbers = #tpu.dot_dimension_numbers<[1], [0], [0], [1], [0, 0, 1, 1], [], []>} : vector<24x64xbf16>, vector<64x64xbf16>, vector<24x64xf32> -> vector<24x64xf32>
    %c0_38 = arith.constant 0 : index
    %c0_39 = arith.constant 0 : index
    %73 = vector.load %arg12[%c0_38, %c0_39] : memref<1x64xf32, #tpu.memory_space<vmem>>, vector<1x64xf32>
    %74 = vector.broadcast %73 : vector<1x64xf32> to vector<24x64xf32>
    %75 = arith.addf %72, %74 : vector<24x64xf32>
    %76 = arith.addf %6, %75 : vector<24x64xf32>
    %c0_40 = arith.constant 0 : index
    %c0_41 = arith.constant 0 : index
    %77 = vector.load %arg13[%c0_40, %c0_41] : memref<1x64xf32, #tpu.memory_space<vmem>>, vector<1x64xf32>
    %c0_42 = arith.constant 0 : index
    %c0_43 = arith.constant 0 : index
    %78 = vector.load %arg14[%c0_42, %c0_43] : memref<1x64xf32, #tpu.memory_space<vmem>>, vector<1x64xf32>
    %cst_44 = arith.constant dense<0.000000e+00> : vector<24xf32>
    %79 = vector.multi_reduction <add>, %76, %cst_44 [1] : vector<24x64xf32> to vector<24xf32>
    %80 = vector.shape_cast %79 : vector<24xf32> to vector<24x1xf32>
    %cst_45 = arith.constant 6.400000e+01 : f32
    %81 = vector.broadcast %cst_45 : f32 to vector<24x1xf32>
    %82 = arith.divf %80, %81 : vector<24x1xf32>
    %83 = vector.broadcast %82 : vector<24x1xf32> to vector<24x64xf32>
    %84 = arith.subf %76, %83 : vector<24x64xf32>
    %85 = vector.broadcast %82 : vector<24x1xf32> to vector<24x64xf32>
    %86 = arith.subf %76, %85 : vector<24x64xf32>
    %87 = arith.mulf %84, %86 : vector<24x64xf32>
    %cst_46 = arith.constant dense<0.000000e+00> : vector<24xf32>
    %88 = vector.multi_reduction <add>, %87, %cst_46 [1] : vector<24x64xf32> to vector<24xf32>
    %89 = vector.shape_cast %88 : vector<24xf32> to vector<24x1xf32>
    %cst_47 = arith.constant 6.400000e+01 : f32
    %90 = vector.broadcast %cst_47 : f32 to vector<24x1xf32>
    %91 = arith.divf %89, %90 : vector<24x1xf32>
    %92 = vector.broadcast %82 : vector<24x1xf32> to vector<24x64xf32>
    %93 = arith.subf %76, %92 : vector<24x64xf32>
    %cst_48 = arith.constant 9.99999974E-6 : f32
    %94 = vector.broadcast %cst_48 : f32 to vector<24x1xf32>
    %95 = arith.addf %91, %94 : vector<24x1xf32>
    %96 = math.rsqrt %95 : vector<24x1xf32>
    %97 = vector.broadcast %96 : vector<24x1xf32> to vector<24x64xf32>
    %98 = arith.mulf %93, %97 : vector<24x64xf32>
    %99 = vector.broadcast %77 : vector<1x64xf32> to vector<24x64xf32>
    %100 = arith.mulf %98, %99 : vector<24x64xf32>
    %101 = vector.broadcast %78 : vector<1x64xf32> to vector<24x64xf32>
    %102 = arith.addf %100, %101 : vector<24x64xf32>
    %103 = arith.truncf %102 : vector<24x64xf32> to vector<24x64xbf16>
    %c0_49 = arith.constant 0 : index
    %c0_50 = arith.constant 0 : index
    %104 = vector.load %arg15[%c0_49, %c0_50] : memref<64x128xbf16, #tpu.memory_space<vmem>>, vector<64x128xbf16>
    %cst_51 = arith.constant dense<0.000000e+00> : vector<24x128xf32>
    %105 = tpu.matmul %103, %104, %cst_51 {dimension_numbers = #tpu.dot_dimension_numbers<[1], [0], [0], [1], [0, 0, 1, 1], [], []>} : vector<24x64xbf16>, vector<64x128xbf16>, vector<24x128xf32> -> vector<24x128xf32>
    %c0_52 = arith.constant 0 : index
    %c0_53 = arith.constant 0 : index
    %106 = vector.load %arg16[%c0_52, %c0_53] : memref<1x128xf32, #tpu.memory_space<vmem>>, vector<1x128xf32>
    %107 = vector.broadcast %106 : vector<1x128xf32> to vector<24x128xf32>
    %108 = arith.addf %105, %107 : vector<24x128xf32>
    %cst_54 = arith.constant 5.000000e-01 : f32
    %109 = vector.broadcast %cst_54 : f32 to vector<24x128xf32>
    %110 = arith.mulf %109, %108 : vector<24x128xf32>
    %cst_55 = arith.constant 0.707106769 : f32
    %111 = vector.broadcast %cst_55 : f32 to vector<24x128xf32>
    %112 = arith.mulf %108, %111 : vector<24x128xf32>
    %113 = math.absf %112 : vector<24x128xf32>
    %cst_56 = arith.constant 0.327591091 : f32
    %114 = vector.broadcast %cst_56 : f32 to vector<24x128xf32>
    %115 = arith.mulf %114, %113 : vector<24x128xf32>
    %cst_57 = arith.constant 1.000000e+00 : f32
    %116 = vector.broadcast %cst_57 : f32 to vector<24x128xf32>
    %117 = arith.addf %116, %115 : vector<24x128xf32>
    %cst_58 = arith.constant 1.000000e+00 : f32
    %118 = vector.broadcast %cst_58 : f32 to vector<24x128xf32>
    %119 = arith.divf %118, %117 : vector<24x128xf32>
    %cst_59 = arith.constant 1.06140542 : f32
    %120 = vector.broadcast %cst_59 : f32 to vector<24x128xf32>
    %121 = arith.mulf %120, %119 : vector<24x128xf32>
    %cst_60 = arith.constant -1.45315206 : f32
    %122 = vector.broadcast %cst_60 : f32 to vector<24x128xf32>
    %123 = arith.addf %121, %122 : vector<24x128xf32>
    %124 = arith.mulf %123, %119 : vector<24x128xf32>
    %cst_61 = arith.constant 1.42141378 : f32
    %125 = vector.broadcast %cst_61 : f32 to vector<24x128xf32>
    %126 = arith.addf %124, %125 : vector<24x128xf32>
    %127 = arith.mulf %126, %119 : vector<24x128xf32>
    %cst_62 = arith.constant -0.284496725 : f32
    %128 = vector.broadcast %cst_62 : f32 to vector<24x128xf32>
    %129 = arith.addf %127, %128 : vector<24x128xf32>
    %130 = arith.mulf %129, %119 : vector<24x128xf32>
    %cst_63 = arith.constant 0.254829586 : f32
    %131 = vector.broadcast %cst_63 : f32 to vector<24x128xf32>
    %132 = arith.addf %130, %131 : vector<24x128xf32>
    %133 = arith.mulf %132, %119 : vector<24x128xf32>
    %cst_64 = arith.constant 0.000000e+00 : f32
    %134 = vector.broadcast %cst_64 : f32 to vector<24x128xf32>
    %135 = arith.subf %134, %113 : vector<24x128xf32>
    %136 = arith.mulf %135, %113 : vector<24x128xf32>
    %137 = math.exp %136 : vector<24x128xf32>
    %138 = arith.mulf %133, %137 : vector<24x128xf32>
    %cst_65 = arith.constant 1.000000e+00 : f32
    %139 = vector.broadcast %cst_65 : f32 to vector<24x128xf32>
    %140 = arith.subf %139, %138 : vector<24x128xf32>
    %cst_66 = arith.constant 0.000000e+00 : f32
    %141 = vector.broadcast %cst_66 : f32 to vector<24x128xf32>
    %142 = arith.cmpf olt, %112, %141 : vector<24x128xf32>
    %cst_67 = arith.constant 0.000000e+00 : f32
    %143 = vector.broadcast %cst_67 : f32 to vector<24x128xf32>
    %144 = arith.subf %143, %140 : vector<24x128xf32>
    %145 = arith.select %142, %144, %140 : vector<24x128xi1>, vector<24x128xf32>
    %cst_68 = arith.constant 1.000000e+00 : f32
    %146 = vector.broadcast %cst_68 : f32 to vector<24x128xf32>
    %147 = arith.addf %146, %145 : vector<24x128xf32>
    %148 = arith.mulf %110, %147 : vector<24x128xf32>
    %149 = arith.truncf %148 : vector<24x128xf32> to vector<24x128xbf16>
    %c0_69 = arith.constant 0 : index
    %c0_70 = arith.constant 0 : index
    %150 = vector.load %arg17[%c0_69, %c0_70] : memref<128x64xbf16, #tpu.memory_space<vmem>>, vector<128x64xbf16>
    %cst_71 = arith.constant dense<0.000000e+00> : vector<24x64xf32>
    %151 = tpu.matmul %149, %150, %cst_71 {dimension_numbers = #tpu.dot_dimension_numbers<[1], [0], [0], [1], [0, 0, 1, 1], [], []>} : vector<24x128xbf16>, vector<128x64xbf16>, vector<24x64xf32> -> vector<24x64xf32>
    %c0_72 = arith.constant 0 : index
    %c0_73 = arith.constant 0 : index
    %152 = vector.load %arg18[%c0_72, %c0_73] : memref<1x64xf32, #tpu.memory_space<vmem>>, vector<1x64xf32>
    %153 = vector.broadcast %152 : vector<1x64xf32> to vector<24x64xf32>
    %154 = arith.addf %151, %153 : vector<24x64xf32>
    %155 = arith.addf %102, %154 : vector<24x64xf32>
    %c0_74 = arith.constant 0 : index
    %c0_75 = arith.constant 0 : index
    %156 = vector.load %arg19[%c0_74, %c0_75] : memref<1x64xf32, #tpu.memory_space<vmem>>, vector<1x64xf32>
    %c0_76 = arith.constant 0 : index
    %c0_77 = arith.constant 0 : index
    %157 = vector.load %arg20[%c0_76, %c0_77] : memref<1x64xf32, #tpu.memory_space<vmem>>, vector<1x64xf32>
    %cst_78 = arith.constant dense<0.000000e+00> : vector<24xf32>
    %158 = vector.multi_reduction <add>, %155, %cst_78 [1] : vector<24x64xf32> to vector<24xf32>
    %159 = vector.shape_cast %158 : vector<24xf32> to vector<24x1xf32>
    %cst_79 = arith.constant 6.400000e+01 : f32
    %160 = vector.broadcast %cst_79 : f32 to vector<24x1xf32>
    %161 = arith.divf %159, %160 : vector<24x1xf32>
    %162 = vector.broadcast %161 : vector<24x1xf32> to vector<24x64xf32>
    %163 = arith.subf %155, %162 : vector<24x64xf32>
    %164 = vector.broadcast %161 : vector<24x1xf32> to vector<24x64xf32>
    %165 = arith.subf %155, %164 : vector<24x64xf32>
    %166 = arith.mulf %163, %165 : vector<24x64xf32>
    %cst_80 = arith.constant dense<0.000000e+00> : vector<24xf32>
    %167 = vector.multi_reduction <add>, %166, %cst_80 [1] : vector<24x64xf32> to vector<24xf32>
    %168 = vector.shape_cast %167 : vector<24xf32> to vector<24x1xf32>
    %cst_81 = arith.constant 6.400000e+01 : f32
    %169 = vector.broadcast %cst_81 : f32 to vector<24x1xf32>
    %170 = arith.divf %168, %169 : vector<24x1xf32>
    %171 = vector.broadcast %161 : vector<24x1xf32> to vector<24x64xf32>
    %172 = arith.subf %155, %171 : vector<24x64xf32>
    %cst_82 = arith.constant 9.99999974E-6 : f32
    %173 = vector.broadcast %cst_82 : f32 to vector<24x1xf32>
    %174 = arith.addf %170, %173 : vector<24x1xf32>
    %175 = math.rsqrt %174 : vector<24x1xf32>
    %176 = vector.broadcast %175 : vector<24x1xf32> to vector<24x64xf32>
    %177 = arith.mulf %172, %176 : vector<24x64xf32>
    %178 = vector.broadcast %156 : vector<1x64xf32> to vector<24x64xf32>
    %179 = arith.mulf %177, %178 : vector<24x64xf32>
    %180 = vector.broadcast %157 : vector<1x64xf32> to vector<24x64xf32>
    %181 = arith.addf %179, %180 : vector<24x64xf32>
    %182 = arith.truncf %181 : vector<24x64xf32> to vector<24x64xbf16>
    %c0_83 = arith.constant 0 : index
    %c0_84 = arith.constant 0 : index
    %183 = vector.load %arg21[%c0_83, %c0_84] : memref<64x128xbf16, #tpu.memory_space<vmem>>, vector<64x128xbf16>
    %cst_85 = arith.constant dense<0.000000e+00> : vector<24x128xf32>
    %184 = tpu.matmul %182, %183, %cst_85 {dimension_numbers = #tpu.dot_dimension_numbers<[1], [0], [0], [1], [0, 0, 1, 1], [], []>} : vector<24x64xbf16>, vector<64x128xbf16>, vector<24x128xf32> -> vector<24x128xf32>
    %c0_86 = arith.constant 0 : index
    %c0_87 = arith.constant 0 : index
    %185 = vector.load %arg22[%c0_86, %c0_87] : memref<1x128xf32, #tpu.memory_space<vmem>>, vector<1x128xf32>
    %186 = vector.broadcast %185 : vector<1x128xf32> to vector<24x128xf32>
    %187 = arith.addf %184, %186 : vector<24x128xf32>
    %c0_88 = arith.constant 0 : index
    %c0_89 = arith.constant 0 : index
    %c0_90 = arith.constant 0 : index
    %188 = vector.load %arg23[%c0_88, %c0_89, %c0_90] : memref<1x24x128xf32, #tpu.memory_space<vmem>>, vector<1x24x128xf32>
    %189 = vector.shape_cast %188 : vector<1x24x128xf32> to vector<24x128xf32>
    %190 = vector.shape_cast %187 : vector<24x128xf32> to vector<1x24x128xf32>
    tpu.vector_store %arg23[%c0_88, %c0_89, %c0_90], %190 {strides = array<i32>} : memref<1x24x128xf32, #tpu.memory_space<vmem>>, vector<1x24x128xf32>,
    return
  }
  func.func @transform_0(%arg0: i32, %arg1: i32) -> (i32, i32, i32) {
    %c0_i32 = arith.constant 0 : i32
    %c0_i32_0 = arith.constant 0 : i32
    %c0_i32_1 = arith.constant 0 : i32
    return %arg0, %c0_i32, %c0_i32_0 : i32, i32, i32
  }
  func.func @transform_1(%arg0: i32, %arg1: i32) -> (i32, i32) {
    %c0_i32 = arith.constant 0 : i32
    %c0_i32_0 = arith.constant 0 : i32
    %c0_i32_1 = arith.constant 0 : i32
    return %c0_i32, %c0_i32_0 : i32, i32
  }
  func.func @transform_2(%arg0: i32, %arg1: i32) -> (i32, i32) {
    %c0_i32 = arith.constant 0 : i32
    %c0_i32_0 = arith.constant 0 : i32
    %c0_i32_1 = arith.constant 0 : i32
    return %c0_i32, %c0_i32_0 : i32, i32
  }
  func.func @transform_3(%arg0: i32, %arg1: i32) -> (i32, i32) {
    %c0_i32 = arith.constant 0 : i32
    %c0_i32_0 = arith.constant 0 : i32
    %c0_i32_1 = arith.constant 0 : i32
    return %c0_i32, %c0_i32_0 : i32, i32
  }
  func.func @transform_4(%arg0: i32, %arg1: i32) -> (i32, i32) {
    %c0_i32 = arith.constant 0 : i32
    %c0_i32_0 = arith.constant 0 : i32
    %c0_i32_1 = arith.constant 0 : i32
    return %c0_i32, %c0_i32_0 : i32, i32
  }
  func.func @transform_5(%arg0: i32, %arg1: i32) -> (i32, i32) {
    %c0_i32 = arith.constant 0 : i32
    %c0_i32_0 = arith.constant 0 : i32
    %c0_i32_1 = arith.constant 0 : i32
    return %c0_i32, %c0_i32_0 : i32, i32
  }
  func.func @transform_6(%arg0: i32, %arg1: i32) -> (i32, i32) {
    %c0_i32 = arith.constant 0 : i32
    %c0_i32_0 = arith.constant 0 : i32
    %c0_i32_1 = arith.constant 0 : i32
    return %c0_i32, %c0_i32_0 : i32, i32
  }
  func.func @transform_7(%arg0: i32, %arg1: i32) -> (i32, i32) {
    %c0_i32 = arith.constant 0 : i32
    %c0_i32_0 = arith.constant 0 : i32
    %c0_i32_1 = arith.constant 0 : i32
    return %c0_i32, %c0_i32_0 : i32, i32
  }
  func.func @transform_8(%arg0: i32, %arg1: i32) -> (i32, i32) {
    %c0_i32 = arith.constant 0 : i32
    %c0_i32_0 = arith.constant 0 : i32
    %c0_i32_1 = arith.constant 0 : i32
    return %c0_i32, %c0_i32_0 : i32, i32
  }
  func.func @transform_9(%arg0: i32, %arg1: i32) -> (i32, i32) {
    %c0_i32 = arith.constant 0 : i32
    %c0_i32_0 = arith.constant 0 : i32
    %c0_i32_1 = arith.constant 0 : i32
    return %c0_i32, %c0_i32_0 : i32, i32
  }
  func.func @transform_10(%arg0: i32, %arg1: i32) -> (i32, i32) {
    %c0_i32 = arith.constant 0 : i32
    %c0_i32_0 = arith.constant 0 : i32
    %c0_i32_1 = arith.constant 0 : i32
    return %c0_i32, %c0_i32_0 : i32, i32
  }
  func.func @transform_11(%arg0: i32, %arg1: i32) -> (i32, i32) {
    %c0_i32 = arith.constant 0 : i32
    %c0_i32_0 = arith.constant 0 : i32
    %c0_i32_1 = arith.constant 0 : i32
    return %c0_i32, %c0_i32_0 : i32, i32
  }
  func.func @transform_12(%arg0: i32, %arg1: i32) -> (i32, i32) {
    %c0_i32 = arith.constant 0 : i32
    %c0_i32_0 = arith.constant 0 : i32
    %c0_i32_1 = arith.constant 0 : i32
    return %c0_i32, %c0_i32_0 : i32, i32
  }
  func.func @transform_13(%arg0: i32, %arg1: i32) -> (i32, i32) {
    %c0_i32 = arith.constant 0 : i32
    %c0_i32_0 = arith.constant 0 : i32
    %c0_i32_1 = arith.constant 0 : i32
    return %c0_i32, %c0_i32_0 : i32, i32
  }
  func.func @transform_14(%arg0: i32, %arg1: i32) -> (i32, i32) {
    %c0_i32 = arith.constant 0 : i32
    %c0_i32_0 = arith.constant 0 : i32
    %c0_i32_1 = arith.constant 0 : i32
    return %c0_i32, %c0_i32_0 : i32, i32
  }
  func.func @transform_15(%arg0: i32, %arg1: i32) -> (i32, i32) {
    %c0_i32 = arith.constant 0 : i32
    %c0_i32_0 = arith.constant 0 : i32
    %c0_i32_1 = arith.constant 0 : i32
    return %c0_i32, %c0_i32_0 : i32, i32
  }
  func.func @transform_16(%arg0: i32, %arg1: i32) -> (i32, i32) {
    %c0_i32 = arith.constant 0 : i32
    %c0_i32_0 = arith.constant 0 : i32
    %c0_i32_1 = arith.constant 0 : i32
    return %c0_i32, %c0_i32_0 : i32, i32
  }
  func.func @transform_17(%arg0: i32, %arg1: i32) -> (i32, i32) {
    %c0_i32 = arith.constant 0 : i32
    %c0_i32_0 = arith.constant 0 : i32
    %c0_i32_1 = arith.constant 0 : i32
    return %c0_i32, %c0_i32_0 : i32, i32
  }
  func.func @transform_18(%arg0: i32, %arg1: i32) -> (i32, i32) {
    %c0_i32 = arith.constant 0 : i32
    %c0_i32_0 = arith.constant 0 : i32
    %c0_i32_1 = arith.constant 0 : i32
    return %c0_i32, %c0_i32_0 : i32, i32
  }
  func.func @transform_19(%arg0: i32, %arg1: i32) -> (i32, i32) {
    %c0_i32 = arith.constant 0 : i32
    %c0_i32_0 = arith.constant 0 : i32
    %c0_i32_1 = arith.constant 0 : i32
    return %c0_i32, %c0_i32_0 : i32, i32
  }
  func.func @transform_20(%arg0: i32, %arg1: i32) -> (i32, i32) {
    %c0_i32 = arith.constant 0 : i32
    %c0_i32_0 = arith.constant 0 : i32
    %c0_i32_1 = arith.constant 0 : i32
    return %c0_i32, %c0_i32_0 : i32, i32
  }
  func.func @transform_21(%arg0: i32, %arg1: i32) -> (i32, i32, i32) {
    %c0_i32 = arith.constant 0 : i32
    %c0_i32_0 = arith.constant 0 : i32
    return %arg0, %arg1, %c0_i32 : i32, i32, i32
  }
}

</mosaic_0001>

<bundles_post_ra>
// kernel: tpu_custom_call.1
= control target key start
LH: loop header
LB: loop body
LE: loop exit
PB: predicated region body
PF: predicated region fallthrough
CT: control target
= control target key end

     0   :  { %s3976_s0 = inlined_call_operand.vmem [shape: f32[2,24,64], index: 0, kind: input, shape index: {}]   ;;  %s3977_s1 = inlined_call_operand.vmem [shape: bf16[64,64], index: 1, kind: input, shape index: {}]   ;;  %s3978_s2 = inlined_call_operand.vmem [shape: f32[1,64], index: 2, kind: input, shape index: {}]   ;;  %s3979_s3 = inlined_call_operand.vmem [shape: bf16[64,64], index: 3, kind: input, shape index: {}]   ;;  %s3980_s4 = inlined_call_operand.vmem [shape: f32[1,64], index: 4, kind: input, shape index: {}]   ;;  %s3981_s5 = inlined_call_operand.hbm [shape: bf16[64,64], index: 5, kind: input, shape index: {}]   ;;  %s3982_s6 = inlined_call_operand.vmem [shape: f32[64,1], index: 6, kind: input, shape index: {}]   ;;  %s3983_s7 = inlined_call_operand.hbm [shape: bf16[64,64], index: 7, kind: input, shape index: {}]   ;;  %s3984_s8 = inlined_call_operand.vmem [shape: f32[1,64], index: 8, kind: input, shape index: {}]   ;;  %s3985_s9 = inlined_call_operand.hbm [shape: bf16[64,64], index: 9, kind: input, shape index: {}]   ;;  %s3986_s10 = inlined_call_operand.vmem [shape: f32[1,64], index: 10, kind: input, shape index: {}]   ;;  %s3987_s11 = inlined_call_operand.vmem [shape: f32[1,64], index: 11, kind: input, shape index: {}]   ;;  %s3988_s12 = inlined_call_operand.vmem [shape: f32[1,64], index: 12, kind: input, shape index: {}]   ;;  %s3989_s13 = inlined_call_operand.hbm [shape: bf16[64,128], index: 13, kind: input, shape index: {}]   ;;  %s3990_s14 = inlined_call_operand.vmem [shape: f32[1,128], index: 14, kind: input, shape index: {}]   ;;  %s3991_s15 = inlined_call_operand.vmem [shape: bf16[128,64], index: 15, kind: input, shape index: {}]   ;;  %s3992_s16 = inlined_call_operand.vmem [shape: f32[1,64], index: 16, kind: input, shape index: {}]   ;;  %s3993_s17 = inlined_call_operand.vmem [shape: f32[1,64], index: 17, kind: input, shape index: {}]   ;;  %s3994_s18 = inlined_call_operand.vmem [shape: f32[1,64], index: 18, kind: input, shape index: {}]   ;;  %s3995_s19 = inlined_call_operand.hbm [shape: bf16[64,128], index: 19, kind: input, shape index: {}]   ;;  %s3996_s20 = inlined_call_operand.vmem [shape: f32[1,128], index: 20, kind: input, shape index: {}]   ;;  %s3997_s21 = inlined_call_operand.hbm [shape: f32[2,24,128], index: 21, kind: output, shape index: {}]  }
   0x1   :  { %4011 = sst [smem:[#allocation30_spill]] %s3976_s0 }
   0x2   :  { %4012 = sst [smem:[#allocation31_spill]] %s3977_s1 }
   0x3   :  { %4013 = sst [smem:[#allocation32_spill]] %s3978_s2 }
   0x4   :  { %4014 = sst [smem:[#allocation33_spill]] %s3979_s3 }
   0x5   :  { %4015 = sst [smem:[#allocation34_spill]] %s3980_s4 }
   0x6   :  { %4016 = sst [smem:[#allocation35_spill]] %s3981_s5 }
   0x7   :  { %4017 = sst [smem:[#allocation36_spill]] %s3983_s7 }
   0x8   :  { %4018 = sst [smem:[#allocation37_spill]] %s3989_s13 }
   0x9   :  { %4019 = sst [smem:[#allocation38_spill]] %s3994_s18 }
   0xa   :  { %4020 = sst [smem:[#allocation39_spill]] %s3996_s20 }
   0xb   :  { %4021 = sst [smem:[#allocation40_spill]] %s3997_s21 }
   0xc   :  { %26 = vsyncpa [#allocation8], 0 }
   0xd   :  { %27 = vsyncpa [#allocation11], 0 }
   0xe   :  { %28 = vsyncpa [#allocation14], 0 }
   0xf   :  { %29 = vsyncpa [#allocation9], 0 }
  0x10   :  { %31 = vsyncpa [#allocation9 + $0x1], 0  ;;  %s3417_s2 = smov 0   ;;  %s3419_s25 = smov 0  }
  0x11   :  { %s3421_s26 = smov 0   ;;  %s3423_s27 = smov 0  }
  0x12   :  { %s3425_s3 = smov 0   ;;  %s3427_s28 = smov 0  }
  0x13 LB: > { %4022 = sst [smem:[#allocation21_spill]] %s3268_s2  ;;  %s2535_s29 = sadd.s32 4294967295, %s3288_s28   ;;  %s3288_s28 = sphi %s3427_s28, %s37_s28   ;;  %s3284_s3 = sphi %s3425_s3, %s4057_s3   ;;  %s3280_s27 = sphi %s3423_s27, %s4056_s27   ;;  %s3276_s26 = sphi %s3421_s26, %s4055_s26   ;;  %s3272_s25 = sphi %s3419_s25, %s4054_s25   ;;  %s3268_s2 = sphi %s3417_s2, %s4053_s2  }
  0x14   : > { %4023 = sst [smem:[#allocation22_spill]] %s3272_s25  ;;  %s2536_s0 = sadd.s32 4294967294, %s3288_s28  }
  0x15   : > { %4024 = sst [smem:[#allocation23_spill]] %s3276_s26  ;;  %s49_s4 = sadd.s32 1, %s3284_s3 }
  0x16   : > { %4025 = sst [smem:[#allocation24_spill]] %s3284_s3  ;;  %s504_s30 = sadd.s32 1, %s3276_s26 }
  0x17   : > { %4026 = sst [smem:[#allocation25_spill]] %s3288_s28  ;;  %p51_p0 = scmp.ge.s32.totalorder %s49_s4, 2 }
  0x18   : > { %p514_p1 = scmp.ne.s32.totalorder %s3276_s26, %s3272_s25  ;;  %p515_p2 = scmp.eq.s32.totalorder %s2535_s29, 1 }
  0x19   : > { %p520_p3 = scmp.ne.s32.totalorder %s3272_s25, %s3268_s2  ;;  %s4059_s4 = smov (%p51_p0, %s49_s4), 0 }
  0x1a   : > { %4027 = sst [smem:[#allocation26_spill]] %s4059_s4  ;;  %p3457_p4 = por %p515_p2, %p514_p1 }
  0x1b   : > { %p521_p5 = scmp.eq.s32.totalorder %s2536_s0, 1  ;;  %s499_s22 = ssub.s32 %s3284_s3, %s4059_s4 }
  0x1c   : > { %s4028_s5 = scalar_select %p3457_p4, 1, 0 }
  0x1d   : > { %p2537_p6 = scmp.ge.s32.totalorder %s3288_s28, 1  ;;  %p502_p7 = scmp.eq.s32.totalorder %s499_s22, 0 }
  0x1e   : > { %4029 = sst [smem:[#allocation27_spill]] %s4028_s5  ;;  %p3464_p8 = por %p521_p5, %p520_p3 }
  0x1f   : > { %p528_p9 = scmp.lt.s32.totalorder %s3288_s28, 3  ;;  %p3476_p11 = scmp.eq.s32.totalorder %s2535_s29, 0 }
  0x20   : > { %s4030_s23 = scalar_select %p3464_p8, 1, 0 }
  0x21   : > { %s3470_s1 = scalar_select %p502_p7, %s3276_s26, %s504_s30  }
  0x22   : > { %4031 = sst [smem:[#allocation28_spill]] %s4030_s23  ;;  %p3472_p10 = pnand %p2537_p6, %p528_p9 }
  0x23   : > { %4032 = sst [smem:[#allocation29_spill]] %s3470_s1  ;;  %s3290_s3 = smov [#allocation10]  }
  0x24   : > { %p2860_p12 = pneg %p3472_p10  ;;  %s4035_s7 = sld [smem:[#allocation36_spill]] }
  0x25   : > { %s570_s29 = sshll.u32 %s3290_s3, 4  ;;  %s4037_s13 = sld [smem:[#allocation37_spill]]  ;;  %s571_s29 = int_to_ptr.vmem [resolvable:$true] %s570_s29 }
  0x26   : > { %p3487_p13 = pnand %p3476_p11, %p2860_p12  ;;  %s3291_s28 = smov 64  }
  0x27   : > { %s3292_s0 = smov 4   ;;  %s3293_s22 = smov [#allocation13]  }
  0x28   : > { %s4038_s20 = sld [smem:[#allocation35_spill]]  ;;  %s3294_s26 = smov [#allocation7]  }
  0x29   : > { %s553_s3 = sshll.u32 %s3294_s26, 4  ;;  %s585_s18 = sshll.u32 %s3985_s9, 4  ;;  %s554_s3 = int_to_ptr.vmem [resolvable:$true] %s553_s3  ;;  %s586_s18 = int_to_ptr.hbm [resolvable:$true] %s585_s18 }
  0x2a   : > { %s568_s4 = sshll.u32 %s4035_s7, 4  ;;  %s610_s7 = sshll.u32 %s3293_s22, 4  ;;  %s569_s4 = int_to_ptr.hbm [resolvable:$true] %s568_s4  ;;  %s611_s7 = int_to_ptr.vmem [resolvable:$true] %s610_s7 }
  0x2b   : > { %s608_s23 = sshll.u32 %s4037_s13, 4  ;;  %s637_s22 = sshll.u32 %s3995_s19, 4  ;;  %s609_s23 = int_to_ptr.hbm [resolvable:$true] %s608_s23  ;;  %s638_s22 = int_to_ptr.hbm [resolvable:$true] %s637_s22 }
  0x2c   : > { %2866 = dma.hbm_to_vmem [thread:$0]  (!%p3487_p13), %s569_s4, 512, %s571_s29, [#allocation11], %s3291_s28, %s3291_s28, %s3292_s0  }
  0x2d   : > { %2872 = dma.hbm_to_vmem [thread:$0]  (!%p3487_p13), %s609_s23, 512, %s611_s7, [#allocation14], %s3291_s28, %s3291_s28, %s3292_s0  }
  0x2e   : > { %s551_s25 = sshll.u32 %s4038_s20, 4  ;;  %s3295_s21 = smov [#allocation12]   ;;  %s552_s25 = int_to_ptr.hbm [resolvable:$true] %s551_s25 }
  0x2f   : > { %2863 = dma.hbm_to_vmem [thread:$0]  (!%p3487_p13), %s552_s25, 512, %s554_s3, [#allocation8], %s3291_s28, %s3291_s28, %s3292_s0  }
  0x30   : > { %s587_s20 = sshll.u32 %s3295_s21, 4  ;;  %s3296_s7 = smov [#allocation15]   ;;  %s588_s20 = int_to_ptr.vmem [resolvable:$true] %s587_s20 }
  0x31   : > { %2869 = dma.hbm_to_vmem [thread:$0]  (!%p3487_p13), %s586_s18, 512, %s588_s20, [#allocation11], %s3291_s28, %s3291_s28, %s3292_s0  }
  0x32   : > { %s639_s5 = sshll.u32 %s3296_s7, 4  ;;  %666 = sbr.rel (%p3472_p10) target bundleno = 2498 (0x9c2), region = 104  ;;  %s640_s5 = int_to_ptr.vmem [resolvable:$true] %s639_s5 }
  0x33   : > { %2875 = dma.hbm_to_vmem [thread:$0]  (!%p3487_p13), %s638_s22, 512, %s640_s5, [#allocation14], %s3291_s28, %s3291_s28, %s3292_s0  }
  0x37   : > { %3251 = dma.done.wait (%p3476_p11), [#allocation8], 512  }
  0x38   : > { %3253 = vsyncadd (%p3476_p11), [#allocation8], 4294966784 }
  0x39   : > { %3255 = dma.done.wait (%p3476_p11), [#allocation11], 1024  }
  0x3a   : > { %3257 = vsyncadd (%p3476_p11), [#allocation11], 4294966272 }
  0x3b   : > { %3259 = dma.done.wait (%p3476_p11), [#allocation14], 1024  }
  0x3c   : > { %3261 = vsyncadd (%p3476_p11), [#allocation14], 4294966272  ;;  %p747_p0 = scmp.lt.s32.totalorder %s3280_s27, 1  ;;  %s4039_s28 = sld [smem:[#allocation31_spill]]  ;;  %v2793_v2 = vld [vmem:[#allocation10 + $0x18] sm:$0xff]  ;;  %vm799_vm0 = vcmask 523264  }
  0x3d   : > { %1048 = vmatpush.bf16.msra.mxu2 %v2793_v2  ;;  %s4041_s4 = sld [smem:[#allocation30_spill]]  ;;  %v2792_v10 = vld [vmem:[#allocation10 + $0x10] sm:$0xff]  ;;  %v2791_v11 = vld [vmem:[#allocation10 + $0x8] sm:$0xff]  ;;  %v2790_v13 = vld [vmem:[#allocation10] sm:$0xff]  ;;  %v3297_v24 = vmov 0   ;;  %vm1065_vm1 = vcmask 125952  }
  0x3e   : > { %s748_s13 = scalar_select %p747_p0, %s3280_s27, 1  ;;  %v873_v22 = vld [vmem:[%s3982_s6 + $0x10] sm:$0xff]  ;;  %v871_v23 = vld [vmem:[%s3982_s6] sm:$0xff]  ;;  %2958 = vset.pattern.permute.xlu2 %v3297_v24  ;;  %2957 = vset.pattern.permute.xlu1 %v3297_v24  ;;  %v874_v29 = vld [vmem:[%s3982_s6 + $0x18] sm:$0xff]  ;;  %vm1596_vm2 = vcmask 1043456   ;;  %vm982_vm3 = vcmask 191488  }
  0x3f   : > { %s4042_s5 = sld [smem:[#allocation33_spill]]  ;;  %891 = vperm.xlu2 %2958, %v873_v22   ;;  %881 = vperm.xlu1 %2957, %v871_v23   ;;  %v876_v36 = vld [vmem:[%s3982_s6 + $0x28] sm:$0xff]  ;;  %v875_v38 = vld [vmem:[%s3982_s6 + $0x20] sm:$0xff]  ;;  %s3298_s3 = smov 96   ;;  %v877_v54 = vld [vmem:[%s3982_s6 + $0x30] sm:$0xff]  ;;  %vm1262_vm4 = vcmask 130048  }
  0x40   : > { %s2836_s0 = smul.u32 24, %s748_s13  ;;  %s4043_s26 = sld [smem:[#allocation32_spill]]  ;;  %v872_v37 = vld [vmem:[%s3982_s6 + $0x8] sm:$0xff]  ;;  %v2961_v39 = vld [vmem:[%s3984_s8] ss:$0 sm:$0xff]  ;;  %vm1416_vm6 = vcmask 195584  }
  0x41   : > { %1049 = vmatpush.bf16.msra.mxu2 %v2792_v10  ;;  %s3300_s22 = smov 80   ;;  %v2787_v22 = vld [vmem:[#allocation7 + $0x8] sm:$0xff]  ;;  %s3301_s7 = smov 16   ;;  %vm1771_vm7 = vcmask 257152   ;;  %vm1790_vm8 = vcmask 388352   ;;  %vm1809_vm9 = vcmask 519552  }
  0x42   : > { %s4040_s23 = smov %s4039_s28  ;;  %v2785_v0 = vld [vmem:[%s4039_s28 + $0x18] sm:$0xff]  ;;  %s3302_s13 = smov 32  }
  0x43   : > { %810 = vmatpush.bf16.msra.mxu0 %v2785_v0  ;;  %v2784_v1 = vld [vmem:[%s4040_s23 + $0x10] sm:$0xff]  ;;  %2831 = vmatpush.bf16.msra.mxu1 %v2785_v0  ;;  %v2783_v3 = vld [vmem:[%s4040_s23 + $0x8] sm:$0xff]  ;;  %s751_s29 = scalar_lea.vmem %s4041_s4, %s2836_s0  ;;  %v2782_v4 = vld [vmem:[%s4040_s23] sm:$0xff]  ;;  %s3303_s18 = smov 48  }
  0x44   : > { %v758_v5 = vld [vmem:[%s751_s29] sm:$0xff]  ;;  %v759_v6 = vld [vmem:[%s751_s29 + $0x8] sm:$0xff]  ;;  %v760_v7 = vld [vmem:[%s751_s29 + $0x10] sm:$0xff]  ;;  %s3299_s29 = smov 112   ;;  %s4045_s20 = sld [smem:[#allocation38_spill]] }
  0x45   : > { %v761_v8 = vpack.c.bf16 %v759_v6, %v758_v5  ;;  %v762_v9 = vpack.c.bf16 %v760_v7, %v760_v7  ;;  %v2797_v12 = vld [vmem:[%s4042_s5 + $0x18] sm:$0xff]  ;;  %1050 = vmatpush.bf16.msra.mxu2 %v2791_v11  ;;  %v2796_v14 = vld [vmem:[%s4042_s5 + $0x10] sm:$0xff]  ;;  %v2795_v15 = vld [vmem:[%s4042_s5 + $0x8] sm:$0xff]  ;;  %s4047_s24 = sld [smem:[#allocation39_spill]]  ;;  %s2837_s2 = smul.u32 24, %s3280_s27 }
  0x46   : > { %1165 = vmatpush.bf16.msra.mxu3 %v2797_v12  ;;  %v2794_v16 = vld [vmem:[%s4042_s5] sm:$0xff]  ;;  %v878_v0 = vld [vmem:[%s3982_s6 + $0x38] sm:$0xff]  ;;  %s4049_s1 = sld [smem:[#allocation40_spill]] }
  0x47   : > { %811 = vmatpush.bf16.msra.mxu0 %v2784_v1  ;;  %2832 = vmatpush.bf16.msra.mxu1 %v2784_v1  ;;  %v2960_v17 = vld [vmem:[%s4043_s26] ss:$0 sm:$0xff]  ;;  %s4044_s26 = sld [smem:[#allocation34_spill]] }
  0x48   : > { %896 = vperm.xlu2 %2958, %v874_v29   ;;  %886 = vperm.xlu1 %2957, %v872_v37  }
  0x49   : > { %1051 = vmatpush.bf16.msra.mxu2 %v2790_v13 }
  0x4a   : > { %1166 = vmatpush.bf16.msra.mxu3 %v2796_v14 }
  0x4b   : > { %812 = vmatpush.bf16.msra.mxu0 %v2783_v3  ;;  %2833 = vmatpush.bf16.msra.mxu1 %v2783_v3 }
  0x4c   : > { %s2406_s4 = scalar_lea.hbm %s4049_s1, %s2837_s2  ;;  %s3218_s25 = scalar_lea.hbm %s4049_s1, 48 }
  0x4d   : > { %v2962_v43 = vld [vmem:[%s4044_s26] ss:$0 sm:$0xff] }
  0x4e   : > { %1167 = vmatpush.bf16.msra.mxu3 %v2795_v15 }
  0x4f   : > { %813 = vmatpush.bf16.msra.mxu0 %v2782_v4  ;;  %2834 = vmatpush.bf16.msra.mxu1 %v2782_v4 }
  0x50   : > { %906 = vperm.xlu2 %2958, %v876_v36   ;;  %901 = vperm.xlu1 %2957, %v875_v38  }
  0x52   : > { %2567 = vmatmul.msk.bf16.vlgmr.msra.gmra.mxu0 %vm799_vm0, %v761_v8  ;;  %2568 = vmatmul.msk.bf16.vlgmr.msra.gmra.mxu1 %vm799_vm0, %v762_v9 }
  0x53   : > { %1168 = vmatpush.bf16.msra.mxu3 %v2794_v16 }
  0x99   : > { %v3626_v6 = vpop.permute.xlu2 %891 }
  0xa2   : > { %v3628_v9 = vpop.permute.xlu2 %896 }
  0xaa   : > { %v3630_v16 = vpop.permute.xlu2 %906 }
  0xcf   : > { %v815_v18 = vpop.f32.mrf.mxu0  ;;  %v820_v19 = vpop.f32.mrf.mxu1 }
  0xd0   : > { %v816_v20 = vadd.f32 %v2960_v17, %v815_v18  ;;  %v821_v21 = vadd.f32 %v2960_v17, %v820_v19 }
  0xd2   : > { %824 = vst.msk [vmem:[#allocation2] sm:$0xff] %vm799_vm0, %v816_v20  ;;  %827 = vxpose.xlu0.b32.start [1/3] (short) (narrow) %v816_v20, 64  ;;  %v1001_v33 = vpack.c.bf16 %v821_v21, %v821_v21 }
  0xd3   : > { %826 = vst.msk [vmem:[#allocation2 + $0x10] sm:$0xff] %vm799_vm0, %v821_v21 }
  0xd7   : > { %v817_v25 = vpop.f32.mrf.mxu0  ;;  %v822_v26 = vpop.f32.mrf.mxu1 }
  0xd8   : > { %v818_v27 = vadd.f32 %v2960_v17, %v817_v25  ;;  %v2786_v17 = vld [vmem:[#allocation7] sm:$0xff] }
  0xd9   : > { %v1113_v30 = vld [vmem:[#allocation2] sm:$0xff] }
  0xda   : > { %825 = vst.msk [vmem:[#allocation2 + $0x8] sm:$0xff] %vm799_vm0, %v818_v27  ;;  %828 = vxpose.xlu0.b32.cont [2/3] (short) (narrow) %v818_v27, 64  ;;  %v1000_v28 = vpack.c.bf16 %v818_v27, %v816_v20  ;;  %v1115_v34 = vld [vmem:[#allocation2 + $0x10] sm:$0xff] }
  0xdb   : > { %v1117_v35 = vpack.c.bf16 %v1115_v34, %v1115_v34  ;;  %v2788_v27 = vld [vmem:[#allocation7 + $0x10] sm:$0xff] }
  0xdc   : > { %2605 = vmatmul.msk.bf16.vlgmr.msra.gmra.mxu2 %vm799_vm0, %v1000_v28 }
  0xe1   : > { %v1114_v31 = vld [vmem:[#allocation2 + $0x8] sm:$0xff] }
  0xe2   : > { %829 = vxpose.xlu0.b32.end [3/3] (short) (narrow) %v821_v21, 64  ;;  %v1116_v32 = vpack.c.bf16 %v1114_v31, %v1113_v30  ;;  %v882_v21 = vpop.permute.xlu1 %881 }
  0xe4   : > { %2623 = vmatmul.msk.bf16.vlgmr.msra.gmra.mxu3 %vm799_vm0, %v1116_v32  ;;  %v2789_v32 = vld [vmem:[#allocation7 + $0x18] sm:$0xff] }
  0xec   : > { %2606 = vmatmul.msk.bf16.gmra.mxu2 %vm799_vm0, %v1001_v33 }
  0xf4   : > { %2624 = vmatmul.msk.bf16.gmra.mxu3 %vm799_vm0, %v1117_v35 }
 0x149   : > { %2959 = vset.pattern.permute.xlu0 %v3297_v24  ;;  %v887_v24 = vpop.permute.xlu1 %886 }
 0x151   : > { %v902_v26 = vpop.permute.xlu1 %901 }
 0x15f   : > { %v1053_v40 = vpop.f32.mrf.mxu2 }
 0x160   : > { %v1054_v41 = vadd.f32 %v2961_v39, %v1053_v40 }
 0x162   : > { %v3589_v42 = vpack.c.bf16 %v1054_v41, %v1054_v41 }
 0x164   : > { %1066 = vst.msk [vmem:[#allocation4] sm:$0xf] %vm1065_vm1, %v3589_v42 }
 0x167   : > { %v1055_v44 = vpop.f32.mrf.mxu2  ;;  %v1170_v45 = vpop.f32.mrf.mxu3 }
 0x168   : > { %v1056_v46 = vadd.f32 %v2961_v39, %v1055_v44  ;;  %v1171_v47 = vadd.f32 %v2962_v43, %v1170_v45 }
 0x16a   : > { %v3596_v48 = vpack.c.bf16 %v1056_v46, %v1056_v46  ;;  %v1179_v49 = vpack.c.bf16 %v1171_v47, %v1171_v47 }
 0x16c   : > { %1067 = vst.msk [vmem:[#allocation4 + $0x4] sm:$0xf] %vm1065_vm1, %v3596_v48  ;;  %1202 = vrot.lane.b32.xlu2 %v1179_v49, %s3298_s3 }
 0x16d   : > { %1183 = vst.msk [vmem:[#allocation5] sm:$0xf] %vm1065_vm1, %v1179_v49 }
 0x16f   : > { %v1058_v50 = vpop.f32.mrf.mxu2  ;;  %v1172_v51 = vpop.f32.mrf.mxu3 }
 0x170   : > { %v1059_v52 = vadd.f32 %v2961_v39, %v1058_v50  ;;  %v1173_v53 = vadd.f32 %v2962_v43, %v1172_v51 }
 0x172   : > { %v1064_v55 = vpack.c.bf16 %v1059_v52, %v1059_v52  ;;  %v1180_v56 = vpack.c.bf16 %v1173_v53, %v1173_v53 }
 0x173   : > { %v2806_v19 = vld [vmem:[#allocation4] sm:$0xff] }
 0x174   : > { %1068 = vst.msk [vmem:[#allocation4 + $0x8] sm:$0xf] %vm1065_vm1, %v1064_v55  ;;  %1191 = vrot.lane.b32.xlu1 %v1180_v56, %s3299_s29  ;;  %911 = vperm.xlu2 %2958, %v877_v54  }
 0x175   : > { %1184 = vst.msk [vmem:[#allocation5 + $0x4] sm:$0xf] %vm1065_vm1, %v1180_v56 }
 0x176   : > { %v843_v57 = vpop.trf.xlu0 }
 0x177   : > { %v1060_v58 = vpop.f32.mrf.mxu2  ;;  %v1175_v59 = vpop.f32.mrf.mxu3 }
 0x178   : > { %v1176_v60 = vadd.f32 %v2962_v43, %v1175_v59  ;;  %1189 = vrot.lane.b32.xlu0 %v1179_v49, %s3299_s29 }
 0x17a   : > { %v1181_v61 = vpack.c.bf16 %v1176_v60, %v1176_v60 }
 0x17b   : > { %v1563_v10 = vld [vmem:[#allocation4 + $0x8] sm:$0xf] }
 0x17c   : > { %1185 = vst.msk [vmem:[#allocation5 + $0x8] sm:$0xf] %vm1065_vm1, %v1181_v61  ;;  %1204 = vrot.lane.b32.xlu1 %v1180_v56, %s3298_s3  ;;  %1215 = vrot.lane.b32.xlu2 %v1179_v49, %s3300_s22  ;;  %v1586_v12 = vunpack.c.l.b16 %v1563_v10  ;;  %v2798_v54 = vld [vmem:[#allocation5] sm:$0xff] }
 0x17e   : > { %v844_v62 = vpop.trf.xlu0  ;;  %v1588_v14 = vpack.c.b16 %v1586_v12, %v1586_v12 }
 0x17f   : > { %v1177_v63 = vpop.f32.mrf.mxu3  ;;  %v859_v15 = vpack.c.bf16 %v844_v62, %v843_v57 }
 0x180   : > { %1085 = vrot.lane.b32.xlu0 %v3589_v42, %s3298_s3  ;;  %v1598_v18 = vsel %vm1596_vm2, %v1588_v14, 0 }
 0x184   : > { %916 = vperm.xlu1 %2957, %v878_v0   ;;  %1193 = vrot.lane.b32.xlu2 %v1181_v61, %s3299_s29 }
 0x186   : > { %v845_v1 = vpop.trf.xlu0 }
 0x188   : > { %1102 = vrot.lane.b32.xlu0 %v1064_v55, %s3300_s22 }
 0x18c   : > { %1217 = vrot.lane.b32.xlu1 %v1180_v56, %s3300_s22  ;;  %1219 = vrot.lane.b32.xlu2 %v1181_v61, %s3300_s22 }
 0x18e   : > { %v846_v2 = vpop.trf.xlu0 }
 0x18f   : > { %v860_v13 = vpack.c.bf16 %v846_v2, %v845_v1 }
 0x194   : > { %1206 = vrot.lane.b32.xlu1 %v1181_v61, %s3298_s3  ;;  %1076 = vrot.lane.b32.xlu2 %v1064_v55, %s3299_s29  ;;  %v1230_v61 = vld [vmem:[#allocation5 + $0x8] sm:$0xf] }
 0x195   : > { %v1253_v1 = vunpack.c.l.b16 %v1230_v61 }
 0x196   : > { %v847_v3 = vpop.trf.xlu0 }
 0x19c   : > { %1089 = vrot.lane.b32.xlu1 %v1064_v55, %s3298_s3  ;;  %1072 = vrot.lane.b32.xlu2 %v3589_v42, %s3299_s29 }
 0x19e   : > { %v848_v4 = vpop.trf.xlu0 }
 0x19f   : > { %v861_v11 = vpack.c.bf16 %v848_v4, %v847_v3  ;;  %v1255_v4 = vpack.c.b16 %v1253_v1, %v1253_v1 }
 0x1a6   : > { %v849_v5 = vpop.trf.xlu0 }
 0x1ae   : > { %v850_v7 = vpop.trf.xlu0 }
 0x1af   : > { %v862_v8 = vpack.c.bf16 %v850_v7, %v849_v5 }
 0x1b1   : > { %955 = vmatpush.bf16.msrb.mxu1 %v862_v8 }
 0x1b5   : > { %956 = vmatpush.bf16.msrb.mxu1 %v861_v11 }
 0x1b9   : > { %957 = vmatpush.bf16.msrb.mxu1 %v860_v13 }
 0x1bd   : > { %958 = vmatpush.bf16.msrb.mxu1 %v859_v15 }
 0x1c0   : > { %2585 = vmatmul.msk.bf16.vlgmr.msrb.gmra.mxu1 %vm799_vm0, %v2786_v17 }
 0x1c1   : > { %1606 = vmatpush.bf16.msra.mxu1 %v1598_v18 }
 0x1c5   : > { %1607 = vmatpush.bf16.msra.mxu1 %v2806_v19 }
 0x1c6   : > { %v1203_v20 = vpop.permute.xlu2 %1202 }
 0x1c7   : > { %1212 = vst.msk [vmem:[#allocation5 + $0x18] sm:$0xf] %vm1065_vm1, %v1203_v20 }
 0x1ce   : > { %v3635_v23 = vpop.permute.xlu2 %911 }
 0x1d0   : > { %2586 = vmatmul.msk.bf16.gmra.mxu1 %vm799_vm0, %v2787_v22 }
 0x1d6   : > { %v1216_v25 = vpop.permute.xlu2 %1215 }
 0x1d7   : > { %1225 = vst.msk [vmem:[#allocation5 + $0x24] sm:$0xf] %vm1065_vm1, %v1216_v25 }
 0x1de   : > { %v1194_v28 = vpop.permute.xlu2 %1193 }
 0x1df   : > { %1201 = vst.msk [vmem:[#allocation5 + $0x14] sm:$0xf] %vm1065_vm1, %v1194_v28 }
 0x1e0   : > { %2587 = vmatmul.msk.bf16.gmra.mxu1 %vm799_vm0, %v2788_v27 }
 0x1e6   : > { %v1192_v29 = vpop.permute.xlu1 %1191  ;;  %v1220_v30 = vpop.permute.xlu2 %1219  ;;  %v1233_v12 = vld [vmem:[#allocation5 + $0x14] sm:$0xf] }
 0x1e7   : > { %1200 = vst.msk [vmem:[#allocation5 + $0x10] sm:$0xf] %vm1065_vm1, %v1192_v29  ;;  %v1292_v17 = vunpack.c.l.b16 %v1233_v12 }
 0x1e8   : > { %1227 = vst.msk [vmem:[#allocation5 + $0x2c] sm:$0xf] %vm1065_vm1, %v1220_v30 }
 0x1e9   : > { %v1294_v19 = vpack.c.b16 %v1292_v17, %v1292_v17 }
 0x1ea   : > { %v1190_v31 = vpop.permute.xlu0 %1189 }
 0x1eb   : > { %1199 = vst.msk [vmem:[#allocation5 + $0xc] sm:$0xf] %vm1065_vm1, %v1190_v31 }
 0x1ee   : > { %v1205_v33 = vpop.permute.xlu1 %1204  ;;  %v1077_v34 = vpop.permute.xlu2 %1076 }
 0x1ef   : > { %1213 = vst.msk [vmem:[#allocation5 + $0x1c] sm:$0xf] %vm1065_vm1, %v1205_v33  ;;  %v1239_v33 = vld [vmem:[#allocation5 + $0x2c] sm:$0xf] }
 0x1f0   : > { %1084 = vst.msk [vmem:[#allocation4 + $0x14] sm:$0xf] %vm1065_vm1, %v1077_v34  ;;  %2588 = vmatmul.msk.bf16.gmra.mxu1 %vm799_vm0, %v2789_v32  ;;  %v1368_v34 = vunpack.c.l.b16 %v1239_v33 }
 0x1f2   : > { %v1086_v35 = vpop.permute.xlu0 %1085  ;;  %v2799_v5 = vld [vmem:[#allocation5 + $0xc] sm:$0xff] }
 0x1f3   : > { %1095 = vst.msk [vmem:[#allocation4 + $0x18] sm:$0xf] %vm1065_vm1, %v1086_v35  ;;  %v1370_v35 = vpack.c.b16 %v1368_v34, %v1368_v34 }
 0x1f6   : > { %v3648_v36 = vpop.permute.xlu1 %916  ;;  %v1073_v37 = vpop.permute.xlu2 %1072  ;;  %v2800_v20 = vld [vmem:[#allocation5 + $0x18] sm:$0xff] }
 0x1f7   : > { %1082 = vst.msk [vmem:[#allocation4 + $0xc] sm:$0xf] %vm1065_vm1, %v1073_v37  ;;  %v1566_v58 = vld [vmem:[#allocation4 + $0x14] sm:$0xf] }
 0x1f8   : > { %v1631_v59 = vunpack.c.l.b16 %v1566_v58 }
 0x1fa   : > { %v1103_v38 = vpop.permute.xlu0 %1102  ;;  %v1633_v63 = vpack.c.b16 %v1631_v59, %v1631_v59 }
 0x1fb   : > { %1110 = vst.msk [vmem:[#allocation4 + $0x2c] sm:$0xf] %vm1065_vm1, %v1103_v38 }
 0x1fc   : > { %v1642_v3 = vsel %vm1596_vm2, %v1633_v63, 0 }
 0x1fe   : > { %v1218_v39 = vpop.permute.xlu1 %1217 }
 0x1ff   : > { %1226 = vst.msk [vmem:[#allocation5 + $0x28] sm:$0xf] %vm1065_vm1, %v1218_v39 }
 0x206   : > { %v1207_v40 = vpop.permute.xlu1 %1206  ;;  %v2801_v32 = vld [vmem:[#allocation5 + $0x24] sm:$0xff] }
 0x207   : > { %1214 = vst.msk [vmem:[#allocation5 + $0x20] sm:$0xf] %vm1065_vm1, %v1207_v40 }
 0x20e   : > { %v1090_v41 = vpop.permute.xlu1 %1089 }
 0x20f   : > { %1097 = vst.msk [vmem:[#allocation4 + $0x20] sm:$0xf] %vm1065_vm1, %v1090_v41 }
 0x23d   : > { %v960_v43 = vpop.f32.mrf.mxu1 }
 0x23e   : > { %v961_v44 = vadd.f32 %v960_v43, %v882_v21 }
 0x240   : > { %v980_v45 = vpack.c.bf16 %v961_v44, %v961_v44 }
 0x242   : > { %983 = vst.msk [vmem:[#allocation3] sm:$0xf] %vm982_vm3, %v980_v45 }
 0x245   : > { %v962_v46 = vpop.f32.mrf.mxu1 }
 0x246   : > { %v963_v47 = vadd.f32 %v962_v46, %v887_v24  ;;  %v1572_v24 = vld [vmem:[#allocation4 + $0x2c] sm:$0xf] }
 0x247   : > { %v1719_v25 = vunpack.c.l.b16 %v1572_v24 }
 0x248   : > { %v981_v49 = vpack.c.bf16 %v963_v47, %v963_v47 }
 0x249   : > { %v1721_v27 = vpack.c.b16 %v1719_v25, %v1719_v25 }
 0x24a   : > { %984 = vst.msk [vmem:[#allocation3 + $0x4] sm:$0xf] %vm982_vm3, %v981_v49 }
 0x24b   : > { %v1730_v30 = vsel %vm1596_vm2, %v1721_v27, 0 }
 0x24d   : > { %v965_v50 = vpop.f32.mrf.mxu1 }
 0x24e   : > { %v966_v51 = vadd.f32 %v965_v50, %v3626_v6 }
 0x250   : > { %v985_v52 = vpack.c.bf16 %v966_v51, %v966_v51 }
 0x251   : > { %v2802_v53 = vld [vmem:[#allocation3] sm:$0xff] }
 0x252   : > { %988 = vst.msk [vmem:[#allocation3 + $0x8] sm:$0xf] %vm982_vm3, %v985_v52  ;;  %1276 = vmatpush.bf16.msrb.mxu0 %v2802_v53 }
 0x255   : > { %v967_v55 = vpop.f32.mrf.mxu1  ;;  %2633 = vmatmul.msk.bf16.vlgmr.msrb.gmra.mxu0 %vm1262_vm4, %v2798_v54 }
 0x256   : > { %v968_v56 = vadd.f32 %v967_v55, %v3628_v9  ;;  %v1569_v9 = vld [vmem:[#allocation4 + $0x20] sm:$0xf] }
 0x257   : > { %v1675_v10 = vunpack.c.l.b16 %v1569_v9 }
 0x258   : > { %v986_v57 = vpack.c.bf16 %v968_v56, %v968_v56 }
 0x259   : > { %v1677_v14 = vpack.c.b16 %v1675_v10, %v1675_v10 }
 0x25a   : > { %989 = vst.msk [vmem:[#allocation3 + $0xc] sm:$0xf] %vm982_vm3, %v986_v57 }
 0x25d   : > { %v970_v60 = vpop.f32.mrf.mxu1 }
 0x25e   : > { %v971_v62 = vadd.f32 %v970_v60, %v902_v26  ;;  %v1236_v26 = vld [vmem:[#allocation5 + $0x20] sm:$0xf] }
 0x25f   : > { %v1330_v28 = vunpack.c.l.b16 %v1236_v26 }
 0x260   : > { %v990_v0 = vpack.c.bf16 %v971_v62, %v971_v62 }
 0x261   : > { %v2803_v2 = vld [vmem:[#allocation3 + $0x8] sm:$0xff]  ;;  %v1332_v31 = vpack.c.b16 %v1330_v28, %v1330_v28 }
 0x262   : > { %993 = vst.msk [vmem:[#allocation3 + $0x10] sm:$0xf] %vm982_vm3, %v990_v0  ;;  %1314 = vmatpush.bf16.msrb.mxu2 %v2803_v2 }
 0x265   : > { %v972_v6 = vpop.f32.mrf.mxu1  ;;  %2634 = vmatmul.msk.bf16.gmra.mxu0 %vm1262_vm4, %v1255_v4  ;;  %2643 = vmatmul.msk.bf16.vlgmr.msrb.gmra.mxu2 %vm1262_vm4, %v2799_v5 }
 0x266   : > { %1650 = vmatpush.bf16.msra.mxu2 %v1642_v3  ;;  %v973_v7 = vadd.f32 %v972_v6, %v3630_v16  ;;  %v1686_v16 = vsel %vm1596_vm2, %v1677_v14, 0 }
 0x268   : > { %v991_v8 = vpack.c.bf16 %v973_v7, %v973_v7 }
 0x26a   : > { %994 = vst.msk [vmem:[#allocation3 + $0x14] sm:$0xf] %vm982_vm3, %v991_v8 }
 0x26d   : > { %v975_v11 = vpop.f32.mrf.mxu1 }
 0x26e   : > { %v976_v13 = vadd.f32 %v975_v11, %v3635_v23 }
 0x270   : > { %v995_v15 = vpack.c.bf16 %v976_v13, %v976_v13 }
 0x271   : > { %v2804_v18 = vld [vmem:[#allocation3 + $0x10] sm:$0xff] }
 0x272   : > { %998 = vst.msk [vmem:[#allocation3 + $0x18] sm:$0xf] %vm982_vm3, %v995_v15  ;;  %1352 = vmatpush.bf16.msrb.mxu3 %v2804_v18 }
 0x275   : > { %v977_v21 = vpop.f32.mrf.mxu1  ;;  %2644 = vmatmul.msk.bf16.gmra.mxu2 %vm1262_vm4, %v1294_v19  ;;  %2653 = vmatmul.msk.bf16.vlgmr.msrb.gmra.mxu3 %vm1262_vm4, %v2800_v20 }
 0x276   : > { %1694 = vmatpush.bf16.msra.mxu3 %v1686_v16  ;;  %v978_v22 = vadd.f32 %v977_v21, %v3648_v36  ;;  %v1401_v36 = vlaneseq }
 0x278   : > { %v996_v23 = vpack.c.bf16 %v978_v22, %v978_v22  ;;  %v1402_v37 = vand.u32 127, %v1401_v36 }
 0x27a   : > { %999 = vst.msk [vmem:[#allocation3 + $0x1c] sm:$0xf] %vm982_vm3, %v996_v23  ;;  %vm1403_vm5 = vcmp.lt.s32.totalorder %v1402_v37, 20 }
 0x281   : > { %v2805_v29 = vld [vmem:[#allocation3 + $0x18] sm:$0xff] }
 0x282   : > { %1390 = vmatpush.bf16.msra.mxu0 %v2805_v29 }
 0x285   : > { %2654 = vmatmul.msk.bf16.gmra.mxu3 %vm1262_vm4, %v1332_v31  ;;  %2663 = vmatmul.msk.bf16.vlgmr.msra.gmra.mxu0 %vm1262_vm4, %v2801_v32 }
 0x286   : > { %1738 = vmatpush.bf16.msrb.mxu0 %v1730_v30 }
 0x295   : > { %2664 = vmatmul.msk.bf16.gmra.mxu0 %vm1262_vm4, %v1370_v35 }
 0x2d2   : > { %v1278_v38 = vpop.f32.mrf.mxu0 }
 0x2d3   : > { %v3680_v39 = vsel %vm1403_vm5, %v1278_v38, -1e+30 }
 0x2d4   : > { %v1417_v40 = vsel %vm1416_vm6, %v3680_v39, -inf }
 0x2d5   : > { %1418 = vmax.xlane.f32.xlu2 %v1417_v40 }
 0x2da   : > { %v1280_v41 = vpop.f32.mrf.mxu0 }
 0x2db   : > { %v3685_v43 = vsel %vm1403_vm5, %v1280_v41, -1e+30 }
 0x2dc   : > { %v1420_v44 = vsel %vm1416_vm6, %v3685_v43, -inf }
 0x2dd   : > { %1421 = vmax.xlane.f32.xlu1 %v1420_v44 }
 0x2e2   : > { %v1283_v45 = vpop.f32.mrf.mxu0 }
 0x2e3   : > { %v3690_v46 = vsel %vm1403_vm5, %v1283_v45, -1e+30 }
 0x2e8   : > { %v1316_v47 = vpop.f32.mrf.mxu2 }
 0x2e9   : > { %v1407_v49 = vsel %vm1403_vm5, %v1316_v47, -1e+30 }
 0x2ea   : > { %v1285_v50 = vpop.f32.mrf.mxu0  ;;  %v1426_v51 = vsel %vm1416_vm6, %v1407_v49, -inf }
 0x2eb   : > { %1427 = vmax.xlane.f32.xlu1 %v1426_v51 }
 0x2f0   : > { %v1318_v52 = vpop.f32.mrf.mxu2 }
 0x2f1   : > { %v1408_v53 = vsel %vm1403_vm5, %v1318_v52, -1e+30 }
 0x2f2   : > { %v1429_v54 = vsel %vm1416_vm6, %v1408_v53, -inf }
 0x2f3   : > { %1430 = vmax.xlane.f32.xlu2 %v1429_v54 }
 0x2f8   : > { %v1321_v55 = vpop.f32.mrf.mxu2  ;;  %v1354_v56 = vpop.f32.mrf.mxu3 }
 0x2f9   : > { %v1410_v57 = vsel %vm1403_vm5, %v1354_v56, -1e+30  ;;  %v3699_v59 = vsel %vm1403_vm5, %v1321_v55, -1e+30 }
 0x2fa   : > { %v1435_v58 = vsel %vm1416_vm6, %v1410_v57, -inf  ;;  %v1432_v0 = vsel %vm1416_vm6, %v3699_v59, -inf }
 0x2fb   : > { %1436 = vmax.xlane.f32.xlu2 %v1435_v58 }
 0x300   : > { %v1323_v60 = vpop.f32.mrf.mxu2  ;;  %v1356_v61 = vpop.f32.mrf.mxu3 }
 0x301   : > { %v1411_v62 = vsel %vm1403_vm5, %v1356_v61, -1e+30 }
 0x302   : > { %v1392_v63 = vpop.f32.mrf.mxu0  ;;  %v1438_v1 = vsel %vm1416_vm6, %v1411_v62, -inf }
 0x303   : > { %1433 = vmax.xlane.f32.xlu2 %v1432_v0  ;;  %1439 = vmax.xlane.f32.xlu1 %v1438_v1  ;;  %v1413_v2 = vsel %vm1403_vm5, %v1392_v63, -1e+30 }
 0x304   : > { %v1444_v7 = vsel %vm1416_vm6, %v1413_v2, -inf }
 0x308   : > { %v1359_v3 = vpop.f32.mrf.mxu3 }
 0x309   : > { %v3707_v4 = vsel %vm1403_vm5, %v1359_v3, -1e+30 }
 0x30a   : > { %v1394_v5 = vpop.f32.mrf.mxu0  ;;  %v1441_v6 = vsel %vm1416_vm6, %v3707_v4, -inf }
 0x30b   : > { %1442 = vmax.xlane.f32.xlu1 %v1441_v6  ;;  %1445 = vmax.xlane.f32.xlu2 %v1444_v7  ;;  %v1414_v8 = vsel %vm1403_vm5, %v1394_v5, -1e+30  ;;  %v1423_v6 = vsel %vm1416_vm6, %v3690_v46, -inf }
 0x30c   : > { %v1447_v11 = vsel %vm1416_vm6, %v1414_v8, -inf }
 0x310   : > { %v1361_v9 = vpop.f32.mrf.mxu3 }
 0x312   : > { %v1397_v10 = vpop.f32.mrf.mxu0 }
 0x313   : > { %v3715_v12 = vsel %vm1403_vm5, %v1397_v10, -1e+30  ;;  %1448 = vmax.xlane.f32.xlu1 %v1447_v11 }
 0x314   : > { %v1450_v14 = vsel %vm1416_vm6, %v3715_v12, -inf }
 0x31a   : > { %v1399_v13 = vpop.f32.mrf.mxu0 }
 0x323   : > { %1087 = vrot.lane.b32.xlu2 %v3596_v48, %s3298_s3 }
 0x32c   : > { %1074 = vrot.lane.b32.xlu1 %v3596_v48, %s3299_s29 }
 0x348   : > { %v1419_v17 = vpop.xlane.xlu2 %1418 }
 0x349   : > { %v1453_v44 = vsub.f32 %v3680_v39, %v1419_v17 }
 0x34b   : > { %v1465_v47 = vmul.f32 1.442695, %v1453_v44 }
 0x350   : > { %v1422_v15 = vpop.xlane.xlu1 %1421 }
 0x351   : > { %v1454_v52 = vsub.f32 %v3685_v43, %v1422_v15 }
 0x353   : > { %v1467_v56 = vmul.f32 1.442695, %v1454_v52 }
 0x356   : > { %1451 = vmax.xlane.f32.xlu1 %v1450_v14 }
 0x35e   : > { %v1428_v18 = vpop.xlane.xlu1 %1427 }
 0x35f   : > { %v1456_v16 = vsub.f32 %v1407_v49, %v1428_v18 }
 0x361   : > { %v1471_v19 = vmul.f32 1.442695, %v1456_v16 }
 0x363   : > { %2971 = vpow2.f32 %v1471_v19 }
 0x366   : > { %v1431_v20 = vpop.xlane.xlu2 %1430 }
 0x367   : > { %v1457_v21 = vsub.f32 %v1408_v53, %v1431_v20 }
 0x369   : > { %v3723_v22 = vpop.eup %2971  ;;  %v1473_v23 = vmul.f32 1.442695, %v1457_v21 }
 0x36a   : > { %v1498_v24 = vsel %vm1416_vm6, %v3723_v22, 0.0 }
 0x36b   : > { %2973 = vpow2.f32 %v1473_v23  ;;  %1499 = vadd.xlane.f32.xlu2 %v1498_v24 }
 0x36e   : > { %v1437_v25 = vpop.xlane.xlu2 %1436 }
 0x36f   : > { %v1459_v26 = vsub.f32 %v1410_v57, %v1437_v25 }
 0x371   : > { %v3727_v27 = vpop.eup %2973  ;;  %v1477_v28 = vmul.f32 1.442695, %v1459_v26 }
 0x372   : > { %v1501_v29 = vsel %vm1416_vm6, %v3727_v27, 0.0 }
 0x373   : > { %2975 = vpow2.f32 %v1477_v28  ;;  %1502 = vadd.xlane.f32.xlu1 %v1501_v29 }
 0x376   : > { %v1434_v30 = vpop.xlane.xlu2 %1433  ;;  %v1440_v31 = vpop.xlane.xlu1 %1439 }
 0x377   : > { %v1460_v32 = vsub.f32 %v1411_v62, %v1440_v31  ;;  %v1458_v55 = vsub.f32 %v3699_v59, %v1434_v30 }
 0x379   : > { %v3731_v33 = vpop.eup %2975  ;;  %v1479_v34 = vmul.f32 1.442695, %v1460_v32  ;;  %v1475_v57 = vmul.f32 1.442695, %v1458_v55 }
 0x37a   : > { %v1507_v35 = vsel %vm1416_vm6, %v3731_v33, 0.0 }
 0x37b   : > { %1508 = vadd.xlane.f32.xlu0 %v1507_v35  ;;  %2977 = vpow2.f32 %v1479_v34 }
 0x37e   : > { %v1443_v36 = vpop.xlane.xlu1 %1442  ;;  %v1446_v37 = vpop.xlane.xlu2 %1445 }
 0x37f   : > { %v1462_v38 = vsub.f32 %v1413_v2, %v1446_v37  ;;  %v1461_v61 = vsub.f32 %v3707_v4, %v1443_v36 }
 0x381   : > { %v1483_v40 = vmul.f32 1.442695, %v1462_v38  ;;  %v3735_v41 = vpop.eup %2977  ;;  %v1481_v63 = vmul.f32 1.442695, %v1461_v61 }
 0x382   : > { %v1510_v45 = vsel %vm1416_vm6, %v3735_v41, 0.0 }
 0x383   : > { %2979 = vpow2.f32 %v1483_v40  ;;  %1511 = vadd.xlane.f32.xlu2 %v1510_v45 }
 0x384   : > { %2981 = vpow2.f32 %v1465_v47 }
 0x386   : > { %v1088_v49 = vpop.permute.xlu2 %1087  ;;  %v1449_v50 = vpop.xlane.xlu1 %1448 }
 0x387   : > { %1096 = vst.msk [vmem:[#allocation4 + $0x1c] sm:$0xf] %vm1065_vm1, %v1088_v49  ;;  %v1463_v51 = vsub.f32 %v1414_v8, %v1449_v50 }
 0x389   : > { %v1485_v53 = vmul.f32 1.442695, %v1463_v51  ;;  %v3742_v54 = vpop.eup %2979 }
 0x38a   : > { %v1516_v39 = vsel %vm1416_vm6, %v3742_v54, 0.0  ;;  %v3749_v60 = vpop.eup %2981 }
 0x38b   : > { %2983 = vpow2.f32 %v1485_v53  ;;  %1517 = vadd.xlane.f32.xlu1 %v1516_v39  ;;  %v1489_v62 = vsel %vm1416_vm6, %v3749_v60, 0.0 }
 0x38c   : > { %2985 = vpow2.f32 %v1467_v56 }
 0x38d   : > { %2987 = vpow2.f32 %v1475_v57 }
 0x38e   : > { %v2808_v58 = vld [vmem:[#allocation4 + $0x18] sm:$0xff]  ;;  %2989 = vpow2.f32 %v1481_v63 }
 0x38f   : > { %1098 = vrot.lane.b32.xlu0 %v3589_v42, %s3300_s22  ;;  %1695 = vmatpush.bf16.msra.mxu3 %v2808_v58 }
 0x391   : > { %v3751_v43 = vpop.eup %2983 }
 0x392   : > { %v1519_v59 = vsel %vm1416_vm6, %v3751_v43, 0.0  ;;  %v3758_v0 = vpop.eup %2985 }
 0x393   : > { %1520 = vadd.xlane.f32.xlu2 %v1519_v59  ;;  %1490 = vadd.xlane.f32.xlu1 %v1489_v62  ;;  %v3762_v42 = vpop.eup %2987  ;;  %v1492_v1 = vsel %vm1416_vm6, %v3758_v0, 0.0 }
 0x394   : > { %v1504_v2 = vsel %vm1416_vm6, %v3762_v42, 0.0  ;;  %v3768_v4 = vpop.eup %2989 }
 0x395   : > { %v1513_v5 = vsel %vm1416_vm6, %v3768_v4, 0.0 }
 0x397   : > { %1100 = vrot.lane.b32.xlu0 %v3596_v48, %s3300_s22  ;;  %s2409_s22 = sshll.u32 %s2406_s4, 4  ;;  %s2410_s22 = int_to_ptr.hbm [resolvable:$true] %s2409_s22 }
 0x39b   : > { %1493 = vadd.xlane.f32.xlu2 %v1492_v1  ;;  %1505 = vadd.xlane.f32.xlu1 %v1504_v2 }
 0x39e   : > { %v1075_v3 = vpop.permute.xlu1 %1074 }
 0x39f   : > { %1083 = vst.msk [vmem:[#allocation4 + $0x10] sm:$0xf] %vm1065_vm1, %v1075_v3 }
 0x3a3   : > { %1514 = vadd.xlane.f32.xlu2 %v1513_v5 }
 0x3a6   : > { %v2807_v48 = vld [vmem:[#allocation4 + $0xc] sm:$0xff] }
 0x3a7   : > { %1651 = vmatpush.bf16.msra.mxu2 %v2807_v48 }
 0x3c1   : > { %1424 = vmax.xlane.f32.xlu0 %v1423_v6 }
 0x3c9   : > { %v1452_v7 = vpop.xlane.xlu1 %1451 }
 0x3ca   : > { %v1464_v8 = vsub.f32 %v3715_v12, %v1452_v7 }
 0x3cc   : > { %v1487_v9 = vmul.f32 1.442695, %v1464_v8 }
 0x3ce   : > { %2991 = vpow2.f32 %v1487_v9 }
 0x3d4   : > { %v3776_v10 = vpop.eup %2991 }
 0x3d5   : > { %v1522_v11 = vsel %vm1416_vm6, %v3776_v10, 0.0 }
 0x3d6   : > { %1523 = vadd.xlane.f32.xlu1 %v1522_v11 }
 0x3de   : > { %v1500_v13 = vpop.xlane.xlu2 %1499 }
 0x3df   : > { %2993 = vrcp.f32 %v1500_v13 }
 0x3e5   : > { %v2994_v15 = vpop.eup %2993 }
 0x3e6   : > { %v1503_v14 = vpop.xlane.xlu1 %1502  ;;  %v1540_v17 = vmul.f32 %v2994_v15, %v3723_v22 }
 0x3e7   : > { %2995 = vrcp.f32 %v1503_v14 }
 0x3e8   : > { %v1552_v16 = vpack.c.bf16 %v1540_v17, %v1540_v17 }
 0x3ea   : > { %v1621_v21 = vunpack.c.l.b16 %v1552_v16 }
 0x3ed   : > { %v2996_v18 = vpop.eup %2995 }
 0x3ee   : > { %v1541_v19 = vmul.f32 %v2996_v18, %v3727_v27  ;;  %v1509_v12 = vpop.xlane.xlu0 %1508 }
 0x3ef   : > { %2997 = vrcp.f32 %v1509_v12 }
 0x3f0   : > { %v1553_v20 = vpack.c.bf16 %v1541_v19, %v1541_v19 }
 0x3f2   : > { %v1622_v23 = vunpack.c.l.b16 %v1553_v20 }
 0x3f4   : > { %v1624_v24 = vpack.c.b16 %v1622_v23, %v1621_v21 }
 0x3f5   : > { %v2998_v26 = vpop.eup %2997 }
 0x3f6   : > { %2675 = vmatmul.msk.bf16.vlgmr.msra.gmra.mxu2 %vm1416_vm6, %v1624_v24  ;;  %v1512_v25 = vpop.xlane.xlu2 %1511  ;;  %v1543_v28 = vmul.f32 %v2998_v26, %v3731_v33 }
 0x3f7   : > { %2999 = vrcp.f32 %v1512_v25 }
 0x3f8   : > { %v1555_v30 = vpack.c.bf16 %v1543_v28, %v1543_v28 }
 0x3fa   : > { %v1665_v34 = vunpack.c.l.b16 %v1555_v30 }
 0x3fd   : > { %v3000_v29 = vpop.eup %2999 }
 0x3fe   : > { %v1544_v22 = vmul.f32 %v3000_v29, %v3735_v41  ;;  %v1518_v31 = vpop.xlane.xlu1 %1517 }
 0x3ff   : > { %3001 = vrcp.f32 %v1518_v31 }
 0x400   : > { %v1556_v32 = vpack.c.bf16 %v1544_v22, %v1544_v22 }
 0x401   : > { %v1099_v27 = vpop.permute.xlu0 %1098 }
 0x402   : > { %1108 = vst.msk [vmem:[#allocation4 + $0x24] sm:$0xf] %vm1065_vm1, %v1099_v27  ;;  %v1666_v35 = vunpack.c.l.b16 %v1556_v32 }
 0x404   : > { %v1668_v36 = vpack.c.b16 %v1666_v35, %v1665_v34 }
 0x405   : > { %v3002_v38 = vpop.eup %3001 }
 0x406   : > { %v1521_v37 = vpop.xlane.xlu2 %1520  ;;  %2681 = vmatmul.msk.bf16.vlgmr.msra.gmra.mxu3 %vm1416_vm6, %v1668_v36  ;;  %v1491_v40 = vpop.xlane.xlu1 %1490  ;;  %v1546_v44 = vmul.f32 %v3002_v38, %v3742_v54 }
 0x407   : > { %3003 = vrcp.f32 %v1521_v37 }
 0x408   : > { %3005 = vrcp.f32 %v1491_v40  ;;  %v1558_v45 = vpack.c.bf16 %v1546_v44, %v1546_v44 }
 0x409   : > { %v1101_v33 = vpop.permute.xlu0 %1100 }
 0x40a   : > { %1109 = vst.msk [vmem:[#allocation4 + $0x28] sm:$0xf] %vm1065_vm1, %v1101_v33  ;;  %v1709_v55 = vunpack.c.l.b16 %v1558_v45 }
 0x40d   : > { %v3004_v41 = vpop.eup %3003 }
 0x40e   : > { %v1547_v47 = vmul.f32 %v3004_v41, %v3751_v43  ;;  %v1494_v49 = vpop.xlane.xlu2 %1493  ;;  %v3006_v50 = vpop.eup %3005 }
 0x40f   : > { %3007 = vrcp.f32 %v1494_v49  ;;  %v1506_v51 = vpop.xlane.xlu1 %1505  ;;  %v1537_v56 = vmul.f32 %v3006_v50, %v3749_v60 }
 0x410   : > { %v1559_v52 = vpack.c.bf16 %v1547_v47, %v1547_v47  ;;  %3009 = vrcp.f32 %v1506_v51 }
 0x411   : > { %v2809_v53 = vld [vmem:[#allocation4 + $0x24] sm:$0xff]  ;;  %v1549_v61 = vpack.c.bf16 %v1537_v56, %v1537_v56 }
 0x412   : > { %v1710_v39 = vunpack.c.l.b16 %v1559_v52  ;;  %1739 = vmatpush.bf16.msrb.mxu0 %v2809_v53 }
 0x413   : > { %v1576_v2 = vunpack.c.l.b16 %v1549_v61 }
 0x414   : > { %v1712_v57 = vpack.c.b16 %v1710_v39, %v1709_v55  ;;  %v2814_v55 = vld [vmem:[#allocation12 + $0x18] sm:$0xff]  ;;  %v2813_v39 = vld [vmem:[#allocation12 + $0x10] sm:$0xff] }
 0x415   : > { %v3008_v54 = vpop.eup %3007  ;;  %1870 = vmatpush.bf16.msrb.mxu1 %v2814_v55 }
 0x416   : > { %v3010_v58 = vpop.eup %3009  ;;  %v1538_v59 = vmul.f32 %v3008_v54, %v3758_v0  ;;  %v1515_v62 = vpop.xlane.xlu2 %1514  ;;  %2687 = vmatmul.msk.bf16.vlgmr.msrb.gmra.mxu0 %vm1416_vm6, %v1712_v57  ;;  %v2812_v54 = vld [vmem:[#allocation12 + $0x8] sm:$0xff] }
 0x417   : > { %3011 = vrcp.f32 %v1515_v62  ;;  %v1542_v43 = vmul.f32 %v3010_v58, %v3762_v42  ;;  %v2811_v58 = vld [vmem:[#allocation12] sm:$0xff] }
 0x418   : > { %v1550_v63 = vpack.c.bf16 %v1538_v59, %v1538_v59 }
 0x419   : > { %v1554_v1 = vpack.c.bf16 %v1542_v43, %v1542_v43  ;;  %1871 = vmatpush.bf16.msrb.mxu1 %v2813_v39  ;;  %v2815_v39 = vld [vmem:[#allocation13] sm:$0xff] }
 0x41a   : > { %v1577_v3 = vunpack.c.l.b16 %v1550_v63 }
 0x41b   : > { %v1623_v5 = vunpack.c.l.b16 %v1554_v1 }
 0x41c   : > { %v1579_v48 = vpack.c.b16 %v1577_v3, %v1576_v2 }
 0x41d   : > { %v3012_v60 = vpop.eup %3011  ;;  %v1625_v6 = vpack.c.b16 %v1623_v5, %v1623_v5  ;;  %1872 = vmatpush.bf16.msrb.mxu1 %v2812_v54 }
 0x41e   : > { %2669 = vmatmul.msk.bf16.vlgmr.msra.gmra.mxu1 %vm1416_vm6, %v1579_v48  ;;  %v1545_v7 = vmul.f32 %v3012_v60, %v3768_v4 }
 0x41f   : > { %2676 = vmatmul.msk.bf16.gmra.mxu2 %vm1416_vm6, %v1625_v6 }
 0x420   : > { %v1557_v0 = vpack.c.bf16 %v1545_v7, %v1545_v7 }
 0x421   : > { %1873 = vmatpush.bf16.msrb.mxu1 %v2811_v58 }
 0x422   : > { %v1667_v8 = vunpack.c.l.b16 %v1557_v0 }
 0x424   : > { %v1669_v9 = vpack.c.b16 %v1667_v8, %v1667_v8  ;;  %v2963_v8 = vld [vmem:[%s3986_s10] ss:$0 sm:$0xff] }
 0x426   : > { %2682 = vmatmul.msk.bf16.gmra.mxu3 %vm1416_vm6, %v1669_v9 }
 0x434   : > { %v1425_v42 = vpop.xlane.xlu0 %1424 }
 0x435   : > { %v1455_v11 = vsub.f32 %v3690_v46, %v1425_v42 }
 0x437   : > { %v1469_v13 = vmul.f32 1.442695, %v1455_v11  ;;  %v3045_v11 = vld [vmem:[#allocation2] sm:$0xff] }
 0x439   : > { %3013 = vpow2.f32 %v1469_v13 }
 0x43f   : > { %v3014_v14 = vpop.eup %3013 }
 0x440   : > { %v1495_v15 = vsel %vm1416_vm6, %v3014_v14, 0.0 }
 0x441   : > { %1496 = vadd.xlane.f32.xlu2 %v1495_v15 }
 0x449   : > { %v1524_v17 = vpop.xlane.xlu1 %1523 }
 0x44a   : > { %3015 = vrcp.f32 %v1524_v17 }
 0x450   : > { %v3016_v18 = vpop.eup %3015 }
 0x451   : > { %v1548_v4 = vmul.f32 %v3016_v18, %v3776_v10  ;;  %v3046_v18 = vld [vmem:[#allocation2 + $0x8] sm:$0xff] }
 0x453   : > { %v1560_v16 = vpack.c.bf16 %v1548_v4, %v1548_v4 }
 0x455   : > { %v1711_v19 = vunpack.c.l.b16 %v1560_v16 }
 0x457   : > { %v1713_v12 = vpack.c.b16 %v1711_v19, %v1711_v19 }
 0x459   : > { %2688 = vmatmul.msk.bf16.gmra.mxu0 %vm1416_vm6, %v1713_v12 }
 0x479   : > { %v1653_v20 = vpop.f32.mrf.mxu2 }
 0x47a   : > { %v1756_v21 = vpack.c.bf16 %v1653_v20, %v1653_v20  ;;  %v3047_v20 = vld [vmem:[#allocation2 + $0x10] sm:$0xff] }
 0x47c   : > { %1762 = vrot.lane.b32.xlu0 %v1756_v21, %s3301_s7 }
 0x481   : > { %v1655_v46 = vpop.f32.mrf.mxu2 }
 0x482   : > { %v1757_v23 = vpack.c.bf16 %v1655_v46, %v1655_v46 }
 0x484   : > { %1764 = vrot.lane.b32.xlu1 %v1757_v23, %s3301_s7 }
 0x489   : > { %v1697_v24 = vpop.f32.mrf.mxu3 }
 0x48a   : > { %v1775_v25 = vpack.c.bf16 %v1697_v24, %v1697_v24  ;;  %v3304_v24 = vmov 64.0  }
 0x48c   : > { %1781 = vrot.lane.b32.xlu2 %v1775_v25, %s3302_s13 }
 0x491   : > { %v1699_v26 = vpop.f32.mrf.mxu3 }
 0x492   : > { %v1776_v28 = vpack.c.bf16 %v1699_v26, %v1699_v26 }
 0x493   : > { %v1741_v29 = vpop.f32.mrf.mxu0 }
 0x494   : > { %v1794_v10 = vpack.c.bf16 %v1741_v29, %v1741_v29  ;;  %1783 = vrot.lane.b32.xlu0 %v1776_v28, %s3302_s13 }
 0x496   : > { %1800 = vrot.lane.b32.xlu1 %v1794_v10, %s3303_s18 }
 0x49b   : > { %v1609_v30 = vpop.f32.mrf.mxu1  ;;  %v1743_v22 = vpop.f32.mrf.mxu0 }
 0x49c   : > { %v1750_v31 = vpack.c.bf16 %v1609_v30, %v1609_v30  ;;  %v1795_v32 = vpack.c.bf16 %v1743_v22, %v1743_v22 }
 0x49e   : > { %1753 = vst.msk [vmem:[#allocation6] sm:$0xf] %vm1065_vm1, %v1750_v31  ;;  %1802 = vrot.lane.b32.xlu0 %v1795_v32, %s3303_s18 }
 0x4a2   : > { %v1658_v27 = vpop.f32.mrf.mxu2 }
 0x4a3   : > { %v1758_v34 = vpack.c.bf16 %v1658_v27, %v1658_v27  ;;  %v1611_v35 = vpop.f32.mrf.mxu1 }
 0x4a4   : > { %v1751_v36 = vpack.c.bf16 %v1611_v35, %v1611_v35 }
 0x4a5   : > { %1766 = vrot.lane.b32.xlu2 %v1758_v34, %s3301_s7  ;;  %s4046_s7 = sld [smem:[#allocation22_spill]] }
 0x4a6   : > { %1754 = vst.msk [vmem:[#allocation6 + $0x4] sm:$0xf] %vm1065_vm1, %v1751_v36 }
 0x4a9   : > { %v1702_v37 = vpop.f32.mrf.mxu3 }
 0x4aa   : > { %v1660_v38 = vpop.f32.mrf.mxu2  ;;  %v1777_v40 = vpack.c.bf16 %v1702_v37, %v1702_v37 }
 0x4ac   : > { %1785 = vrot.lane.b32.xlu1 %v1777_v40, %s3302_s13  ;;  %s744_s13 = sand.u32 1, %s4046_s7  }
 0x4ad   : > { %s2393_s21 = scalar_lea.sflag [#allocation9], %s744_s13 }
 0x4b1   : > { %v1704_v33 = vpop.f32.mrf.mxu3 }
 0x4b4   : > { %v1497_v44 = vpop.xlane.xlu2 %1496 }
 0x4b5   : > { %3017 = vrcp.f32 %v1497_v44 }
 0x4b6   : > { %3019 = vrcp.f32 %v3304_v24 }
 0x4bb   : > { %v3018_v41 = vpop.eup %3017 }
 0x4bc   : > { %v1539_v45 = vmul.f32 %v3018_v41, %v3014_v14  ;;  %v3020_v25 = vpop.eup %3019 }
 0x4bd   : > { %v1899_v26 = vmul.f32 64.0, %v3020_v25  ;;  %vm1903_vm10 = vweird.f32 %v3020_v25 }
 0x4be   : > { %v1551_v47 = vpack.c.bf16 %v1539_v45, %v1539_v45 }
 0x4bf   : > { %v1900_v28 = vsub.f32 1.0, %v1899_v26 }
 0x4c0   : > { %v1578_v49 = vunpack.c.l.b16 %v1551_v47 }
 0x4c1   : > { %v1901_v29 = vmul.f32 %v3020_v25, %v1900_v28 }
 0x4c2   : > { %v1580_v50 = vpack.c.b16 %v1578_v49, %v1578_v49  ;;  %v2818_v49 = vld [vmem:[#allocation13 + $0x18] sm:$0xff] }
 0x4c3   : > { %v1902_v10 = vadd.f32 %v3020_v25, %v1901_v29  ;;  %2022 = vmatpush.bf16.msrb.mxu2 %v2818_v49 }
 0x4c4   : > { %2670 = vmatmul.msk.bf16.gmra.mxu1 %vm1416_vm6, %v1580_v50  ;;  %v2817_v50 = vld [vmem:[#allocation13 + $0x10] sm:$0xff] }
 0x4c5   : > { %v3823_v30 = vsel %vm1903_vm10, %v3020_v25, %v1902_v10  ;;  %v3860_v10 = vld [vmem:[%s3990_s14] ss:$0 sm:$0xff] }
 0x4c7   : > { %2023 = vmatpush.bf16.msrb.mxu2 %v2817_v50 }
 0x4d6   : > { %v1746_v51 = vpop.f32.mrf.mxu0 }
 0x4d7   : > { %v1796_v52 = vpack.c.bf16 %v1746_v51, %v1746_v51  ;;  %v2816_v51 = vld [vmem:[#allocation13 + $0x8] sm:$0xff] }
 0x4d8   : > { %2024 = vmatpush.bf16.msrb.mxu2 %v2816_v51 }
 0x4d9   : > { %1804 = vrot.lane.b32.xlu0 %v1796_v52, %s3303_s18  ;;  %s2835_s18 = smul.u32 24, %s744_s13 }
 0x4db   : > { %s746_s30 = scalar_lea.vmem [#allocation16], %s2835_s18 }
 0x4dc   : > { %2025 = vmatpush.bf16.msrb.mxu2 %v2815_v39  ;;  %s2407_s29 = sshll.u32 %s746_s30, 4  ;;  %s2408_s29 = int_to_ptr.vmem [resolvable:$true] %s2407_s29 }
 0x4de   : > { %v1748_v53 = vpop.f32.mrf.mxu0 }
 0x4e6   : > { %v1782_v57 = vpop.permute.xlu2 %1781 }
 0x4ee   : > { %v1763_v56 = vpop.permute.xlu0 %1762 }
 0x4ef   : > { %1772 = vst.msk [vmem:[#allocation6] sm:$0xf] %vm1771_vm7, %v1763_v56 }
 0x4f0   : > { %1791 = vst.msk [vmem:[#allocation6] sm:$0xf] %vm1790_vm8, %v1782_v57 }
 0x4f6   : > { %v1765_v61 = vpop.permute.xlu1 %1764 }
 0x4f7   : > { %1773 = vst.msk [vmem:[#allocation6 + $0x4] sm:$0xf] %vm1771_vm7, %v1765_v61 }
 0x4ff   : > { %v1767_v3 = vpop.permute.xlu2 %1766 }
 0x506   : > { %v1784_v59 = vpop.permute.xlu0 %1783 }
 0x507   : > { %1792 = vst.msk [vmem:[#allocation6 + $0x4] sm:$0xf] %vm1790_vm8, %v1784_v59 }
 0x508   : > { %v1801_v62 = vpop.permute.xlu1 %1800 }
 0x509   : > { %1810 = vst.msk [vmem:[#allocation6] sm:$0xf] %vm1809_vm9, %v1801_v62 }
 0x510   : > { %v1803_v43 = vpop.permute.xlu0 %1802 }
 0x511   : > { %1811 = vst.msk [vmem:[#allocation6 + $0x4] sm:$0xf] %vm1809_vm9, %v1803_v43 }
 0x518   : > { %v2810_v63 = vld [vmem:[#allocation6] sm:$0xff] }
 0x519   : > { %2709 = vmatmul.msk.bf16.vlgmr.msrb.gmra.mxu1 %vm799_vm0, %v2810_v63 }
 0x51e   : > { %v1786_v5 = vpop.permute.xlu1 %1785 }
 0x541   : > { %v1614_v1 = vpop.f32.mrf.mxu1 }
 0x542   : > { %v1752_v2 = vpack.c.bf16 %v1614_v1, %v1614_v1 }
 0x544   : > { %1755 = vst.msk [vmem:[#allocation6 + $0x8] sm:$0xf] %vm1065_vm1, %v1752_v2 }
 0x545   : > { %1774 = vst.msk [vmem:[#allocation6 + $0x8] sm:$0xf] %vm1771_vm7, %v1767_v3 }
 0x546   : > { %1793 = vst.msk [vmem:[#allocation6 + $0x8] sm:$0xf] %vm1790_vm8, %v1786_v5 }
 0x549   : > { %v1616_v48 = vpop.f32.mrf.mxu1 }
 0x54b   : > { %v1805_v60 = vpop.permute.xlu0 %1804 }
 0x54c   : > { %1812 = vst.msk [vmem:[#allocation6 + $0x8] sm:$0xf] %vm1809_vm9, %v1805_v60 }
 0x553   : > { %v1815_v6 = vld [vmem:[#allocation6 + $0x8] sm:$0xf] }
 0x554   : > { %v1833_v7 = vunpack.c.l.b16 %v1815_v6  ;;  %v2964_v6 = vld [vmem:[%s3987_s11] ss:$0 sm:$0xff] }
 0x556   : > { %v1835_v0 = vpack.c.b16 %v1833_v7, %v1833_v7 }
 0x558   : > { %2710 = vmatmul.msk.bf16.gmra.mxu1 %vm799_vm0, %v1835_v0 }
 0x596   : > { %v1875_v9 = vpop.f32.mrf.mxu1 }
 0x597   : > { %v1876_v42 = vadd.f32 %v2963_v8, %v1875_v9  ;;  %v2965_v9 = vld [vmem:[%s3988_s12] ss:$0 sm:$0xff] }
 0x599   : > { %v1884_v13 = vadd.f32 %v3045_v11, %v1876_v42 }
 0x59b   : > { %v1889_v14 = vsel %vm799_vm0, %v1884_v13, 0.0 }
 0x59c   : > { %1890 = vadd.xlane.f32.xlu2 %v1889_v14 }
 0x59e   : > { %v1877_v15 = vpop.f32.mrf.mxu1 }
 0x59f   : > { %v1878_v17 = vadd.f32 %v2963_v8, %v1877_v15 }
 0x5a1   : > { %v1885_v4 = vadd.f32 %v3046_v18, %v1878_v17 }
 0x5a3   : > { %v1892_v16 = vsel %vm799_vm0, %v1885_v4, 0.0 }
 0x5a4   : > { %1893 = vadd.xlane.f32.xlu1 %v1892_v16 }
 0x5d5   : > { %v1880_v19 = vpop.f32.mrf.mxu1 }
 0x5d6   : > { %v1881_v12 = vadd.f32 %v2963_v8, %v1880_v19 }
 0x5d8   : > { %v1886_v21 = vadd.f32 %v3047_v20, %v1881_v12 }
 0x5da   : > { %v1895_v46 = vsel %vm799_vm0, %v1886_v21, 0.0 }
 0x5db   : > { %1896 = vadd.xlane.f32.xlu0 %v1895_v46 }
 0x5dd   : > { %v1882_v23 = vpop.f32.mrf.mxu1 }
 0x60f   : > { %v1891_v22 = vpop.xlane.xlu2 %1890 }
 0x610   : > { %v1905_v31 = vmul.f32 %v3823_v30, %v1891_v22 }
 0x612   : > { %v1908_v32 = vsub.f32 %v1884_v13, %v1905_v31 }
 0x614   : > { %v1911_v27 = vmul.f32 %v1908_v32, %v1908_v32 }
 0x616   : > { %v1914_v34 = vsel %vm799_vm0, %v1911_v27, 0.0  ;;  %v2826_v27 = vld [vmem:[%s3991_s15 + $0x38] sm:$0xff] }
 0x617   : > { %v1894_v35 = vpop.xlane.xlu1 %1893  ;;  %1915 = vadd.xlane.f32.xlu2 %v1914_v34  ;;  %2226 = vmatpush.bf16.msrb.mxu3 %v2826_v27 }
 0x618   : > { %v1906_v36 = vmul.f32 %v3823_v30, %v1894_v35 }
 0x61a   : > { %v1909_v37 = vsub.f32 %v1885_v4, %v1906_v36 }
 0x61c   : > { %v1912_v38 = vmul.f32 %v1909_v37, %v1909_v37 }
 0x61e   : > { %v1917_v40 = vsel %vm799_vm0, %v1912_v38, 0.0 }
 0x61f   : > { %1918 = vadd.xlane.f32.xlu1 %v1917_v40 }
 0x64e   : > { %v1897_v33 = vpop.xlane.xlu0 %1896 }
 0x64f   : > { %v1907_v44 = vmul.f32 %v3823_v30, %v1897_v33 }
 0x651   : > { %v3830_v41 = vsub.f32 %v1886_v21, %v1907_v44  ;;  %v2824_v44 = vld [vmem:[%s3991_s15 + $0x28] sm:$0xff] }
 0x653   : > { %v1913_v45 = vmul.f32 %v3830_v41, %v3830_v41 }
 0x655   : > { %v1920_v47 = vsel %vm799_vm0, %v1913_v45, 0.0 }
 0x656   : > { %1921 = vadd.xlane.f32.xlu0 %v1920_v47  ;;  %v2823_v47 = vld [vmem:[%s3991_s15 + $0x20] sm:$0xff] }
 0x68a   : > { %v1916_v52 = vpop.xlane.xlu2 %1915 }
 0x68b   : > { %v1923_v53 = vmul.f32 %v1916_v52, %v3823_v30 }
 0x68d   : > { %v1926_v55 = vadd.f32 1e-05, %v1923_v53  ;;  %v2822_v53 = vld [vmem:[%s3991_s15 + $0x18] sm:$0xff] }
 0x68f   : > { %3021 = vrsqrt.f32 %v1926_v55  ;;  %vm1935_vm12 = vweird.f32 %v1926_v55 }
 0x692   : > { %v1919_v56 = vpop.xlane.xlu1 %1918 }
 0x693   : > { %v1924_v57 = vmul.f32 %v1919_v56, %v3823_v30 }
 0x695   : > { %v3022_v54 = vpop.eup %3021  ;;  %v1927_v58 = vadd.f32 1e-05, %v1924_v57 }
 0x696   : > { %v1930_v61 = vmul.f32 %v3022_v54, %v1926_v55  ;;  %vm1936_vm11 = vweird.f32 %v3022_v54 }
 0x697   : > { %3023 = vrsqrt.f32 %v1927_v58  ;;  %vm1937_vm13 = vmor %vm1935_vm12, %vm1936_vm11  ;;  %vm1945_vm15 = vweird.f32 %v1927_v58 }
 0x698   : > { %v1931_v59 = vmul.f32 %v3022_v54, %v1930_v61 }
 0x69a   : > { %v1932_v62 = vmul.f32 0.5, %v1931_v59 }
 0x69c   : > { %v1933_v43 = vsub.f32 1.5, %v1932_v62 }
 0x69d   : > { %v3024_v63 = vpop.eup %3023 }
 0x69e   : > { %v1934_v1 = vmul.f32 %v3022_v54, %v1933_v43  ;;  %v1940_v2 = vmul.f32 %v3024_v63, %v1927_v58  ;;  %vm1946_vm14 = vweird.f32 %v3024_v63 }
 0x69f   : > { %vm1947_vm1 = vmor %vm1945_vm15, %vm1946_vm14 }
 0x6a0   : > { %v1941_v3 = vmul.f32 %v3024_v63, %v1940_v2  ;;  %v1938_v5 = vsel %vm1937_vm13, %v3022_v54, %v1934_v1  ;;  %v2821_v54 = vld [vmem:[%s3991_s15 + $0x10] sm:$0xff]  ;;  %v2820_v2 = vld [vmem:[%s3991_s15 + $0x8] sm:$0xff] }
 0x6a1   : > { %v1959_v7 = vmul.f32 %v1938_v5, %v1908_v32 }
 0x6a2   : > { %v1942_v48 = vmul.f32 0.5, %v1941_v3 }
 0x6a3   : > { %v1965_v42 = vmul.f32 %v2964_v6, %v1959_v7 }
 0x6a4   : > { %v1943_v60 = vsub.f32 1.5, %v1942_v48 }
 0x6a5   : > { %v3843_v14 = vadd.f32 %v2965_v9, %v1965_v42 }
 0x6a6   : > { %v1944_v0 = vmul.f32 %v3024_v63, %v1943_v60 }
 0x6a8   : > { %v1948_v8 = vsel %vm1947_vm1, %v3024_v63, %v1944_v0 }
 0x6a9   : > { %v1960_v11 = vmul.f32 %v1948_v8, %v1909_v37  ;;  %v2825_v37 = vld [vmem:[%s3991_s15 + $0x30] sm:$0xff]  ;;  %v2819_v8 = vld [vmem:[%s3991_s15] sm:$0xff] }
 0x6aa   : > { %2227 = vmatpush.bf16.msrb.mxu3 %v2825_v37 }
 0x6ab   : > { %v1966_v13 = vmul.f32 %v2964_v6, %v1960_v11 }
 0x6ad   : > { %v3845_v15 = vadd.f32 %v2965_v9, %v1966_v13 }
 0x6ae   : > { %2228 = vmatpush.bf16.msrb.mxu3 %v2824_v44 }
 0x6af   : > { %v1974_v17 = vpack.c.bf16 %v3845_v15, %v3843_v14 }
 0x6b1   : > { %2727 = vmatmul.msk.bf16.vlgmr.msrb.gmra.mxu2 %vm799_vm0, %v1974_v17 }
 0x6b2   : > { %2229 = vmatpush.bf16.msrb.mxu3 %v2823_v47 }
 0x6b6   : > { %2230 = vmatpush.bf16.msrb.mxu3 %v2822_v53 }
 0x6ba   : > { %2231 = vmatpush.bf16.msrb.mxu3 %v2821_v54 }
 0x6be   : > { %2232 = vmatpush.bf16.msrb.mxu3 %v2820_v2 }
 0x6c2   : > { %2233 = vmatpush.bf16.msrb.mxu3 %v2819_v8 }
 0x6c9   : > { %v1922_v18 = vpop.xlane.xlu0 %1921 }
 0x6ca   : > { %v1925_v4 = vmul.f32 %v1922_v18, %v3823_v30 }
 0x6cc   : > { %v1928_v16 = vadd.f32 1e-05, %v1925_v4 }
 0x6ce   : > { %3025 = vrsqrt.f32 %v1928_v16  ;;  %vm1955_vm3 = vweird.f32 %v1928_v16 }
 0x6d4   : > { %v3026_v19 = vpop.eup %3025 }
 0x6d5   : > { %v1950_v12 = vmul.f32 %v3026_v19, %v1928_v16  ;;  %vm1956_vm2 = vweird.f32 %v3026_v19 }
 0x6d6   : > { %vm1957_vm4 = vmor %vm1955_vm3, %vm1956_vm2 }
 0x6d7   : > { %v1951_v20 = vmul.f32 %v3026_v19, %v1950_v12 }
 0x6d9   : > { %v1952_v21 = vmul.f32 0.5, %v1951_v20 }
 0x6db   : > { %v1953_v46 = vsub.f32 1.5, %v1952_v21 }
 0x6dd   : > { %v1954_v23 = vmul.f32 %v3026_v19, %v1953_v46 }
 0x6df   : > { %v1958_v24 = vsel %vm1957_vm4, %v3026_v19, %v1954_v23 }
 0x6e0   : > { %v1961_v25 = vmul.f32 %v1958_v24, %v3830_v41 }
 0x6e2   : > { %v1967_v26 = vmul.f32 %v2964_v6, %v1961_v25 }
 0x6e4   : > { %v3852_v28 = vadd.f32 %v2965_v9, %v1967_v26 }
 0x6e6   : > { %v1975_v29 = vpack.c.bf16 %v3852_v28, %v3852_v28 }
 0x6e8   : > { %2728 = vmatmul.msk.bf16.gmra.mxu2 %vm799_vm0, %v1975_v29 }
 0x734   : > { %v2027_v22 = vpop.f32.mrf.mxu2 }
 0x735   : > { %v3863_v31 = vadd.f32 %v3860_v10, %v2027_v22 }
 0x737   : > { %v3866_v32 = vmul.f32 0.70710677, %v3863_v31 }
 0x739   : > { %v2042_v34 = vand.u32 2147483647, %v3866_v32  ;;  %vm2141_vm13 = vcmp.lt.f32.partialorder %v3866_v32, 0.0 }
 0x73b   : > { %v2045_v35 = vmul.f32 0.3275911, %v2042_v34  ;;  %v2123_v43 = vsub.f32 0.0, %v2042_v34 }
 0x73c   : > { %v2029_v36 = vpop.f32.mrf.mxu2 }
 0x73d   : > { %v2048_v38 = vadd.f32 1.0, %v2045_v35  ;;  %v3876_v40 = vadd.f32 %v3860_v10, %v2029_v36  ;;  %v2126_v60 = vmul.f32 %v2123_v43, %v2042_v34 }
 0x73f   : > { %3027 = vrcp.f32 %v2048_v38  ;;  %v3879_v33 = vmul.f32 0.70710677, %v3876_v40  ;;  %v2062_v55 = vand.u32 2147483648, %v2048_v38  ;;  %v2060_v56 = vand.u32 2147483647, %v2048_v38 }
 0x740   : > { %vm2056_vm6 = vweird.f32 %v2048_v38  ;;  %v2129_v13 = vmul.f32 1.442695, %v2126_v60 }
 0x741   : > { %v2043_v41 = vand.u32 2147483647, %v3879_v33  ;;  %v2063_v58 = vor.u32 1.1754944e-38, %v2062_v55  ;;  %vm2061_vm8 = vcmp.eq.f32.partialorder %v2060_v56, 8.507059e+37  ;;  %vm2142_vm14 = vcmp.lt.f32.partialorder %v3879_v33, 0.0 }
 0x743   : > { %v2046_v45 = vmul.f32 0.3275911, %v2043_v41  ;;  %v2124_v16 = vsub.f32 0.0, %v2043_v41 }
 0x745   : > { %v3028_v49 = vpop.eup %3027  ;;  %v2049_v51 = vadd.f32 1.0, %v2046_v45  ;;  %v2127_v46 = vmul.f32 %v2124_v16, %v2043_v41 }
 0x746   : > { %v2052_v50 = vmul.f32 %v3028_v49, %v2048_v38  ;;  %vm2057_vm5 = vweird.f32 %v3028_v49 }
 0x747   : > { %3029 = vrcp.f32 %v2049_v51  ;;  %vm2058_vm7 = vmor %vm2056_vm6, %vm2057_vm5  ;;  %v2077_v48 = vand.u32 2147483648, %v2049_v51  ;;  %v2075_v7 = vand.u32 2147483647, %v2049_v51  ;;  %vm2071_vm10 = vweird.f32 %v2049_v51 }
 0x748   : > { %v2053_v52 = vsub.f32 1.0, %v2052_v50  ;;  %3031 = vpow2.f32 %v2129_v13  ;;  %v2131_v29 = vmul.f32 1.442695, %v2127_v46 }
 0x749   : > { %v2078_v11 = vor.u32 1.1754944e-38, %v2077_v48  ;;  %vm2076_vm12 = vcmp.eq.f32.partialorder %v2075_v7, 8.507059e+37 }
 0x74a   : > { %v2054_v39 = vmul.f32 %v3028_v49, %v2053_v52  ;;  %3033 = vpow2.f32 %v2131_v29 }
 0x74c   : > { %v2055_v57 = vadd.f32 %v3028_v49, %v2054_v39 }
 0x74d   : > { %v3030_v61 = vpop.eup %3029 }
 0x74e   : > { %v2059_v59 = vsel %vm2058_vm7, %v3028_v49, %v2055_v57  ;;  %v2067_v63 = vmul.f32 %v3030_v61, %v2049_v51  ;;  %vm2072_vm9 = vweird.f32 %v3030_v61  ;;  %v3032_v22 = vpop.eup %3031 }
 0x74f   : > { %v2064_v62 = vsel %vm2061_vm8, %v2063_v58, %v2059_v59  ;;  %vm2073_vm11 = vmor %vm2071_vm10, %vm2072_vm9  ;;  %v2036_v58 = vmul.f32 0.5, %v3863_v31 }
 0x750   : > { %v2096_v1 = vmul.f32 1.0614054, %v2064_v62  ;;  %v2068_v3 = vsub.f32 1.0, %v2067_v63  ;;  %v3034_v47 = vpop.eup %3033 }
 0x752   : > { %v2099_v5 = vadd.f32 -1.4531521, %v2096_v1  ;;  %v2069_v6 = vmul.f32 %v3030_v61, %v2068_v3 }
 0x754   : > { %v2102_v0 = vmul.f32 %v2099_v5, %v2064_v62  ;;  %v2070_v9 = vadd.f32 %v3030_v61, %v2069_v6 }
 0x756   : > { %v2105_v42 = vadd.f32 1.4214138, %v2102_v0  ;;  %v2074_v17 = vsel %vm2073_vm11, %v3030_v61, %v2070_v9  ;;  %v2037_v61 = vmul.f32 0.5, %v3876_v40 }
 0x757   : > { %v2079_v4 = vsel %vm2076_vm12, %v2078_v11, %v2074_v17 }
 0x758   : > { %v2108_v18 = vmul.f32 %v2105_v42, %v2064_v62  ;;  %v2097_v19 = vmul.f32 1.0614054, %v2079_v4 }
 0x75a   : > { %v2111_v12 = vadd.f32 -0.28449672, %v2108_v18  ;;  %v2100_v20 = vadd.f32 -1.4531521, %v2097_v19 }
 0x75c   : > { %v2114_v21 = vmul.f32 %v2111_v12, %v2064_v62  ;;  %v2103_v23 = vmul.f32 %v2100_v20, %v2079_v4 }
 0x75e   : > { %v2117_v24 = vadd.f32 0.2548296, %v2114_v21  ;;  %v2106_v25 = vadd.f32 1.4214138, %v2103_v23 }
 0x760   : > { %v2120_v26 = vmul.f32 %v2117_v24, %v2064_v62  ;;  %v2109_v27 = vmul.f32 %v2106_v25, %v2079_v4 }
 0x762   : > { %v2135_v34 = vmul.f32 %v3032_v22, %v2120_v26  ;;  %v2112_v35 = vadd.f32 -0.28449672, %v2109_v27  ;;  %v2967_v22 = vld [vmem:[%s3992_s16] ss:$0 sm:$0xff] }
 0x764   : > { %v2138_v36 = vsub.f32 1.0, %v2135_v34  ;;  %v2115_v37 = vmul.f32 %v2112_v35, %v2079_v4 }
 0x766   : > { %v2118_v38 = vadd.f32 0.2548296, %v2115_v37  ;;  %v2144_v44 = vsub.f32 0.0, %v2138_v36 }
 0x768   : > { %v2121_v45 = vmul.f32 %v2118_v38, %v2079_v4  ;;  %v2147_v51 = vsel %vm2141_vm13, %v2144_v44, %v2138_v36 }
 0x769   : > { %v2150_v56 = vadd.f32 1.0, %v2147_v51 }
 0x76a   : > { %v2136_v50 = vmul.f32 %v3034_v47, %v2121_v45 }
 0x76b   : > { %v2032_v49 = vpop.f32.mrf.mxu2 }
 0x76c   : > { %v2033_v41 = vadd.f32 %v3860_v10, %v2032_v49  ;;  %v2139_v52 = vsub.f32 1.0, %v2136_v50  ;;  %v2153_v10 = vmul.f32 %v2150_v56, %v2036_v58 }
 0x76e   : > { %v2041_v53 = vmul.f32 0.70710677, %v2033_v41  ;;  %v2145_v55 = vsub.f32 0.0, %v2139_v52  ;;  %v2038_v24 = vmul.f32 0.5, %v2033_v41 }
 0x770   : > { %v2044_v39 = vand.u32 2147483647, %v2041_v53  ;;  %v2148_v57 = vsel %vm2142_vm14, %v2145_v55, %v2139_v52  ;;  %vm2143_vm4 = vcmp.lt.f32.partialorder %v2041_v53, 0.0 }
 0x771   : > { %v2151_v59 = vadd.f32 1.0, %v2148_v57 }
 0x772   : > { %v2047_v54 = vmul.f32 0.3275911, %v2044_v39  ;;  %v2125_v6 = vsub.f32 0.0, %v2044_v39 }
 0x773   : > { %v2034_v62 = vpop.f32.mrf.mxu2  ;;  %v2154_v63 = vmul.f32 %v2151_v59, %v2037_v61 }
 0x774   : > { %v2050_v43 = vadd.f32 1.0, %v2047_v54  ;;  %v2128_v9 = vmul.f32 %v2125_v6, %v2044_v39 }
 0x775   : > { %v2156_v32 = vpack.c.bf16 %v2154_v63, %v2153_v10  ;;  %v2830_v10 = vld [vmem:[#allocation15 + $0x18] sm:$0xff]  ;;  %v2829_v63 = vld [vmem:[#allocation15 + $0x10] sm:$0xff] }
 0x776   : > { %3035 = vrcp.f32 %v2050_v43  ;;  %v2092_v5 = vand.u32 2147483648, %v2050_v43  ;;  %v2090_v33 = vand.u32 2147483647, %v2050_v43  ;;  %vm2086_vm1 = vweird.f32 %v2050_v43  ;;  %2375 = vmatpush.bf16.msra.mxu0 %v2830_v10 }
 0x777   : > { %2234 = vmatmul.bf16.vlgmr.msrb.gmra.mxu3 %v2156_v32  ;;  %v2133_v13 = vmul.f32 1.442695, %v2128_v9  ;;  %v2828_v32 = vld [vmem:[#allocation15 + $0x8] sm:$0xff] }
 0x778   : > { %v2093_v31 = vor.u32 1.1754944e-38, %v2092_v5  ;;  %vm2091_vm3 = vcmp.eq.f32.partialorder %v2090_v33, 8.507059e+37  ;;  %v2827_v5 = vld [vmem:[#allocation15] sm:$0xff] }
 0x779   : > { %3037 = vpow2.f32 %v2133_v13 }
 0x77a   : > { %2376 = vmatpush.bf16.msra.mxu0 %v2829_v63 }
 0x77c   : > { %v3036_v1 = vpop.eup %3035 }
 0x77d   : > { %v2082_v2 = vmul.f32 %v3036_v1, %v2050_v43  ;;  %vm2087_vm15 = vweird.f32 %v3036_v1 }
 0x77e   : > { %vm2088_vm2 = vmor %vm2086_vm1, %vm2087_vm15  ;;  %2377 = vmatpush.bf16.msra.mxu0 %v2828_v32 }
 0x77f   : > { %v2083_v3 = vsub.f32 1.0, %v2082_v2  ;;  %v3038_v12 = vpop.eup %3037 }
 0x781   : > { %v2084_v48 = vmul.f32 %v3036_v1, %v2083_v3 }
 0x782   : > { %2378 = vmatpush.bf16.msra.mxu0 %v2827_v5 }
 0x783   : > { %v2085_v60 = vadd.f32 %v3036_v1, %v2084_v48 }
 0x785   : > { %v2089_v40 = vsel %vm2088_vm2, %v3036_v1, %v2085_v60 }
 0x786   : > { %v2094_v7 = vsel %vm2091_vm3, %v2093_v31, %v2089_v40 }
 0x787   : > { %v2098_v0 = vmul.f32 1.0614054, %v2094_v7 }
 0x789   : > { %v2101_v8 = vadd.f32 -1.4531521, %v2098_v0 }
 0x78b   : > { %v2104_v42 = vmul.f32 %v2101_v8, %v2094_v7 }
 0x78d   : > { %v2107_v11 = vadd.f32 1.4214138, %v2104_v42 }
 0x78f   : > { %v2110_v17 = vmul.f32 %v2107_v11, %v2094_v7 }
 0x791   : > { %v2113_v18 = vadd.f32 -0.28449672, %v2110_v17 }
 0x793   : > { %v2116_v4 = vmul.f32 %v2113_v18, %v2094_v7 }
 0x795   : > { %v2119_v16 = vadd.f32 0.2548296, %v2116_v4  ;;  %v2968_v4 = vld [vmem:[%s3993_s17] ss:$0 sm:$0xff] }
 0x797   : > { %v2122_v19 = vmul.f32 %v2119_v16, %v2094_v7 }
 0x799   : > { %v2137_v20 = vmul.f32 %v3038_v12, %v2122_v19 }
 0x79b   : > { %v2140_v21 = vsub.f32 1.0, %v2137_v20  ;;  %v2969_v20 = vld [vmem:[%s4045_s20] ss:$0 sm:$0xff]  ;;  %s3212_s20 = sshra.s32 %s2410_s22, 4  ;;  %s3213_s20 = int_to_ptr.hbm [resolvable:$true] %s3212_s20 }
 0x79c   : > { %s3214_s7 = scalar_lea.hbm %s3213_s20, 24  ;;  %p3219_p5 = scmp.lt.s32.totalorder %s3213_s20, %s4049_s1 }
 0x79d   : > { %v2146_v46 = vsub.f32 0.0, %v2140_v21  ;;  %p3215_p1 = scmp.ne.s32.totalorder %s3213_s20, %s3214_s7  ;;  %p3220_p6 = scmp.lt.s32.totalorder %s3218_s25, %s3214_s7 }
 0x79f   : > { %v2149_v23 = vsel %vm2143_vm4, %v2146_v46, %v2140_v21  ;;  %p3216_p2 = pnand %p3215_p1, %p3457_p4  ;;  %p3221_p7 = por %p3220_p6, %p3219_p5 }
 0x7a0   : > { %v2152_v25 = vadd.f32 1.0, %v2149_v23 }
 0x7a1   : > { %p3217_p3 = pneg %p3216_p2 }
 0x7a2   : > { %v2155_v26 = vmul.f32 %v2152_v25, %v2038_v24 }
 0x7a3   : > { %p3222_p9 = pnand %p3221_p7, %p3217_p3 }
 0x7a4   : > { %v2157_v29 = vpack.c.bf16 %v2155_v26, %v2155_v26 }
 0x7a6   : > { %2239 = vmatmul.bf16.gmra.mxu3 %v2157_v29 }
 0x7fa   : > { %v2235_v27 = vpop.f32.mrf.mxu3 }
 0x7fb   : > { %v2236_v34 = vadd.f32 %v2967_v22, %v2235_v27 }
 0x7fd   : > { %v2244_v35 = vadd.f32 %v2236_v34, %v3843_v14 }
 0x7ff   : > { %v2249_v36 = vsel %vm799_vm0, %v2244_v35, 0.0 }
 0x800   : > { %2250 = vadd.xlane.f32.xlu2 %v2249_v36 }
 0x802   : > { %v2237_v37 = vpop.f32.mrf.mxu3 }
 0x803   : > { %v2238_v38 = vadd.f32 %v2967_v22, %v2237_v37 }
 0x805   : > { %v2245_v44 = vadd.f32 %v2238_v38, %v3845_v15 }
 0x807   : > { %v2252_v45 = vsel %vm799_vm0, %v2245_v44, 0.0 }
 0x808   : > { %2253 = vadd.xlane.f32.xlu1 %v2252_v45 }
 0x829   : > { %v2240_v47 = vpop.f32.mrf.mxu3 }
 0x82a   : > { %v2241_v49 = vadd.f32 %v2967_v22, %v2240_v47 }
 0x82c   : > { %v2246_v50 = vadd.f32 %v2241_v49, %v3852_v28 }
 0x82e   : > { %v2255_v41 = vsel %vm799_vm0, %v2246_v50, 0.0 }
 0x82f   : > { %2256 = vadd.xlane.f32.xlu0 %v2255_v41 }
 0x831   : > { %v2242_v51 = vpop.f32.mrf.mxu3 }
 0x873   : > { %v2251_v52 = vpop.xlane.xlu2 %2250 }
 0x874   : > { %v2258_v14 = vmul.f32 %v2251_v52, %v3823_v30 }
 0x876   : > { %v2261_v53 = vsub.f32 %v2244_v35, %v2258_v14 }
 0x878   : > { %v2264_v55 = vmul.f32 %v2261_v53, %v2261_v53 }
 0x87a   : > { %v2267_v39 = vsel %vm799_vm0, %v2264_v55, 0.0 }
 0x87b   : > { %v2254_v56 = vpop.xlane.xlu1 %2253  ;;  %2268 = vadd.xlane.f32.xlu2 %v2267_v39 }
 0x87c   : > { %v2259_v15 = vmul.f32 %v2254_v56, %v3823_v30 }
 0x87e   : > { %v2262_v57 = vsub.f32 %v2245_v44, %v2259_v15 }
 0x880   : > { %v2265_v54 = vmul.f32 %v2262_v57, %v2262_v57 }
 0x882   : > { %v2270_v58 = vsel %vm799_vm0, %v2265_v54, 0.0 }
 0x883   : > { %2271 = vadd.xlane.f32.xlu1 %v2270_v58 }
 0x8a2   : > { %v2257_v28 = vpop.xlane.xlu0 %2256 }
 0x8a3   : > { %v2260_v61 = vmul.f32 %v2257_v28, %v3823_v30 }
 0x8a5   : > { %v3919_v59 = vsub.f32 %v2246_v50, %v2260_v61 }
 0x8a7   : > { %v2266_v62 = vmul.f32 %v3919_v59, %v3919_v59 }
 0x8a9   : > { %v2273_v43 = vsel %vm799_vm0, %v2266_v62, 0.0 }
 0x8aa   : > { %2274 = vadd.xlane.f32.xlu0 %v2273_v43 }
 0x8ee   : > { %v2269_v1 = vpop.xlane.xlu2 %2268 }
 0x8ef   : > { %v2276_v2 = vmul.f32 %v2269_v1, %v3823_v30 }
 0x8f1   : > { %v2279_v3 = vadd.f32 1e-05, %v2276_v2 }
 0x8f3   : > { %3039 = vrsqrt.f32 %v2279_v3  ;;  %vm2288_vm6 = vweird.f32 %v2279_v3 }
 0x8f6   : > { %v2272_v48 = vpop.xlane.xlu1 %2271 }
 0x8f7   : > { %v2277_v33 = vmul.f32 %v2272_v48, %v3823_v30 }
 0x8f9   : > { %v3040_v60 = vpop.eup %3039  ;;  %v2280_v31 = vadd.f32 1e-05, %v2277_v33 }
 0x8fa   : > { %v2283_v40 = vmul.f32 %v3040_v60, %v2279_v3  ;;  %vm2289_vm5 = vweird.f32 %v3040_v60 }
 0x8fb   : > { %3041 = vrsqrt.f32 %v2280_v31  ;;  %vm2290_vm7 = vmor %vm2288_vm6, %vm2289_vm5  ;;  %vm2298_vm9 = vweird.f32 %v2280_v31 }
 0x8fc   : > { %v2284_v6 = vmul.f32 %v3040_v60, %v2283_v40 }
 0x8fe   : > { %v2285_v7 = vmul.f32 0.5, %v2284_v6 }
 0x900   : > { %v2286_v0 = vsub.f32 1.5, %v2285_v7 }
 0x901   : > { %v3042_v8 = vpop.eup %3041 }
 0x902   : > { %v2287_v9 = vmul.f32 %v3040_v60, %v2286_v0  ;;  %v2293_v42 = vmul.f32 %v3042_v8, %v2280_v31  ;;  %vm2299_vm8 = vweird.f32 %v3042_v8 }
 0x903   : > { %vm2300_vm10 = vmor %vm2298_vm9, %vm2299_vm8 }
 0x904   : > { %v2294_v11 = vmul.f32 %v3042_v8, %v2293_v42  ;;  %v2291_v13 = vsel %vm2290_vm7, %v3040_v60, %v2287_v9 }
 0x905   : > { %v2312_v16 = vmul.f32 %v2291_v13, %v2261_v53 }
 0x906   : > { %v2295_v17 = vmul.f32 0.5, %v2294_v11 }
 0x907   : > { %v2318_v21 = vmul.f32 %v2968_v4, %v2312_v16 }
 0x908   : > { %v2296_v18 = vsub.f32 1.5, %v2295_v17 }
 0x909   : > { %v2324_v24 = vadd.f32 %v2969_v20, %v2318_v21 }
 0x90a   : > { %v2297_v19 = vmul.f32 %v3042_v8, %v2296_v18 }
 0x90c   : > { %v2301_v12 = vsel %vm2300_vm10, %v3042_v8, %v2297_v19 }
 0x90d   : > { %v2313_v46 = vmul.f32 %v2301_v12, %v2262_v57 }
 0x90f   : > { %v2319_v23 = vmul.f32 %v2968_v4, %v2313_v46 }
 0x911   : > { %v2325_v25 = vadd.f32 %v2969_v20, %v2319_v23 }
 0x913   : > { %v2327_v26 = vpack.c.bf16 %v2325_v25, %v2324_v24 }
 0x915   : > { %2777 = vmatmul.msk.bf16.vlgmr.msra.gmra.mxu0 %vm799_vm0, %v2327_v26 }
 0x91d   : > { %v2275_v29 = vpop.xlane.xlu0 %2274 }
 0x91e   : > { %v2278_v22 = vmul.f32 %v2275_v29, %v3823_v30  ;;  %v2970_v30 = vld [vmem:[%s4047_s24] ss:$0 sm:$0xff] }
 0x920   : > { %v2281_v27 = vadd.f32 1e-05, %v2278_v22 }
 0x922   : > { %3043 = vrsqrt.f32 %v2281_v27  ;;  %vm2308_vm12 = vweird.f32 %v2281_v27 }
 0x928   : > { %v3044_v34 = vpop.eup %3043 }
 0x929   : > { %v2303_v35 = vmul.f32 %v3044_v34, %v2281_v27  ;;  %vm2309_vm11 = vweird.f32 %v3044_v34 }
 0x92a   : > { %vm2310_vm13 = vmor %vm2308_vm12, %vm2309_vm11 }
 0x92b   : > { %v2304_v36 = vmul.f32 %v3044_v34, %v2303_v35 }
 0x92d   : > { %v2305_v37 = vmul.f32 0.5, %v2304_v36 }
 0x92f   : > { %v2306_v38 = vsub.f32 1.5, %v2305_v37 }
 0x931   : > { %v2307_v44 = vmul.f32 %v3044_v34, %v2306_v38 }
 0x933   : > { %v2311_v45 = vsel %vm2310_vm13, %v3044_v34, %v2307_v44 }
 0x934   : > { %v2314_v47 = vmul.f32 %v2311_v45, %v3919_v59 }
 0x936   : > { %v2320_v49 = vmul.f32 %v2968_v4, %v2314_v47 }
 0x938   : > { %v2326_v50 = vadd.f32 %v2969_v20, %v2320_v49 }
 0x93a   : > { %v2328_v41 = vpack.c.bf16 %v2326_v50, %v2326_v50 }
 0x93c   : > { %2778 = vmatmul.msk.bf16.gmra.mxu0 %vm799_vm0, %v2328_v41 }
 0x992   : > { %v2380_v51 = vpop.f32.mrf.mxu0 }
 0x993   : > { %v2381_v52 = vadd.f32 %v2970_v30, %v2380_v51 }
 0x995   : > { %2389 = vst [vmem:[%s746_s30] sm:$0xff] %v2381_v52 }
 0x99a   : > { %v2382_v14 = vpop.f32.mrf.mxu0 }
 0x99b   : > { %v2383_v53 = vadd.f32 %v2970_v30, %v2382_v14 }
 0x99d   : > { %2390 = vst [vmem:[%s746_s30 + $0x8] sm:$0xff] %v2383_v53 }
 0x9b9   : > { %v2385_v55 = vpop.f32.mrf.mxu0 }
 0x9ba   : > { %v2386_v39 = vadd.f32 %v2970_v30, %v2385_v55 }
 0x9bc   : > { %2391 = vst [vmem:[%s746_s30 + $0x10] sm:$0xff] %v2386_v39 }
 0x9bd   : > { %3225 = shalt.err (!%p3222_p9)
}
 0x9be   : > { %s3305_s13 = smov 128   ;;  %s3306_s30 = smov 8  }
 0x9bf   : > { %2858 = dma.vmem_to_hbm [thread:$0]  (%p3457_p4), %s2408_s29, 384, %s2410_s22, %s2393_s21, %s3305_s13, %s3305_s13, %s3306_s30  }
 0x9c1   : > { %v2387_v56 = vpop.f32.mrf.mxu0 }
 0x9c2 PF: > { %s4050_s2 = sld [smem:[#allocation25_spill]] }
 0x9c3   : > { %s4051_s26 = sld [smem:[#allocation21_spill]] }
 0x9c8   : > { %p2890_p10 = scmp.ge.s32.totalorder %s4050_s2, 2 }
 0x9c9   : > { %s2424_s4 = sand.u32 1, %s4051_s26  }
 0x9ca   : > { %p2877_p11 = pnand %p2890_p10, %p3464_p8  ;;  %s2425_s20 = scalar_lea.sflag [#allocation9], %s2424_s4 }
 0x9cc   : > { %p2878_p12 = pneg %p2877_p11 }
 0x9ce   : > { %3263 = dma.done.wait (%p2878_p12), %s2425_s20, 384  }
 0x9cf   : > { %3265 = vsyncadd (%p2878_p12), %s2425_s20, 4294966912  ;;  %s37_s28 = sadd.s32 1, %s4050_s2   ;;  %s4053_s2 = sld [smem:[#allocation22_spill]] }
 0x9d0   : > { %p34_p13 = scmp.ge.s32.totalorder %s37_s28, 4   ;;  %s4054_s25 = sld [smem:[#allocation23_spill]] }
 0x9d1   : > { %s4055_s26 = sld [smem:[#allocation29_spill]] }
 0x9d2   : > { %s4056_s27 = sld [smem:[#allocation24_spill]]  ;;  %36 = sbr.rel (!%p34_p13) target bundleno = 19 (0x13), region = 174 }
 0x9d3   : > { %s4057_s3 = sld [smem:[#allocation26_spill]] }
 0x9d7   :  { %2431 = vsyncpa [#allocation8], 1 }
 0x9d8   :  { %2433 = vsyncpa [#allocation8 + $0x1], 1 }
 0x9d9   :  { %2434 = vsyncpa [#allocation11], 1 }
 0x9da   :  { %2435 = vsyncpa [#allocation14], 1 }
 0x9db   :  { %2436 = vsyncpa [#allocation9], 1 }
 0x9dc   :  { %2438 = vsyncpa [#allocation9 + $0x1], 1 }

// kernel: tpu_custom_call.1
= control target key start
LH: loop header
LB: loop body
LE: loop exit
PB: predicated region body
PF: predicated region fallthrough
CT: control target
= control target key end

     0   :  { %s3976_s0 = inlined_call_operand.vmem [shape: f32[2,24,64], index: 0, kind: input, shape index: {}]   ;;  %s3977_s1 = inlined_call_operand.vmem [shape: bf16[64,64], index: 1, kind: input, shape index: {}]   ;;  %s3978_s2 = inlined_call_operand.vmem [shape: f32[1,64], index: 2, kind: input, shape index: {}]   ;;  %s3979_s3 = inlined_call_operand.vmem [shape: bf16[64,64], index: 3, kind: input, shape index: {}]   ;;  %s3980_s4 = inlined_call_operand.vmem [shape: f32[1,64], index: 4, kind: input, shape index: {}]   ;;  %s3981_s5 = inlined_call_operand.hbm [shape: bf16[64,64], index: 5, kind: input, shape index: {}]   ;;  %s3982_s6 = inlined_call_operand.vmem [shape: f32[64,1], index: 6, kind: input, shape index: {}]   ;;  %s3983_s7 = inlined_call_operand.hbm [shape: bf16[64,64], index: 7, kind: input, shape index: {}]   ;;  %s3984_s8 = inlined_call_operand.vmem [shape: f32[1,64], index: 8, kind: input, shape index: {}]   ;;  %s3985_s9 = inlined_call_operand.hbm [shape: bf16[64,64], index: 9, kind: input, shape index: {}]   ;;  %s3986_s10 = inlined_call_operand.vmem [shape: f32[1,64], index: 10, kind: input, shape index: {}]   ;;  %s3987_s11 = inlined_call_operand.vmem [shape: f32[1,64], index: 11, kind: input, shape index: {}]   ;;  %s3988_s12 = inlined_call_operand.vmem [shape: f32[1,64], index: 12, kind: input, shape index: {}]   ;;  %s3989_s13 = inlined_call_operand.hbm [shape: bf16[64,128], index: 13, kind: input, shape index: {}]   ;;  %s3990_s14 = inlined_call_operand.vmem [shape: f32[1,128], index: 14, kind: input, shape index: {}]   ;;  %s3991_s15 = inlined_call_operand.vmem [shape: bf16[128,64], index: 15, kind: input, shape index: {}]   ;;  %s3992_s16 = inlined_call_operand.vmem [shape: f32[1,64], index: 16, kind: input, shape index: {}]   ;;  %s3993_s17 = inlined_call_operand.vmem [shape: f32[1,64], index: 17, kind: input, shape index: {}]   ;;  %s3994_s18 = inlined_call_operand.vmem [shape: f32[1,64], index: 18, kind: input, shape index: {}]   ;;  %s3995_s19 = inlined_call_operand.hbm [shape: bf16[64,128], index: 19, kind: input, shape index: {}]   ;;  %s3996_s20 = inlined_call_operand.vmem [shape: f32[1,128], index: 20, kind: input, shape index: {}]   ;;  %s3997_s21 = inlined_call_operand.hbm [shape: f32[2,24,128], index: 21, kind: output, shape index: {}]  }
   0x1   :  { %4011 = sst [smem:[#allocation30_spill]] %s3976_s0 }
   0x2   :  { %4012 = sst [smem:[#allocation31_spill]] %s3977_s1 }
   0x3   :  { %4013 = sst [smem:[#allocation32_spill]] %s3978_s2 }
   0x4   :  { %4014 = sst [smem:[#allocation33_spill]] %s3979_s3 }
   0x5   :  { %4015 = sst [smem:[#allocation34_spill]] %s3980_s4 }
   0x6   :  { %4016 = sst [smem:[#allocation35_spill]] %s3981_s5 }
   0x7   :  { %4017 = sst [smem:[#allocation36_spill]] %s3983_s7 }
   0x8   :  { %4018 = sst [smem:[#allocation37_spill]] %s3989_s13 }
   0x9   :  { %4019 = sst [smem:[#allocation38_spill]] %s3994_s18 }
   0xa   :  { %4020 = sst [smem:[#allocation39_spill]] %s3996_s20 }
   0xb   :  { %4021 = sst [smem:[#allocation40_spill]] %s3997_s21 }
   0xc   :  { %26 = vsyncpa [#allocation8], 0 }
   0xd   :  { %27 = vsyncpa [#allocation11], 0 }
   0xe   :  { %28 = vsyncpa [#allocation14], 0 }
   0xf   :  { %29 = vsyncpa [#allocation9], 0 }
  0x10   :  { %31 = vsyncpa [#allocation9 + $0x1], 0  ;;  %s3417_s2 = smov 0   ;;  %s3419_s25 = smov 0  }
  0x11   :  { %s3421_s26 = smov 0   ;;  %s3423_s27 = smov 0  }
  0x12   :  { %s3425_s3 = smov 0   ;;  %s3427_s28 = smov 0  }
  0x13 LB: > { %4022 = sst [smem:[#allocation21_spill]] %s3268_s2  ;;  %s2535_s29 = sadd.s32 4294967295, %s3288_s28   ;;  %s3288_s28 = sphi %s3427_s28, %s37_s28   ;;  %s3284_s3 = sphi %s3425_s3, %s4057_s3   ;;  %s3280_s27 = sphi %s3423_s27, %s4056_s27   ;;  %s3276_s26 = sphi %s3421_s26, %s4055_s26   ;;  %s3272_s25 = sphi %s3419_s25, %s4054_s25   ;;  %s3268_s2 = sphi %s3417_s2, %s4053_s2  }
  0x14   : > { %4023 = sst [smem:[#allocation22_spill]] %s3272_s25  ;;  %s2536_s0 = sadd.s32 4294967294, %s3288_s28  }
  0x15   : > { %4024 = sst [smem:[#allocation23_spill]] %s3276_s26  ;;  %s49_s4 = sadd.s32 1, %s3284_s3 }
  0x16   : > { %4025 = sst [smem:[#allocation24_spill]] %s3284_s3  ;;  %s504_s30 = sadd.s32 1, %s3276_s26 }
  0x17   : > { %4026 = sst [smem:[#allocation25_spill]] %s3288_s28  ;;  %p51_p0 = scmp.ge.s32.totalorder %s49_s4, 2 }
  0x18   : > { %p514_p1 = scmp.ne.s32.totalorder %s3276_s26, %s3272_s25  ;;  %p515_p2 = scmp.eq.s32.totalorder %s2535_s29, 1 }
  0x19   : > { %p520_p3 = scmp.ne.s32.totalorder %s3272_s25, %s3268_s2  ;;  %s4059_s4 = smov (%p51_p0, %s49_s4), 0 }
  0x1a   : > { %4027 = sst [smem:[#allocation26_spill]] %s4059_s4  ;;  %p3457_p4 = por %p515_p2, %p514_p1 }
  0x1b   : > { %p521_p5 = scmp.eq.s32.totalorder %s2536_s0, 1  ;;  %s499_s22 = ssub.s32 %s3284_s3, %s4059_s4 }
  0x1c   : > { %s4028_s5 = scalar_select %p3457_p4, 1, 0 }
  0x1d   : > { %p2537_p6 = scmp.ge.s32.totalorder %s3288_s28, 1  ;;  %p502_p7 = scmp.eq.s32.totalorder %s499_s22, 0 }
  0x1e   : > { %4029 = sst [smem:[#allocation27_spill]] %s4028_s5  ;;  %p3464_p8 = por %p521_p5, %p520_p3 }
  0x1f   : > { %p528_p9 = scmp.lt.s32.totalorder %s3288_s28, 3  ;;  %p3476_p11 = scmp.eq.s32.totalorder %s2535_s29, 0 }
  0x20   : > { %s4030_s23 = scalar_select %p3464_p8, 1, 0 }
  0x21   : > { %s3470_s1 = scalar_select %p502_p7, %s3276_s26, %s504_s30  }
  0x22   : > { %4031 = sst [smem:[#allocation28_spill]] %s4030_s23  ;;  %p3472_p10 = pnand %p2537_p6, %p528_p9 }
  0x23   : > { %4032 = sst [smem:[#allocation29_spill]] %s3470_s1  ;;  %s3290_s3 = smov [#allocation10]  }
  0x24   : > { %p2860_p12 = pneg %p3472_p10  ;;  %s4035_s7 = sld [smem:[#allocation36_spill]] }
  0x25   : > { %s570_s29 = sshll.u32 %s3290_s3, 4  ;;  %s4037_s13 = sld [smem:[#allocation37_spill]]  ;;  %s571_s29 = int_to_ptr.vmem [resolvable:$true] %s570_s29 }
  0x26   : > { %p3487_p13 = pnand %p3476_p11, %p2860_p12  ;;  %s3291_s28 = smov 64  }
  0x27   : > { %s3292_s0 = smov 4   ;;  %s3293_s22 = smov [#allocation13]  }
  0x28   : > { %s4038_s20 = sld [smem:[#allocation35_spill]]  ;;  %s3294_s26 = smov [#allocation7]  }
  0x29   : > { %s553_s3 = sshll.u32 %s3294_s26, 4  ;;  %s585_s18 = sshll.u32 %s3985_s9, 4  ;;  %s554_s3 = int_to_ptr.vmem [resolvable:$true] %s553_s3  ;;  %s586_s18 = int_to_ptr.hbm [resolvable:$true] %s585_s18 }
  0x2a   : > { %s568_s4 = sshll.u32 %s4035_s7, 4  ;;  %s610_s7 = sshll.u32 %s3293_s22, 4  ;;  %s569_s4 = int_to_ptr.hbm [resolvable:$true] %s568_s4  ;;  %s611_s7 = int_to_ptr.vmem [resolvable:$true] %s610_s7 }
  0x2b   : > { %s608_s23 = sshll.u32 %s4037_s13, 4  ;;  %s637_s22 = sshll.u32 %s3995_s19, 4  ;;  %s609_s23 = int_to_ptr.hbm [resolvable:$true] %s608_s23  ;;  %s638_s22 = int_to_ptr.hbm [resolvable:$true] %s637_s22 }
  0x2c   : > { %2866 = dma.hbm_to_vmem [thread:$0]  (!%p3487_p13), %s569_s4, 512, %s571_s29, [#allocation11], %s3291_s28, %s3291_s28, %s3292_s0  }
  0x2d   : > { %2872 = dma.hbm_to_vmem [thread:$0]  (!%p3487_p13), %s609_s23, 512, %s611_s7, [#allocation14], %s3291_s28, %s3291_s28, %s3292_s0  }
  0x2e   : > { %s551_s25 = sshll.u32 %s4038_s20, 4  ;;  %s3295_s21 = smov [#allocation12]   ;;  %s552_s25 = int_to_ptr.hbm [resolvable:$true] %s551_s25 }
  0x2f   : > { %2863 = dma.hbm_to_vmem [thread:$0]  (!%p3487_p13), %s552_s25, 512, %s554_s3, [#allocation8], %s3291_s28, %s3291_s28, %s3292_s0  }
  0x30   : > { %s587_s20 = sshll.u32 %s3295_s21, 4  ;;  %s3296_s7 = smov [#allocation15]   ;;  %s588_s20 = int_to_ptr.vmem [resolvable:$true] %s587_s20 }
  0x31   : > { %2869 = dma.hbm_to_vmem [thread:$0]  (!%p3487_p13), %s586_s18, 512, %s588_s20, [#allocation11], %s3291_s28, %s3291_s28, %s3292_s0  }
  0x32   : > { %s639_s5 = sshll.u32 %s3296_s7, 4  ;;  %666 = sbr.rel (%p3472_p10) target bundleno = 2498 (0x9c2), region = 104  ;;  %s640_s5 = int_to_ptr.vmem [resolvable:$true] %s639_s5 }
  0x33   : > { %2875 = dma.hbm_to_vmem [thread:$0]  (!%p3487_p13), %s638_s22, 512, %s640_s5, [#allocation14], %s3291_s28, %s3291_s28, %s3292_s0  }
  0x37   : > { %3251 = dma.done.wait (%p3476_p11), [#allocation8], 512  }
  0x38   : > { %3253 = vsyncadd (%p3476_p11), [#allocation8], 4294966784 }
  0x39   : > { %3255 = dma.done.wait (%p3476_p11), [#allocation11], 1024  }
  0x3a   : > { %3257 = vsyncadd (%p3476_p11), [#allocation11], 4294966272 }
  0x3b   : > { %3259 = dma.done.wait (%p3476_p11), [#allocation14], 1024  }
  0x3c   : > { %3261 = vsyncadd (%p3476_p11), [#allocation14], 4294966272  ;;  %p747_p0 = scmp.lt.s32.totalorder %s3280_s27, 1  ;;  %s4039_s28 = sld [smem:[#allocation31_spill]]  ;;  %v2793_v2 = vld [vmem:[#allocation10 + $0x18] sm:$0xff]  ;;  %vm799_vm0 = vcmask 523264  }
  0x3d   : > { %1048 = vmatpush.bf16.msra.mxu2 %v2793_v2  ;;  %s4041_s4 = sld [smem:[#allocation30_spill]]  ;;  %v2792_v10 = vld [vmem:[#allocation10 + $0x10] sm:$0xff]  ;;  %v2791_v11 = vld [vmem:[#allocation10 + $0x8] sm:$0xff]  ;;  %v2790_v13 = vld [vmem:[#allocation10] sm:$0xff]  ;;  %v3297_v24 = vmov 0   ;;  %vm1065_vm1 = vcmask 125952  }
  0x3e   : > { %s748_s13 = scalar_select %p747_p0, %s3280_s27, 1  ;;  %v873_v22 = vld [vmem:[%s3982_s6 + $0x10] sm:$0xff]  ;;  %v871_v23 = vld [vmem:[%s3982_s6] sm:$0xff]  ;;  %2958 = vset.pattern.permute.xlu2 %v3297_v24  ;;  %2957 = vset.pattern.permute.xlu1 %v3297_v24  ;;  %v874_v29 = vld [vmem:[%s3982_s6 + $0x18] sm:$0xff]  ;;  %vm1596_vm2 = vcmask 1043456   ;;  %vm982_vm3 = vcmask 191488  }
  0x3f   : > { %s4042_s5 = sld [smem:[#allocation33_spill]]  ;;  %891 = vperm.xlu2 %2958, %v873_v22   ;;  %881 = vperm.xlu1 %2957, %v871_v23   ;;  %v876_v36 = vld [vmem:[%s3982_s6 + $0x28] sm:$0xff]  ;;  %v875_v38 = vld [vmem:[%s3982_s6 + $0x20] sm:$0xff]  ;;  %s3298_s3 = smov 96   ;;  %v877_v54 = vld [vmem:[%s3982_s6 + $0x30] sm:$0xff]  ;;  %vm1262_vm4 = vcmask 130048  }
  0x40   : > { %s2836_s0 = smul.u32 24, %s748_s13  ;;  %s4043_s26 = sld [smem:[#allocation32_spill]]  ;;  %v872_v37 = vld [vmem:[%s3982_s6 + $0x8] sm:$0xff]  ;;  %v2961_v39 = vld [vmem:[%s3984_s8] ss:$0 sm:$0xff]  ;;  %vm1416_vm6 = vcmask 195584  }
  0x41   : > { %1049 = vmatpush.bf16.msra.mxu2 %v2792_v10  ;;  %s3300_s22 = smov 80   ;;  %v2787_v22 = vld [vmem:[#allocation7 + $0x8] sm:$0xff]  ;;  %s3301_s7 = smov 16   ;;  %vm1771_vm7 = vcmask 257152   ;;  %vm1790_vm8 = vcmask 388352   ;;  %vm1809_vm9 = vcmask 519552  }
  0x42   : > { %s4040_s23 = smov %s4039_s28  ;;  %v2785_v0 = vld [vmem:[%s4039_s28 + $0x18] sm:$0xff]  ;;  %s3302_s13 = smov 32  }
  0x43   : > { %810 = vmatpush.bf16.msra.mxu0 %v2785_v0  ;;  %v2784_v1 = vld [vmem:[%s4040_s23 + $0x10] sm:$0xff]  ;;  %2831 = vmatpush.bf16.msra.mxu1 %v2785_v0  ;;  %v2783_v3 = vld [vmem:[%s4040_s23 + $0x8] sm:$0xff]  ;;  %s751_s29 = scalar_lea.vmem %s4041_s4, %s2836_s0  ;;  %v2782_v4 = vld [vmem:[%s4040_s23] sm:$0xff]  ;;  %s3303_s18 = smov 48  }
  0x44   : > { %v758_v5 = vld [vmem:[%s751_s29] sm:$0xff]  ;;  %v759_v6 = vld [vmem:[%s751_s29 + $0x8] sm:$0xff]  ;;  %v760_v7 = vld [vmem:[%s751_s29 + $0x10] sm:$0xff]  ;;  %s3299_s29 = smov 112   ;;  %s4045_s20 = sld [smem:[#allocation38_spill]] }
  0x45   : > { %v761_v8 = vpack.c.bf16 %v759_v6, %v758_v5  ;;  %v762_v9 = vpack.c.bf16 %v760_v7, %v760_v7  ;;  %v2797_v12 = vld [vmem:[%s4042_s5 + $0x18] sm:$0xff]  ;;  %1050 = vmatpush.bf16.msra.mxu2 %v2791_v11  ;;  %v2796_v14 = vld [vmem:[%s4042_s5 + $0x10] sm:$0xff]  ;;  %v2795_v15 = vld [vmem:[%s4042_s5 + $0x8] sm:$0xff]  ;;  %s4047_s24 = sld [smem:[#allocation39_spill]]  ;;  %s2837_s2 = smul.u32 24, %s3280_s27 }
  0x46   : > { %1165 = vmatpush.bf16.msra.mxu3 %v2797_v12  ;;  %v2794_v16 = vld [vmem:[%s4042_s5] sm:$0xff]  ;;  %v878_v0 = vld [vmem:[%s3982_s6 + $0x38] sm:$0xff]  ;;  %s4049_s1 = sld [smem:[#allocation40_spill]] }
  0x47   : > { %811 = vmatpush.bf16.msra.mxu0 %v2784_v1  ;;  %2832 = vmatpush.bf16.msra.mxu1 %v2784_v1  ;;  %v2960_v17 = vld [vmem:[%s4043_s26] ss:$0 sm:$0xff]  ;;  %s4044_s26 = sld [smem:[#allocation34_spill]] }
  0x48   : > { %896 = vperm.xlu2 %2958, %v874_v29   ;;  %886 = vperm.xlu1 %2957, %v872_v37  }
  0x49   : > { %1051 = vmatpush.bf16.msra.mxu2 %v2790_v13 }
  0x4a   : > { %1166 = vmatpush.bf16.msra.mxu3 %v2796_v14 }
  0x4b   : > { %812 = vmatpush.bf16.msra.mxu0 %v2783_v3  ;;  %2833 = vmatpush.bf16.msra.mxu1 %v2783_v3 }
  0x4c   : > { %s2406_s4 = scalar_lea.hbm %s4049_s1, %s2837_s2  ;;  %s3218_s25 = scalar_lea.hbm %s4049_s1, 48 }
  0x4d   : > { %v2962_v43 = vld [vmem:[%s4044_s26] ss:$0 sm:$0xff] }
  0x4e   : > { %1167 = vmatpush.bf16.msra.mxu3 %v2795_v15 }
  0x4f   : > { %813 = vmatpush.bf16.msra.mxu0 %v2782_v4  ;;  %2834 = vmatpush.bf16.msra.mxu1 %v2782_v4 }
  0x50   : > { %906 = vperm.xlu2 %2958, %v876_v36   ;;  %901 = vperm.xlu1 %2957, %v875_v38  }
  0x52   : > { %2567 = vmatmul.msk.bf16.vlgmr.msra.gmra.mxu0 %vm799_vm0, %v761_v8  ;;  %2568 = vmatmul.msk.bf16.vlgmr.msra.gmra.mxu1 %vm799_vm0, %v762_v9 }
  0x53   : > { %1168 = vmatpush.bf16.msra.mxu3 %v2794_v16 }
  0x99   : > { %v3626_v6 = vpop.permute.xlu2 %891 }
  0xa2   : > { %v3628_v9 = vpop.permute.xlu2 %896 }
  0xaa   : > { %v3630_v16 = vpop.permute.xlu2 %906 }
  0xcf   : > { %v815_v18 = vpop.f32.mrf.mxu0  ;;  %v820_v19 = vpop.f32.mrf.mxu1 }
  0xd0   : > { %v816_v20 = vadd.f32 %v2960_v17, %v815_v18  ;;  %v821_v21 = vadd.f32 %v2960_v17, %v820_v19 }
  0xd2   : > { %824 = vst.msk [vmem:[#allocation2] sm:$0xff] %vm799_vm0, %v816_v20  ;;  %827 = vxpose.xlu0.b32.start [1/3] (short) (narrow) %v816_v20, 64  ;;  %v1001_v33 = vpack.c.bf16 %v821_v21, %v821_v21 }
  0xd3   : > { %826 = vst.msk [vmem:[#allocation2 + $0x10] sm:$0xff] %vm799_vm0, %v821_v21 }
  0xd7   : > { %v817_v25 = vpop.f32.mrf.mxu0  ;;  %v822_v26 = vpop.f32.mrf.mxu1 }
  0xd8   : > { %v818_v27 = vadd.f32 %v2960_v17, %v817_v25  ;;  %v2786_v17 = vld [vmem:[#allocation7] sm:$0xff] }
  0xd9   : > { %v1113_v30 = vld [vmem:[#allocation2] sm:$0xff] }
  0xda   : > { %825 = vst.msk [vmem:[#allocation2 + $0x8] sm:$0xff] %vm799_vm0, %v818_v27  ;;  %828 = vxpose.xlu0.b32.cont [2/3] (short) (narrow) %v818_v27, 64  ;;  %v1000_v28 = vpack.c.bf16 %v818_v27, %v816_v20  ;;  %v1115_v34 = vld [vmem:[#allocation2 + $0x10] sm:$0xff] }
  0xdb   : > { %v1117_v35 = vpack.c.bf16 %v1115_v34, %v1115_v34  ;;  %v2788_v27 = vld [vmem:[#allocation7 + $0x10] sm:$0xff] }
  0xdc   : > { %2605 = vmatmul.msk.bf16.vlgmr.msra.gmra.mxu2 %vm799_vm0, %v1000_v28 }
  0xe1   : > { %v1114_v31 = vld [vmem:[#allocation2 + $0x8] sm:$0xff] }
  0xe2   : > { %829 = vxpose.xlu0.b32.end [3/3] (short) (narrow) %v821_v21, 64  ;;  %v1116_v32 = vpack.c.bf16 %v1114_v31, %v1113_v30  ;;  %v882_v21 = vpop.permute.xlu1 %881 }
  0xe4   : > { %2623 = vmatmul.msk.bf16.vlgmr.msra.gmra.mxu3 %vm799_vm0, %v1116_v32  ;;  %v2789_v32 = vld [vmem:[#allocation7 + $0x18] sm:$0xff] }
  0xec   : > { %2606 = vmatmul.msk.bf16.gmra.mxu2 %vm799_vm0, %v1001_v33 }
  0xf4   : > { %2624 = vmatmul.msk.bf16.gmra.mxu3 %vm799_vm0, %v1117_v35 }
 0x149   : > { %2959 = vset.pattern.permute.xlu0 %v3297_v24  ;;  %v887_v24 = vpop.permute.xlu1 %886 }
 0x151   : > { %v902_v26 = vpop.permute.xlu1 %901 }
 0x15f   : > { %v1053_v40 = vpop.f32.mrf.mxu2 }
 0x160   : > { %v1054_v41 = vadd.f32 %v2961_v39, %v1053_v40 }
 0x162   : > { %v3589_v42 = vpack.c.bf16 %v1054_v41, %v1054_v41 }
 0x164   : > { %1066 = vst.msk [vmem:[#allocation4] sm:$0xf] %vm1065_vm1, %v3589_v42 }
 0x167   : > { %v1055_v44 = vpop.f32.mrf.mxu2  ;;  %v1170_v45 = vpop.f32.mrf.mxu3 }
 0x168   : > { %v1056_v46 = vadd.f32 %v2961_v39, %v1055_v44  ;;  %v1171_v47 = vadd.f32 %v2962_v43, %v1170_v45 }
 0x16a   : > { %v3596_v48 = vpack.c.bf16 %v1056_v46, %v1056_v46  ;;  %v1179_v49 = vpack.c.bf16 %v1171_v47, %v1171_v47 }
 0x16c   : > { %1067 = vst.msk [vmem:[#allocation4 + $0x4] sm:$0xf] %vm1065_vm1, %v3596_v48  ;;  %1202 = vrot.lane.b32.xlu2 %v1179_v49, %s3298_s3 }
 0x16d   : > { %1183 = vst.msk [vmem:[#allocation5] sm:$0xf] %vm1065_vm1, %v1179_v49 }
 0x16f   : > { %v1058_v50 = vpop.f32.mrf.mxu2  ;;  %v1172_v51 = vpop.f32.mrf.mxu3 }
 0x170   : > { %v1059_v52 = vadd.f32 %v2961_v39, %v1058_v50  ;;  %v1173_v53 = vadd.f32 %v2962_v43, %v1172_v51 }
 0x172   : > { %v1064_v55 = vpack.c.bf16 %v1059_v52, %v1059_v52  ;;  %v1180_v56 = vpack.c.bf16 %v1173_v53, %v1173_v53 }
 0x173   : > { %v2806_v19 = vld [vmem:[#allocation4] sm:$0xff] }
 0x174   : > { %1068 = vst.msk [vmem:[#allocation4 + $0x8] sm:$0xf] %vm1065_vm1, %v1064_v55  ;;  %1191 = vrot.lane.b32.xlu1 %v1180_v56, %s3299_s29  ;;  %911 = vperm.xlu2 %2958, %v877_v54  }
 0x175   : > { %1184 = vst.msk [vmem:[#allocation5 + $0x4] sm:$0xf] %vm1065_vm1, %v1180_v56 }
 0x176   : > { %v843_v57 = vpop.trf.xlu0 }
 0x177   : > { %v1060_v58 = vpop.f32.mrf.mxu2  ;;  %v1175_v59 = vpop.f32.mrf.mxu3 }
 0x178   : > { %v1176_v60 = vadd.f32 %v2962_v43, %v1175_v59  ;;  %1189 = vrot.lane.b32.xlu0 %v1179_v49, %s3299_s29 }
 0x17a   : > { %v1181_v61 = vpack.c.bf16 %v1176_v60, %v1176_v60 }
 0x17b   : > { %v1563_v10 = vld [vmem:[#allocation4 + $0x8] sm:$0xf] }
 0x17c   : > { %1185 = vst.msk [vmem:[#allocation5 + $0x8] sm:$0xf] %vm1065_vm1, %v1181_v61  ;;  %1204 = vrot.lane.b32.xlu1 %v1180_v56, %s3298_s3  ;;  %1215 = vrot.lane.b32.xlu2 %v1179_v49, %s3300_s22  ;;  %v1586_v12 = vunpack.c.l.b16 %v1563_v10  ;;  %v2798_v54 = vld [vmem:[#allocation5] sm:$0xff] }
 0x17e   : > { %v844_v62 = vpop.trf.xlu0  ;;  %v1588_v14 = vpack.c.b16 %v1586_v12, %v1586_v12 }
 0x17f   : > { %v1177_v63 = vpop.f32.mrf.mxu3  ;;  %v859_v15 = vpack.c.bf16 %v844_v62, %v843_v57 }
 0x180   : > { %1085 = vrot.lane.b32.xlu0 %v3589_v42, %s3298_s3  ;;  %v1598_v18 = vsel %vm1596_vm2, %v1588_v14, 0 }
 0x184   : > { %916 = vperm.xlu1 %2957, %v878_v0   ;;  %1193 = vrot.lane.b32.xlu2 %v1181_v61, %s3299_s29 }
 0x186   : > { %v845_v1 = vpop.trf.xlu0 }
 0x188   : > { %1102 = vrot.lane.b32.xlu0 %v1064_v55, %s3300_s22 }
 0x18c   : > { %1217 = vrot.lane.b32.xlu1 %v1180_v56, %s3300_s22  ;;  %1219 = vrot.lane.b32.xlu2 %v1181_v61, %s3300_s22 }
 0x18e   : > { %v846_v2 = vpop.trf.xlu0 }
 0x18f   : > { %v860_v13 = vpack.c.bf16 %v846_v2, %v845_v1 }
 0x194   : > { %1206 = vrot.lane.b32.xlu1 %v1181_v61, %s3298_s3  ;;  %1076 = vrot.lane.b32.xlu2 %v1064_v55, %s3299_s29  ;;  %v1230_v61 = vld [vmem:[#allocation5 + $0x8] sm:$0xf] }
 0x195   : > { %v1253_v1 = vunpack.c.l.b16 %v1230_v61 }
 0x196   : > { %v847_v3 = vpop.trf.xlu0 }
 0x19c   : > { %1089 = vrot.lane.b32.xlu1 %v1064_v55, %s3298_s3  ;;  %1072 = vrot.lane.b32.xlu2 %v3589_v42, %s3299_s29 }
 0x19e   : > { %v848_v4 = vpop.trf.xlu0 }
 0x19f   : > { %v861_v11 = vpack.c.bf16 %v848_v4, %v847_v3  ;;  %v1255_v4 = vpack.c.b16 %v1253_v1, %v1253_v1 }
 0x1a6   : > { %v849_v5 = vpop.trf.xlu0 }
 0x1ae   : > { %v850_v7 = vpop.trf.xlu0 }
 0x1af   : > { %v862_v8 = vpack.c.bf16 %v850_v7, %v849_v5 }
 0x1b1   : > { %955 = vmatpush.bf16.msrb.mxu1 %v862_v8 }
 0x1b5   : > { %956 = vmatpush.bf16.msrb.mxu1 %v861_v11 }
 0x1b9   : > { %957 = vmatpush.bf16.msrb.mxu1 %v860_v13 }
 0x1bd   : > { %958 = vmatpush.bf16.msrb.mxu1 %v859_v15 }
 0x1c0   : > { %2585 = vmatmul.msk.bf16.vlgmr.msrb.gmra.mxu1 %vm799_vm0, %v2786_v17 }
 0x1c1   : > { %1606 = vmatpush.bf16.msra.mxu1 %v1598_v18 }
 0x1c5   : > { %1607 = vmatpush.bf16.msra.mxu1 %v2806_v19 }
 0x1c6   : > { %v1203_v20 = vpop.permute.xlu2 %1202 }
 0x1c7   : > { %1212 = vst.msk [vmem:[#allocation5 + $0x18] sm:$0xf] %vm1065_vm1, %v1203_v20 }
 0x1ce   : > { %v3635_v23 = vpop.permute.xlu2 %911 }
 0x1d0   : > { %2586 = vmatmul.msk.bf16.gmra.mxu1 %vm799_vm0, %v2787_v22 }
 0x1d6   : > { %v1216_v25 = vpop.permute.xlu2 %1215 }
 0x1d7   : > { %1225 = vst.msk [vmem:[#allocation5 + $0x24] sm:$0xf] %vm1065_vm1, %v1216_v25 }
 0x1de   : > { %v1194_v28 = vpop.permute.xlu2 %1193 }
 0x1df   : > { %1201 = vst.msk [vmem:[#allocation5 + $0x14] sm:$0xf] %vm1065_vm1, %v1194_v28 }
 0x1e0   : > { %2587 = vmatmul.msk.bf16.gmra.mxu1 %vm799_vm0, %v2788_v27 }
 0x1e6   : > { %v1192_v29 = vpop.permute.xlu1 %1191  ;;  %v1220_v30 = vpop.permute.xlu2 %1219  ;;  %v1233_v12 = vld [vmem:[#allocation5 + $0x14] sm:$0xf] }
 0x1e7   : > { %1200 = vst.msk [vmem:[#allocation5 + $0x10] sm:$0xf] %vm1065_vm1, %v1192_v29  ;;  %v1292_v17 = vunpack.c.l.b16 %v1233_v12 }
 0x1e8   : > { %1227 = vst.msk [vmem:[#allocation5 + $0x2c] sm:$0xf] %vm1065_vm1, %v1220_v30 }
 0x1e9   : > { %v1294_v19 = vpack.c.b16 %v1292_v17, %v1292_v17 }
 0x1ea   : > { %v1190_v31 = vpop.permute.xlu0 %1189 }
 0x1eb   : > { %1199 = vst.msk [vmem:[#allocation5 + $0xc] sm:$0xf] %vm1065_vm1, %v1190_v31 }
 0x1ee   : > { %v1205_v33 = vpop.permute.xlu1 %1204  ;;  %v1077_v34 = vpop.permute.xlu2 %1076 }
 0x1ef   : > { %1213 = vst.msk [vmem:[#allocation5 + $0x1c] sm:$0xf] %vm1065_vm1, %v1205_v33  ;;  %v1239_v33 = vld [vmem:[#allocation5 + $0x2c] sm:$0xf] }
 0x1f0   : > { %1084 = vst.msk [vmem:[#allocation4 + $0x14] sm:$0xf] %vm1065_vm1, %v1077_v34  ;;  %2588 = vmatmul.msk.bf16.gmra.mxu1 %vm799_vm0, %v2789_v32  ;;  %v1368_v34 = vunpack.c.l.b16 %v1239_v33 }
 0x1f2   : > { %v1086_v35 = vpop.permute.xlu0 %1085  ;;  %v2799_v5 = vld [vmem:[#allocation5 + $0xc] sm:$0xff] }
 0x1f3   : > { %1095 = vst.msk [vmem:[#allocation4 + $0x18] sm:$0xf] %vm1065_vm1, %v1086_v35  ;;  %v1370_v35 = vpack.c.b16 %v1368_v34, %v1368_v34 }
 0x1f6   : > { %v3648_v36 = vpop.permute.xlu1 %916  ;;  %v1073_v37 = vpop.permute.xlu2 %1072  ;;  %v2800_v20 = vld [vmem:[#allocation5 + $0x18] sm:$0xff] }
 0x1f7   : > { %1082 = vst.msk [vmem:[#allocation4 + $0xc] sm:$0xf] %vm1065_vm1, %v1073_v37  ;;  %v1566_v58 = vld [vmem:[#allocation4 + $0x14] sm:$0xf] }
 0x1f8   : > { %v1631_v59 = vunpack.c.l.b16 %v1566_v58 }
 0x1fa   : > { %v1103_v38 = vpop.permute.xlu0 %1102  ;;  %v1633_v63 = vpack.c.b16 %v1631_v59, %v1631_v59 }
 0x1fb   : > { %1110 = vst.msk [vmem:[#allocation4 + $0x2c] sm:$0xf] %vm1065_vm1, %v1103_v38 }
 0x1fc   : > { %v1642_v3 = vsel %vm1596_vm2, %v1633_v63, 0 }
 0x1fe   : > { %v1218_v39 = vpop.permute.xlu1 %1217 }
 0x1ff   : > { %1226 = vst.msk [vmem:[#allocation5 + $0x28] sm:$0xf] %vm1065_vm1, %v1218_v39 }
 0x206   : > { %v1207_v40 = vpop.permute.xlu1 %1206  ;;  %v2801_v32 = vld [vmem:[#allocation5 + $0x24] sm:$0xff] }
 0x207   : > { %1214 = vst.msk [vmem:[#allocation5 + $0x20] sm:$0xf] %vm1065_vm1, %v1207_v40 }
 0x20e   : > { %v1090_v41 = vpop.permute.xlu1 %1089 }
 0x20f   : > { %1097 = vst.msk [vmem:[#allocation4 + $0x20] sm:$0xf] %vm1065_vm1, %v1090_v41 }
 0x23d   : > { %v960_v43 = vpop.f32.mrf.mxu1 }
 0x23e   : > { %v961_v44 = vadd.f32 %v960_v43, %v882_v21 }
 0x240   : > { %v980_v45 = vpack.c.bf16 %v961_v44, %v961_v44 }
 0x242   : > { %983 = vst.msk [vmem:[#allocation3] sm:$0xf] %vm982_vm3, %v980_v45 }
 0x245   : > { %v962_v46 = vpop.f32.mrf.mxu1 }
 0x246   : > { %v963_v47 = vadd.f32 %v962_v46, %v887_v24  ;;  %v1572_v24 = vld [vmem:[#allocation4 + $0x2c] sm:$0xf] }
 0x247   : > { %v1719_v25 = vunpack.c.l.b16 %v1572_v24 }
 0x248   : > { %v981_v49 = vpack.c.bf16 %v963_v47, %v963_v47 }
 0x249   : > { %v1721_v27 = vpack.c.b16 %v1719_v25, %v1719_v25 }
 0x24a   : > { %984 = vst.msk [vmem:[#allocation3 + $0x4] sm:$0xf] %vm982_vm3, %v981_v49 }
 0x24b   : > { %v1730_v30 = vsel %vm1596_vm2, %v1721_v27, 0 }
 0x24d   : > { %v965_v50 = vpop.f32.mrf.mxu1 }
 0x24e   : > { %v966_v51 = vadd.f32 %v965_v50, %v3626_v6 }
 0x250   : > { %v985_v52 = vpack.c.bf16 %v966_v51, %v966_v51 }
 0x251   : > { %v2802_v53 = vld [vmem:[#allocation3] sm:$0xff] }
 0x252   : > { %988 = vst.msk [vmem:[#allocation3 + $0x8] sm:$0xf] %vm982_vm3, %v985_v52  ;;  %1276 = vmatpush.bf16.msrb.mxu0 %v2802_v53 }
 0x255   : > { %v967_v55 = vpop.f32.mrf.mxu1  ;;  %2633 = vmatmul.msk.bf16.vlgmr.msrb.gmra.mxu0 %vm1262_vm4, %v2798_v54 }
 0x256   : > { %v968_v56 = vadd.f32 %v967_v55, %v3628_v9  ;;  %v1569_v9 = vld [vmem:[#allocation4 + $0x20] sm:$0xf] }
 0x257   : > { %v1675_v10 = vunpack.c.l.b16 %v1569_v9 }
 0x258   : > { %v986_v57 = vpack.c.bf16 %v968_v56, %v968_v56 }
 0x259   : > { %v1677_v14 = vpack.c.b16 %v1675_v10, %v1675_v10 }
 0x25a   : > { %989 = vst.msk [vmem:[#allocation3 + $0xc] sm:$0xf] %vm982_vm3, %v986_v57 }
 0x25d   : > { %v970_v60 = vpop.f32.mrf.mxu1 }
 0x25e   : > { %v971_v62 = vadd.f32 %v970_v60, %v902_v26  ;;  %v1236_v26 = vld [vmem:[#allocation5 + $0x20] sm:$0xf] }
 0x25f   : > { %v1330_v28 = vunpack.c.l.b16 %v1236_v26 }
 0x260   : > { %v990_v0 = vpack.c.bf16 %v971_v62, %v971_v62 }
 0x261   : > { %v2803_v2 = vld [vmem:[#allocation3 + $0x8] sm:$0xff]  ;;  %v1332_v31 = vpack.c.b16 %v1330_v28, %v1330_v28 }
 0x262   : > { %993 = vst.msk [vmem:[#allocation3 + $0x10] sm:$0xf] %vm982_vm3, %v990_v0  ;;  %1314 = vmatpush.bf16.msrb.mxu2 %v2803_v2 }
 0x265   : > { %v972_v6 = vpop.f32.mrf.mxu1  ;;  %2634 = vmatmul.msk.bf16.gmra.mxu0 %vm1262_vm4, %v1255_v4  ;;  %2643 = vmatmul.msk.bf16.vlgmr.msrb.gmra.mxu2 %vm1262_vm4, %v2799_v5 }
 0x266   : > { %1650 = vmatpush.bf16.msra.mxu2 %v1642_v3  ;;  %v973_v7 = vadd.f32 %v972_v6, %v3630_v16  ;;  %v1686_v16 = vsel %vm1596_vm2, %v1677_v14, 0 }
 0x268   : > { %v991_v8 = vpack.c.bf16 %v973_v7, %v973_v7 }
 0x26a   : > { %994 = vst.msk [vmem:[#allocation3 + $0x14] sm:$0xf] %vm982_vm3, %v991_v8 }
 0x26d   : > { %v975_v11 = vpop.f32.mrf.mxu1 }
 0x26e   : > { %v976_v13 = vadd.f32 %v975_v11, %v3635_v23 }
 0x270   : > { %v995_v15 = vpack.c.bf16 %v976_v13, %v976_v13 }
 0x271   : > { %v2804_v18 = vld [vmem:[#allocation3 + $0x10] sm:$0xff] }
 0x272   : > { %998 = vst.msk [vmem:[#allocation3 + $0x18] sm:$0xf] %vm982_vm3, %v995_v15  ;;  %1352 = vmatpush.bf16.msrb.mxu3 %v2804_v18 }
 0x275   : > { %v977_v21 = vpop.f32.mrf.mxu1  ;;  %2644 = vmatmul.msk.bf16.gmra.mxu2 %vm1262_vm4, %v1294_v19  ;;  %2653 = vmatmul.msk.bf16.vlgmr.msrb.gmra.mxu3 %vm1262_vm4, %v2800_v20 }
 0x276   : > { %1694 = vmatpush.bf16.msra.mxu3 %v1686_v16  ;;  %v978_v22 = vadd.f32 %v977_v21, %v3648_v36  ;;  %v1401_v36 = vlaneseq }
 0x278   : > { %v996_v23 = vpack.c.bf16 %v978_v22, %v978_v22  ;;  %v1402_v37 = vand.u32 127, %v1401_v36 }
 0x27a   : > { %999 = vst.msk [vmem:[#allocation3 + $0x1c] sm:$0xf] %vm982_vm3, %v996_v23  ;;  %vm1403_vm5 = vcmp.lt.s32.totalorder %v1402_v37, 20 }
 0x281   : > { %v2805_v29 = vld [vmem:[#allocation3 + $0x18] sm:$0xff] }
 0x282   : > { %1390 = vmatpush.bf16.msra.mxu0 %v2805_v29 }
 0x285   : > { %2654 = vmatmul.msk.bf16.gmra.mxu3 %vm1262_vm4, %v1332_v31  ;;  %2663 = vmatmul.msk.bf16.vlgmr.msra.gmra.mxu0 %vm1262_vm4, %v2801_v32 }
 0x286   : > { %1738 = vmatpush.bf16.msrb.mxu0 %v1730_v30 }
 0x295   : > { %2664 = vmatmul.msk.bf16.gmra.mxu0 %vm1262_vm4, %v1370_v35 }
 0x2d2   : > { %v1278_v38 = vpop.f32.mrf.mxu0 }
 0x2d3   : > { %v3680_v39 = vsel %vm1403_vm5, %v1278_v38, -1e+30 }
 0x2d4   : > { %v1417_v40 = vsel %vm1416_vm6, %v3680_v39, -inf }
 0x2d5   : > { %1418 = vmax.xlane.f32.xlu2 %v1417_v40 }
 0x2da   : > { %v1280_v41 = vpop.f32.mrf.mxu0 }
 0x2db   : > { %v3685_v43 = vsel %vm1403_vm5, %v1280_v41, -1e+30 }
 0x2dc   : > { %v1420_v44 = vsel %vm1416_vm6, %v3685_v43, -inf }
 0x2dd   : > { %1421 = vmax.xlane.f32.xlu1 %v1420_v44 }
 0x2e2   : > { %v1283_v45 = vpop.f32.mrf.mxu0 }
 0x2e3   : > { %v3690_v46 = vsel %vm1403_vm5, %v1283_v45, -1e+30 }
 0x2e8   : > { %v1316_v47 = vpop.f32.mrf.mxu2 }
 0x2e9   : > { %v1407_v49 = vsel %vm1403_vm5, %v1316_v47, -1e+30 }
 0x2ea   : > { %v1285_v50 = vpop.f32.mrf.mxu0  ;;  %v1426_v51 = vsel %vm1416_vm6, %v1407_v49, -inf }
 0x2eb   : > { %1427 = vmax.xlane.f32.xlu1 %v1426_v51 }
 0x2f0   : > { %v1318_v52 = vpop.f32.mrf.mxu2 }
 0x2f1   : > { %v1408_v53 = vsel %vm1403_vm5, %v1318_v52, -1e+30 }
 0x2f2   : > { %v1429_v54 = vsel %vm1416_vm6, %v1408_v53, -inf }
 0x2f3   : > { %1430 = vmax.xlane.f32.xlu2 %v1429_v54 }
 0x2f8   : > { %v1321_v55 = vpop.f32.mrf.mxu2  ;;  %v1354_v56 = vpop.f32.mrf.mxu3 }
 0x2f9   : > { %v1410_v57 = vsel %vm1403_vm5, %v1354_v56, -1e+30  ;;  %v3699_v59 = vsel %vm1403_vm5, %v1321_v55, -1e+30 }
 0x2fa   : > { %v1435_v58 = vsel %vm1416_vm6, %v1410_v57, -inf  ;;  %v1432_v0 = vsel %vm1416_vm6, %v3699_v59, -inf }
 0x2fb   : > { %1436 = vmax.xlane.f32.xlu2 %v1435_v58 }
 0x300   : > { %v1323_v60 = vpop.f32.mrf.mxu2  ;;  %v1356_v61 = vpop.f32.mrf.mxu3 }
 0x301   : > { %v1411_v62 = vsel %vm1403_vm5, %v1356_v61, -1e+30 }
 0x302   : > { %v1392_v63 = vpop.f32.mrf.mxu0  ;;  %v1438_v1 = vsel %vm1416_vm6, %v1411_v62, -inf }
 0x303   : > { %1433 = vmax.xlane.f32.xlu2 %v1432_v0  ;;  %1439 = vmax.xlane.f32.xlu1 %v1438_v1  ;;  %v1413_v2 = vsel %vm1403_vm5, %v1392_v63, -1e+30 }
 0x304   : > { %v1444_v7 = vsel %vm1416_vm6, %v1413_v2, -inf }
 0x308   : > { %v1359_v3 = vpop.f32.mrf.mxu3 }
 0x309   : > { %v3707_v4 = vsel %vm1403_vm5, %v1359_v3, -1e+30 }
 0x30a   : > { %v1394_v5 = vpop.f32.mrf.mxu0  ;;  %v1441_v6 = vsel %vm1416_vm6, %v3707_v4, -inf }
 0x30b   : > { %1442 = vmax.xlane.f32.xlu1 %v1441_v6  ;;  %1445 = vmax.xlane.f32.xlu2 %v1444_v7  ;;  %v1414_v8 = vsel %vm1403_vm5, %v1394_v5, -1e+30  ;;  %v1423_v6 = vsel %vm1416_vm6, %v3690_v46, -inf }
 0x30c   : > { %v1447_v11 = vsel %vm1416_vm6, %v1414_v8, -inf }
 0x310   : > { %v1361_v9 = vpop.f32.mrf.mxu3 }
 0x312   : > { %v1397_v10 = vpop.f32.mrf.mxu0 }
 0x313   : > { %v3715_v12 = vsel %vm1403_vm5, %v1397_v10, -1e+30  ;;  %1448 = vmax.xlane.f32.xlu1 %v1447_v11 }
 0x314   : > { %v1450_v14 = vsel %vm1416_vm6, %v3715_v12, -inf }
 0x31a   : > { %v1399_v13 = vpop.f32.mrf.mxu0 }
 0x323   : > { %1087 = vrot.lane.b32.xlu2 %v3596_v48, %s3298_s3 }
 0x32c   : > { %1074 = vrot.lane.b32.xlu1 %v3596_v48, %s3299_s29 }
 0x348   : > { %v1419_v17 = vpop.xlane.xlu2 %1418 }
 0x349   : > { %v1453_v44 = vsub.f32 %v3680_v39, %v1419_v17 }
 0x34b   : > { %v1465_v47 = vmul.f32 1.442695, %v1453_v44 }
 0x350   : > { %v1422_v15 = vpop.xlane.xlu1 %1421 }
 0x351   : > { %v1454_v52 = vsub.f32 %v3685_v43, %v1422_v15 }
 0x353   : > { %v1467_v56 = vmul.f32 1.442695, %v1454_v52 }
 0x356   : > { %1451 = vmax.xlane.f32.xlu1 %v1450_v14 }
 0x35e   : > { %v1428_v18 = vpop.xlane.xlu1 %1427 }
 0x35f   : > { %v1456_v16 = vsub.f32 %v1407_v49, %v1428_v18 }
 0x361   : > { %v1471_v19 = vmul.f32 1.442695, %v1456_v16 }
 0x363   : > { %2971 = vpow2.f32 %v1471_v19 }
 0x366   : > { %v1431_v20 = vpop.xlane.xlu2 %1430 }
 0x367   : > { %v1457_v21 = vsub.f32 %v1408_v53, %v1431_v20 }
 0x369   : > { %v3723_v22 = vpop.eup %2971  ;;  %v1473_v23 = vmul.f32 1.442695, %v1457_v21 }
 0x36a   : > { %v1498_v24 = vsel %vm1416_vm6, %v3723_v22, 0.0 }
 0x36b   : > { %2973 = vpow2.f32 %v1473_v23  ;;  %1499 = vadd.xlane.f32.xlu2 %v1498_v24 }
 0x36e   : > { %v1437_v25 = vpop.xlane.xlu2 %1436 }
 0x36f   : > { %v1459_v26 = vsub.f32 %v1410_v57, %v1437_v25 }
 0x371   : > { %v3727_v27 = vpop.eup %2973  ;;  %v1477_v28 = vmul.f32 1.442695, %v1459_v26 }
 0x372   : > { %v1501_v29 = vsel %vm1416_vm6, %v3727_v27, 0.0 }
 0x373   : > { %2975 = vpow2.f32 %v1477_v28  ;;  %1502 = vadd.xlane.f32.xlu1 %v1501_v29 }
 0x376   : > { %v1434_v30 = vpop.xlane.xlu2 %1433  ;;  %v1440_v31 = vpop.xlane.xlu1 %1439 }
 0x377   : > { %v1460_v32 = vsub.f32 %v1411_v62, %v1440_v31  ;;  %v1458_v55 = vsub.f32 %v3699_v59, %v1434_v30 }
 0x379   : > { %v3731_v33 = vpop.eup %2975  ;;  %v1479_v34 = vmul.f32 1.442695, %v1460_v32  ;;  %v1475_v57 = vmul.f32 1.442695, %v1458_v55 }
 0x37a   : > { %v1507_v35 = vsel %vm1416_vm6, %v3731_v33, 0.0 }
 0x37b   : > { %1508 = vadd.xlane.f32.xlu0 %v1507_v35  ;;  %2977 = vpow2.f32 %v1479_v34 }
 0x37e   : > { %v1443_v36 = vpop.xlane.xlu1 %1442  ;;  %v1446_v37 = vpop.xlane.xlu2 %1445 }
 0x37f   : > { %v1462_v38 = vsub.f32 %v1413_v2, %v1446_v37  ;;  %v1461_v61 = vsub.f32 %v3707_v4, %v1443_v36 }
 0x381   : > { %v1483_v40 = vmul.f32 1.442695, %v1462_v38  ;;  %v3735_v41 = vpop.eup %2977  ;;  %v1481_v63 = vmul.f32 1.442695, %v1461_v61 }
 0x382   : > { %v1510_v45 = vsel %vm1416_vm6, %v3735_v41, 0.0 }
 0x383   : > { %2979 = vpow2.f32 %v1483_v40  ;;  %1511 = vadd.xlane.f32.xlu2 %v1510_v45 }
 0x384   : > { %2981 = vpow2.f32 %v1465_v47 }
 0x386   : > { %v1088_v49 = vpop.permute.xlu2 %1087  ;;  %v1449_v50 = vpop.xlane.xlu1 %1448 }
 0x387   : > { %1096 = vst.msk [vmem:[#allocation4 + $0x1c] sm:$0xf] %vm1065_vm1, %v1088_v49  ;;  %v1463_v51 = vsub.f32 %v1414_v8, %v1449_v50 }
 0x389   : > { %v1485_v53 = vmul.f32 1.442695, %v1463_v51  ;;  %v3742_v54 = vpop.eup %2979 }
 0x38a   : > { %v1516_v39 = vsel %vm1416_vm6, %v3742_v54, 0.0  ;;  %v3749_v60 = vpop.eup %2981 }
 0x38b   : > { %2983 = vpow2.f32 %v1485_v53  ;;  %1517 = vadd.xlane.f32.xlu1 %v1516_v39  ;;  %v1489_v62 = vsel %vm1416_vm6, %v3749_v60, 0.0 }
 0x38c   : > { %2985 = vpow2.f32 %v1467_v56 }
 0x38d   : > { %2987 = vpow2.f32 %v1475_v57 }
 0x38e   : > { %v2808_v58 = vld [vmem:[#allocation4 + $0x18] sm:$0xff]  ;;  %2989 = vpow2.f32 %v1481_v63 }
 0x38f   : > { %1098 = vrot.lane.b32.xlu0 %v3589_v42, %s3300_s22  ;;  %1695 = vmatpush.bf16.msra.mxu3 %v2808_v58 }
 0x391   : > { %v3751_v43 = vpop.eup %2983 }
 0x392   : > { %v1519_v59 = vsel %vm1416_vm6, %v3751_v43, 0.0  ;;  %v3758_v0 = vpop.eup %2985 }
 0x393   : > { %1520 = vadd.xlane.f32.xlu2 %v1519_v59  ;;  %1490 = vadd.xlane.f32.xlu1 %v1489_v62  ;;  %v3762_v42 = vpop.eup %2987  ;;  %v1492_v1 = vsel %vm1416_vm6, %v3758_v0, 0.0 }
 0x394   : > { %v1504_v2 = vsel %vm1416_vm6, %v3762_v42, 0.0  ;;  %v3768_v4 = vpop.eup %2989 }
 0x395   : > { %v1513_v5 = vsel %vm1416_vm6, %v3768_v4, 0.0 }
 0x397   : > { %1100 = vrot.lane.b32.xlu0 %v3596_v48, %s3300_s22  ;;  %s2409_s22 = sshll.u32 %s2406_s4, 4  ;;  %s2410_s22 = int_to_ptr.hbm [resolvable:$true] %s2409_s22 }
 0x39b   : > { %1493 = vadd.xlane.f32.xlu2 %v1492_v1  ;;  %1505 = vadd.xlane.f32.xlu1 %v1504_v2 }
 0x39e   : > { %v1075_v3 = vpop.permute.xlu1 %1074 }
 0x39f   : > { %1083 = vst.msk [vmem:[#allocation4 + $0x10] sm:$0xf] %vm1065_vm1, %v1075_v3 }
 0x3a3   : > { %1514 = vadd.xlane.f32.xlu2 %v1513_v5 }
 0x3a6   : > { %v2807_v48 = vld [vmem:[#allocation4 + $0xc] sm:$0xff] }
 0x3a7   : > { %1651 = vmatpush.bf16.msra.mxu2 %v2807_v48 }
 0x3c1   : > { %1424 = vmax.xlane.f32.xlu0 %v1423_v6 }
 0x3c9   : > { %v1452_v7 = vpop.xlane.xlu1 %1451 }
 0x3ca   : > { %v1464_v8 = vsub.f32 %v3715_v12, %v1452_v7 }
 0x3cc   : > { %v1487_v9 = vmul.f32 1.442695, %v1464_v8 }
 0x3ce   : > { %2991 = vpow2.f32 %v1487_v9 }
 0x3d4   : > { %v3776_v10 = vpop.eup %2991 }
 0x3d5   : > { %v1522_v11 = vsel %vm1416_vm6, %v3776_v10, 0.0 }
 0x3d6   : > { %1523 = vadd.xlane.f32.xlu1 %v1522_v11 }
 0x3de   : > { %v1500_v13 = vpop.xlane.xlu2 %1499 }
 0x3df   : > { %2993 = vrcp.f32 %v1500_v13 }
 0x3e5   : > { %v2994_v15 = vpop.eup %2993 }
 0x3e6   : > { %v1503_v14 = vpop.xlane.xlu1 %1502  ;;  %v1540_v17 = vmul.f32 %v2994_v15, %v3723_v22 }
 0x3e7   : > { %2995 = vrcp.f32 %v1503_v14 }
 0x3e8   : > { %v1552_v16 = vpack.c.bf16 %v1540_v17, %v1540_v17 }
 0x3ea   : > { %v1621_v21 = vunpack.c.l.b16 %v1552_v16 }
 0x3ed   : > { %v2996_v18 = vpop.eup %2995 }
 0x3ee   : > { %v1541_v19 = vmul.f32 %v2996_v18, %v3727_v27  ;;  %v1509_v12 = vpop.xlane.xlu0 %1508 }
 0x3ef   : > { %2997 = vrcp.f32 %v1509_v12 }
 0x3f0   : > { %v1553_v20 = vpack.c.bf16 %v1541_v19, %v1541_v19 }
 0x3f2   : > { %v1622_v23 = vunpack.c.l.b16 %v1553_v20 }
 0x3f4   : > { %v1624_v24 = vpack.c.b16 %v1622_v23, %v1621_v21 }
 0x3f5   : > { %v2998_v26 = vpop.eup %2997 }
 0x3f6   : > { %2675 = vmatmul.msk.bf16.vlgmr.msra.gmra.mxu2 %vm1416_vm6, %v1624_v24  ;;  %v1512_v25 = vpop.xlane.xlu2 %1511  ;;  %v1543_v28 = vmul.f32 %v2998_v26, %v3731_v33 }
 0x3f7   : > { %2999 = vrcp.f32 %v1512_v25 }
 0x3f8   : > { %v1555_v30 = vpack.c.bf16 %v1543_v28, %v1543_v28 }
 0x3fa   : > { %v1665_v34 = vunpack.c.l.b16 %v1555_v30 }
 0x3fd   : > { %v3000_v29 = vpop.eup %2999 }
 0x3fe   : > { %v1544_v22 = vmul.f32 %v3000_v29, %v3735_v41  ;;  %v1518_v31 = vpop.xlane.xlu1 %1517 }
 0x3ff   : > { %3001 = vrcp.f32 %v1518_v31 }
 0x400   : > { %v1556_v32 = vpack.c.bf16 %v1544_v22, %v1544_v22 }
 0x401   : > { %v1099_v27 = vpop.permute.xlu0 %1098 }
 0x402   : > { %1108 = vst.msk [vmem:[#allocation4 + $0x24] sm:$0xf] %vm1065_vm1, %v1099_v27  ;;  %v1666_v35 = vunpack.c.l.b16 %v1556_v32 }
 0x404   : > { %v1668_v36 = vpack.c.b16 %v1666_v35, %v1665_v34 }
 0x405   : > { %v3002_v38 = vpop.eup %3001 }
 0x406   : > { %v1521_v37 = vpop.xlane.xlu2 %1520  ;;  %2681 = vmatmul.msk.bf16.vlgmr.msra.gmra.mxu3 %vm1416_vm6, %v1668_v36  ;;  %v1491_v40 = vpop.xlane.xlu1 %1490  ;;  %v1546_v44 = vmul.f32 %v3002_v38, %v3742_v54 }
 0x407   : > { %3003 = vrcp.f32 %v1521_v37 }
 0x408   : > { %3005 = vrcp.f32 %v1491_v40  ;;  %v1558_v45 = vpack.c.bf16 %v1546_v44, %v1546_v44 }
 0x409   : > { %v1101_v33 = vpop.permute.xlu0 %1100 }
 0x40a   : > { %1109 = vst.msk [vmem:[#allocation4 + $0x28] sm:$0xf] %vm1065_vm1, %v1101_v33  ;;  %v1709_v55 = vunpack.c.l.b16 %v1558_v45 }
 0x40d   : > { %v3004_v41 = vpop.eup %3003 }
 0x40e   : > { %v1547_v47 = vmul.f32 %v3004_v41, %v3751_v43  ;;  %v1494_v49 = vpop.xlane.xlu2 %1493  ;;  %v3006_v50 = vpop.eup %3005 }
 0x40f   : > { %3007 = vrcp.f32 %v1494_v49  ;;  %v1506_v51 = vpop.xlane.xlu1 %1505  ;;  %v1537_v56 = vmul.f32 %v3006_v50, %v3749_v60 }
 0x410   : > { %v1559_v52 = vpack.c.bf16 %v1547_v47, %v1547_v47  ;;  %3009 = vrcp.f32 %v1506_v51 }
 0x411   : > { %v2809_v53 = vld [vmem:[#allocation4 + $0x24] sm:$0xff]  ;;  %v1549_v61 = vpack.c.bf16 %v1537_v56, %v1537_v56 }
 0x412   : > { %v1710_v39 = vunpack.c.l.b16 %v1559_v52  ;;  %1739 = vmatpush.bf16.msrb.mxu0 %v2809_v53 }
 0x413   : > { %v1576_v2 = vunpack.c.l.b16 %v1549_v61 }
 0x414   : > { %v1712_v57 = vpack.c.b16 %v1710_v39, %v1709_v55  ;;  %v2814_v55 = vld [vmem:[#allocation12 + $0x18] sm:$0xff]  ;;  %v2813_v39 = vld [vmem:[#allocation12 + $0x10] sm:$0xff] }
 0x415   : > { %v3008_v54 = vpop.eup %3007  ;;  %1870 = vmatpush.bf16.msrb.mxu1 %v2814_v55 }
 0x416   : > { %v3010_v58 = vpop.eup %3009  ;;  %v1538_v59 = vmul.f32 %v3008_v54, %v3758_v0  ;;  %v1515_v62 = vpop.xlane.xlu2 %1514  ;;  %2687 = vmatmul.msk.bf16.vlgmr.msrb.gmra.mxu0 %vm1416_vm6, %v1712_v57  ;;  %v2812_v54 = vld [vmem:[#allocation12 + $0x8] sm:$0xff] }
 0x417   : > { %3011 = vrcp.f32 %v1515_v62  ;;  %v1542_v43 = vmul.f32 %v3010_v58, %v3762_v42  ;;  %v2811_v58 = vld [vmem:[#allocation12] sm:$0xff] }
 0x418   : > { %v1550_v63 = vpack.c.bf16 %v1538_v59, %v1538_v59 }
 0x419   : > { %v1554_v1 = vpack.c.bf16 %v1542_v43, %v1542_v43  ;;  %1871 = vmatpush.bf16.msrb.mxu1 %v2813_v39  ;;  %v2815_v39 = vld [vmem:[#allocation13] sm:$0xff] }
 0x41a   : > { %v1577_v3 = vunpack.c.l.b16 %v1550_v63 }
 0x41b   : > { %v1623_v5 = vunpack.c.l.b16 %v1554_v1 }
 0x41c   : > { %v1579_v48 = vpack.c.b16 %v1577_v3, %v1576_v2 }
 0x41d   : > { %v3012_v60 = vpop.eup %3011  ;;  %v1625_v6 = vpack.c.b16 %v1623_v5, %v1623_v5  ;;  %1872 = vmatpush.bf16.msrb.mxu1 %v2812_v54 }
 0x41e   : > { %2669 = vmatmul.msk.bf16.vlgmr.msra.gmra.mxu1 %vm1416_vm6, %v1579_v48  ;;  %v1545_v7 = vmul.f32 %v3012_v60, %v3768_v4 }
 0x41f   : > { %2676 = vmatmul.msk.bf16.gmra.mxu2 %vm1416_vm6, %v1625_v6 }
 0x420   : > { %v1557_v0 = vpack.c.bf16 %v1545_v7, %v1545_v7 }
 0x421   : > { %1873 = vmatpush.bf16.msrb.mxu1 %v2811_v58 }
 0x422   : > { %v1667_v8 = vunpack.c.l.b16 %v1557_v0 }
 0x424   : > { %v1669_v9 = vpack.c.b16 %v1667_v8, %v1667_v8  ;;  %v2963_v8 = vld [vmem:[%s3986_s10] ss:$0 sm:$0xff] }
 0x426   : > { %2682 = vmatmul.msk.bf16.gmra.mxu3 %vm1416_vm6, %v1669_v9 }
 0x434   : > { %v1425_v42 = vpop.xlane.xlu0 %1424 }
 0x435   : > { %v1455_v11 = vsub.f32 %v3690_v46, %v1425_v42 }
 0x437   : > { %v1469_v13 = vmul.f32 1.442695, %v1455_v11  ;;  %v3045_v11 = vld [vmem:[#allocation2] sm:$0xff] }
 0x439   : > { %3013 = vpow2.f32 %v1469_v13 }
 0x43f   : > { %v3014_v14 = vpop.eup %3013 }
 0x440   : > { %v1495_v15 = vsel %vm1416_vm6, %v3014_v14, 0.0 }
 0x441   : > { %1496 = vadd.xlane.f32.xlu2 %v1495_v15 }
 0x449   : > { %v1524_v17 = vpop.xlane.xlu1 %1523 }
 0x44a   : > { %3015 = vrcp.f32 %v1524_v17 }
 0x450   : > { %v3016_v18 = vpop.eup %3015 }
 0x451   : > { %v1548_v4 = vmul.f32 %v3016_v18, %v3776_v10  ;;  %v3046_v18 = vld [vmem:[#allocation2 + $0x8] sm:$0xff] }
 0x453   : > { %v1560_v16 = vpack.c.bf16 %v1548_v4, %v1548_v4 }
 0x455   : > { %v1711_v19 = vunpack.c.l.b16 %v1560_v16 }
 0x457   : > { %v1713_v12 = vpack.c.b16 %v1711_v19, %v1711_v19 }
 0x459   : > { %2688 = vmatmul.msk.bf16.gmra.mxu0 %vm1416_vm6, %v1713_v12 }
 0x479   : > { %v1653_v20 = vpop.f32.mrf.mxu2 }
 0x47a   : > { %v1756_v21 = vpack.c.bf16 %v1653_v20, %v1653_v20  ;;  %v3047_v20 = vld [vmem:[#allocation2 + $0x10] sm:$0xff] }
 0x47c   : > { %1762 = vrot.lane.b32.xlu0 %v1756_v21, %s3301_s7 }
 0x481   : > { %v1655_v46 = vpop.f32.mrf.mxu2 }
 0x482   : > { %v1757_v23 = vpack.c.bf16 %v1655_v46, %v1655_v46 }
 0x484   : > { %1764 = vrot.lane.b32.xlu1 %v1757_v23, %s3301_s7 }
 0x489   : > { %v1697_v24 = vpop.f32.mrf.mxu3 }
 0x48a   : > { %v1775_v25 = vpack.c.bf16 %v1697_v24, %v1697_v24  ;;  %v3304_v24 = vmov 64.0  }
 0x48c   : > { %1781 = vrot.lane.b32.xlu2 %v1775_v25, %s3302_s13 }
 0x491   : > { %v1699_v26 = vpop.f32.mrf.mxu3 }
 0x492   : > { %v1776_v28 = vpack.c.bf16 %v1699_v26, %v1699_v26 }
 0x493   : > { %v1741_v29 = vpop.f32.mrf.mxu0 }
 0x494   : > { %v1794_v10 = vpack.c.bf16 %v1741_v29, %v1741_v29  ;;  %1783 = vrot.lane.b32.xlu0 %v1776_v28, %s3302_s13 }
 0x496   : > { %1800 = vrot.lane.b32.xlu1 %v1794_v10, %s3303_s18 }
 0x49b   : > { %v1609_v30 = vpop.f32.mrf.mxu1  ;;  %v1743_v22 = vpop.f32.mrf.mxu0 }
 0x49c   : > { %v1750_v31 = vpack.c.bf16 %v1609_v30, %v1609_v30  ;;  %v1795_v32 = vpack.c.bf16 %v1743_v22, %v1743_v22 }
 0x49e   : > { %1753 = vst.msk [vmem:[#allocation6] sm:$0xf] %vm1065_vm1, %v1750_v31  ;;  %1802 = vrot.lane.b32.xlu0 %v1795_v32, %s3303_s18 }
 0x4a2   : > { %v1658_v27 = vpop.f32.mrf.mxu2 }
 0x4a3   : > { %v1758_v34 = vpack.c.bf16 %v1658_v27, %v1658_v27  ;;  %v1611_v35 = vpop.f32.mrf.mxu1 }
 0x4a4   : > { %v1751_v36 = vpack.c.bf16 %v1611_v35, %v1611_v35 }
 0x4a5   : > { %1766 = vrot.lane.b32.xlu2 %v1758_v34, %s3301_s7  ;;  %s4046_s7 = sld [smem:[#allocation22_spill]] }
 0x4a6   : > { %1754 = vst.msk [vmem:[#allocation6 + $0x4] sm:$0xf] %vm1065_vm1, %v1751_v36 }
 0x4a9   : > { %v1702_v37 = vpop.f32.mrf.mxu3 }
 0x4aa   : > { %v1660_v38 = vpop.f32.mrf.mxu2  ;;  %v1777_v40 = vpack.c.bf16 %v1702_v37, %v1702_v37 }
 0x4ac   : > { %1785 = vrot.lane.b32.xlu1 %v1777_v40, %s3302_s13  ;;  %s744_s13 = sand.u32 1, %s4046_s7  }
 0x4ad   : > { %s2393_s21 = scalar_lea.sflag [#allocation9], %s744_s13 }
 0x4b1   : > { %v1704_v33 = vpop.f32.mrf.mxu3 }
 0x4b4   : > { %v1497_v44 = vpop.xlane.xlu2 %1496 }
 0x4b5   : > { %3017 = vrcp.f32 %v1497_v44 }
 0x4b6   : > { %3019 = vrcp.f32 %v3304_v24 }
 0x4bb   : > { %v3018_v41 = vpop.eup %3017 }
 0x4bc   : > { %v1539_v45 = vmul.f32 %v3018_v41, %v3014_v14  ;;  %v3020_v25 = vpop.eup %3019 }
 0x4bd   : > { %v1899_v26 = vmul.f32 64.0, %v3020_v25  ;;  %vm1903_vm10 = vweird.f32 %v3020_v25 }
 0x4be   : > { %v1551_v47 = vpack.c.bf16 %v1539_v45, %v1539_v45 }
 0x4bf   : > { %v1900_v28 = vsub.f32 1.0, %v1899_v26 }
 0x4c0   : > { %v1578_v49 = vunpack.c.l.b16 %v1551_v47 }
 0x4c1   : > { %v1901_v29 = vmul.f32 %v3020_v25, %v1900_v28 }
 0x4c2   : > { %v1580_v50 = vpack.c.b16 %v1578_v49, %v1578_v49  ;;  %v2818_v49 = vld [vmem:[#allocation13 + $0x18] sm:$0xff] }
 0x4c3   : > { %v1902_v10 = vadd.f32 %v3020_v25, %v1901_v29  ;;  %2022 = vmatpush.bf16.msrb.mxu2 %v2818_v49 }
 0x4c4   : > { %2670 = vmatmul.msk.bf16.gmra.mxu1 %vm1416_vm6, %v1580_v50  ;;  %v2817_v50 = vld [vmem:[#allocation13 + $0x10] sm:$0xff] }
 0x4c5   : > { %v3823_v30 = vsel %vm1903_vm10, %v3020_v25, %v1902_v10  ;;  %v3860_v10 = vld [vmem:[%s3990_s14] ss:$0 sm:$0xff] }
 0x4c7   : > { %2023 = vmatpush.bf16.msrb.mxu2 %v2817_v50 }
 0x4d6   : > { %v1746_v51 = vpop.f32.mrf.mxu0 }
 0x4d7   : > { %v1796_v52 = vpack.c.bf16 %v1746_v51, %v1746_v51  ;;  %v2816_v51 = vld [vmem:[#allocation13 + $0x8] sm:$0xff] }
 0x4d8   : > { %2024 = vmatpush.bf16.msrb.mxu2 %v2816_v51 }
 0x4d9   : > { %1804 = vrot.lane.b32.xlu0 %v1796_v52, %s3303_s18  ;;  %s2835_s18 = smul.u32 24, %s744_s13 }
 0x4db   : > { %s746_s30 = scalar_lea.vmem [#allocation16], %s2835_s18 }
 0x4dc   : > { %2025 = vmatpush.bf16.msrb.mxu2 %v2815_v39  ;;  %s2407_s29 = sshll.u32 %s746_s30, 4  ;;  %s2408_s29 = int_to_ptr.vmem [resolvable:$true] %s2407_s29 }
 0x4de   : > { %v1748_v53 = vpop.f32.mrf.mxu0 }
 0x4e6   : > { %v1782_v57 = vpop.permute.xlu2 %1781 }
 0x4ee   : > { %v1763_v56 = vpop.permute.xlu0 %1762 }
 0x4ef   : > { %1772 = vst.msk [vmem:[#allocation6] sm:$0xf] %vm1771_vm7, %v1763_v56 }
 0x4f0   : > { %1791 = vst.msk [vmem:[#allocation6] sm:$0xf] %vm1790_vm8, %v1782_v57 }
 0x4f6   : > { %v1765_v61 = vpop.permute.xlu1 %1764 }
 0x4f7   : > { %1773 = vst.msk [vmem:[#allocation6 + $0x4] sm:$0xf] %vm1771_vm7, %v1765_v61 }
 0x4ff   : > { %v1767_v3 = vpop.permute.xlu2 %1766 }
 0x506   : > { %v1784_v59 = vpop.permute.xlu0 %1783 }
 0x507   : > { %1792 = vst.msk [vmem:[#allocation6 + $0x4] sm:$0xf] %vm1790_vm8, %v1784_v59 }
 0x508   : > { %v1801_v62 = vpop.permute.xlu1 %1800 }
 0x509   : > { %1810 = vst.msk [vmem:[#allocation6] sm:$0xf] %vm1809_vm9, %v1801_v62 }
 0x510   : > { %v1803_v43 = vpop.permute.xlu0 %1802 }
 0x511   : > { %1811 = vst.msk [vmem:[#allocation6 + $0x4] sm:$0xf] %vm1809_vm9, %v1803_v43 }
 0x518   : > { %v2810_v63 = vld [vmem:[#allocation6] sm:$0xff] }
 0x519   : > { %2709 = vmatmul.msk.bf16.vlgmr.msrb.gmra.mxu1 %vm799_vm0, %v2810_v63 }
 0x51e   : > { %v1786_v5 = vpop.permute.xlu1 %1785 }
 0x541   : > { %v1614_v1 = vpop.f32.mrf.mxu1 }
 0x542   : > { %v1752_v2 = vpack.c.bf16 %v1614_v1, %v1614_v1 }
 0x544   : > { %1755 = vst.msk [vmem:[#allocation6 + $0x8] sm:$0xf] %vm1065_vm1, %v1752_v2 }
 0x545   : > { %1774 = vst.msk [vmem:[#allocation6 + $0x8] sm:$0xf] %vm1771_vm7, %v1767_v3 }
 0x546   : > { %1793 = vst.msk [vmem:[#allocation6 + $0x8] sm:$0xf] %vm1790_vm8, %v1786_v5 }
 0x549   : > { %v1616_v48 = vpop.f32.mrf.mxu1 }
 0x54b   : > { %v1805_v60 = vpop.permute.xlu0 %1804 }
 0x54c   : > { %1812 = vst.msk [vmem:[#allocation6 + $0x8] sm:$0xf] %vm1809_vm9, %v1805_v60 }
 0x553   : > { %v1815_v6 = vld [vmem:[#allocation6 + $0x8] sm:$0xf] }
 0x554   : > { %v1833_v7 = vunpack.c.l.b16 %v1815_v6  ;;  %v2964_v6 = vld [vmem:[%s3987_s11] ss:$0 sm:$0xff] }
 0x556   : > { %v1835_v0 = vpack.c.b16 %v1833_v7, %v1833_v7 }
 0x558   : > { %2710 = vmatmul.msk.bf16.gmra.mxu1 %vm799_vm0, %v1835_v0 }
 0x596   : > { %v1875_v9 = vpop.f32.mrf.mxu1 }
 0x597   : > { %v1876_v42 = vadd.f32 %v2963_v8, %v1875_v9  ;;  %v2965_v9 = vld [vmem:[%s3988_s12] ss:$0 sm:$0xff] }
 0x599   : > { %v1884_v13 = vadd.f32 %v3045_v11, %v1876_v42 }
 0x59b   : > { %v1889_v14 = vsel %vm799_vm0, %v1884_v13, 0.0 }
 0x59c   : > { %1890 = vadd.xlane.f32.xlu2 %v1889_v14 }
 0x59e   : > { %v1877_v15 = vpop.f32.mrf.mxu1 }
 0x59f   : > { %v1878_v17 = vadd.f32 %v2963_v8, %v1877_v15 }
 0x5a1   : > { %v1885_v4 = vadd.f32 %v3046_v18, %v1878_v17 }
 0x5a3   : > { %v1892_v16 = vsel %vm799_vm0, %v1885_v4, 0.0 }
 0x5a4   : > { %1893 = vadd.xlane.f32.xlu1 %v1892_v16 }
 0x5d5   : > { %v1880_v19 = vpop.f32.mrf.mxu1 }
 0x5d6   : > { %v1881_v12 = vadd.f32 %v2963_v8, %v1880_v19 }
 0x5d8   : > { %v1886_v21 = vadd.f32 %v3047_v20, %v1881_v12 }
 0x5da   : > { %v1895_v46 = vsel %vm799_vm0, %v1886_v21, 0.0 }
 0x5db   : > { %1896 = vadd.xlane.f32.xlu0 %v1895_v46 }
 0x5dd   : > { %v1882_v23 = vpop.f32.mrf.mxu1 }
 0x60f   : > { %v1891_v22 = vpop.xlane.xlu2 %1890 }
 0x610   : > { %v1905_v31 = vmul.f32 %v3823_v30, %v1891_v22 }
 0x612   : > { %v1908_v32 = vsub.f32 %v1884_v13, %v1905_v31 }
 0x614   : > { %v1911_v27 = vmul.f32 %v1908_v32, %v1908_v32 }
 0x616   : > { %v1914_v34 = vsel %vm799_vm0, %v1911_v27, 0.0  ;;  %v2826_v27 = vld [vmem:[%s3991_s15 + $0x38] sm:$0xff] }
 0x617   : > { %v1894_v35 = vpop.xlane.xlu1 %1893  ;;  %1915 = vadd.xlane.f32.xlu2 %v1914_v34  ;;  %2226 = vmatpush.bf16.msrb.mxu3 %v2826_v27 }
 0x618   : > { %v1906_v36 = vmul.f32 %v3823_v30, %v1894_v35 }
 0x61a   : > { %v1909_v37 = vsub.f32 %v1885_v4, %v1906_v36 }
 0x61c   : > { %v1912_v38 = vmul.f32 %v1909_v37, %v1909_v37 }
 0x61e   : > { %v1917_v40 = vsel %vm799_vm0, %v1912_v38, 0.0 }
 0x61f   : > { %1918 = vadd.xlane.f32.xlu1 %v1917_v40 }
 0x64e   : > { %v1897_v33 = vpop.xlane.xlu0 %1896 }
 0x64f   : > { %v1907_v44 = vmul.f32 %v3823_v30, %v1897_v33 }
 0x651   : > { %v3830_v41 = vsub.f32 %v1886_v21, %v1907_v44  ;;  %v2824_v44 = vld [vmem:[%s3991_s15 + $0x28] sm:$0xff] }
 0x653   : > { %v1913_v45 = vmul.f32 %v3830_v41, %v3830_v41 }
 0x655   : > { %v1920_v47 = vsel %vm799_vm0, %v1913_v45, 0.0 }
 0x656   : > { %1921 = vadd.xlane.f32.xlu0 %v1920_v47  ;;  %v2823_v47 = vld [vmem:[%s3991_s15 + $0x20] sm:$0xff] }
 0x68a   : > { %v1916_v52 = vpop.xlane.xlu2 %1915 }
 0x68b   : > { %v1923_v53 = vmul.f32 %v1916_v52, %v3823_v30 }
 0x68d   : > { %v1926_v55 = vadd.f32 1e-05, %v1923_v53  ;;  %v2822_v53 = vld [vmem:[%s3991_s15 + $0x18] sm:$0xff] }
 0x68f   : > { %3021 = vrsqrt.f32 %v1926_v55  ;;  %vm1935_vm12 = vweird.f32 %v1926_v55 }
 0x692   : > { %v1919_v56 = vpop.xlane.xlu1 %1918 }
 0x693   : > { %v1924_v57 = vmul.f32 %v1919_v56, %v3823_v30 }
 0x695   : > { %v3022_v54 = vpop.eup %3021  ;;  %v1927_v58 = vadd.f32 1e-05, %v1924_v57 }
 0x696   : > { %v1930_v61 = vmul.f32 %v3022_v54, %v1926_v55  ;;  %vm1936_vm11 = vweird.f32 %v3022_v54 }
 0x697   : > { %3023 = vrsqrt.f32 %v1927_v58  ;;  %vm1937_vm13 = vmor %vm1935_vm12, %vm1936_vm11  ;;  %vm1945_vm15 = vweird.f32 %v1927_v58 }
 0x698   : > { %v1931_v59 = vmul.f32 %v3022_v54, %v1930_v61 }
 0x69a   : > { %v1932_v62 = vmul.f32 0.5, %v1931_v59 }
 0x69c   : > { %v1933_v43 = vsub.f32 1.5, %v1932_v62 }
 0x69d   : > { %v3024_v63 = vpop.eup %3023 }
 0x69e   : > { %v1934_v1 = vmul.f32 %v3022_v54, %v1933_v43  ;;  %v1940_v2 = vmul.f32 %v3024_v63, %v1927_v58  ;;  %vm1946_vm14 = vweird.f32 %v3024_v63 }
 0x69f   : > { %vm1947_vm1 = vmor %vm1945_vm15, %vm1946_vm14 }
 0x6a0   : > { %v1941_v3 = vmul.f32 %v3024_v63, %v1940_v2  ;;  %v1938_v5 = vsel %vm1937_vm13, %v3022_v54, %v1934_v1  ;;  %v2821_v54 = vld [vmem:[%s3991_s15 + $0x10] sm:$0xff]  ;;  %v2820_v2 = vld [vmem:[%s3991_s15 + $0x8] sm:$0xff] }
 0x6a1   : > { %v1959_v7 = vmul.f32 %v1938_v5, %v1908_v32 }
 0x6a2   : > { %v1942_v48 = vmul.f32 0.5, %v1941_v3 }
 0x6a3   : > { %v1965_v42 = vmul.f32 %v2964_v6, %v1959_v7 }
 0x6a4   : > { %v1943_v60 = vsub.f32 1.5, %v1942_v48 }
 0x6a5   : > { %v3843_v14 = vadd.f32 %v2965_v9, %v1965_v42 }
 0x6a6   : > { %v1944_v0 = vmul.f32 %v3024_v63, %v1943_v60 }
 0x6a8   : > { %v1948_v8 = vsel %vm1947_vm1, %v3024_v63, %v1944_v0 }
 0x6a9   : > { %v1960_v11 = vmul.f32 %v1948_v8, %v1909_v37  ;;  %v2825_v37 = vld [vmem:[%s3991_s15 + $0x30] sm:$0xff]  ;;  %v2819_v8 = vld [vmem:[%s3991_s15] sm:$0xff] }
 0x6aa   : > { %2227 = vmatpush.bf16.msrb.mxu3 %v2825_v37 }
 0x6ab   : > { %v1966_v13 = vmul.f32 %v2964_v6, %v1960_v11 }
 0x6ad   : > { %v3845_v15 = vadd.f32 %v2965_v9, %v1966_v13 }
 0x6ae   : > { %2228 = vmatpush.bf16.msrb.mxu3 %v2824_v44 }
 0x6af   : > { %v1974_v17 = vpack.c.bf16 %v3845_v15, %v3843_v14 }
 0x6b1   : > { %2727 = vmatmul.msk.bf16.vlgmr.msrb.gmra.mxu2 %vm799_vm0, %v1974_v17 }
 0x6b2   : > { %2229 = vmatpush.bf16.msrb.mxu3 %v2823_v47 }
 0x6b6   : > { %2230 = vmatpush.bf16.msrb.mxu3 %v2822_v53 }
 0x6ba   : > { %2231 = vmatpush.bf16.msrb.mxu3 %v2821_v54 }
 0x6be   : > { %2232 = vmatpush.bf16.msrb.mxu3 %v2820_v2 }
 0x6c2   : > { %2233 = vmatpush.bf16.msrb.mxu3 %v2819_v8 }
 0x6c9   : > { %v1922_v18 = vpop.xlane.xlu0 %1921 }
 0x6ca   : > { %v1925_v4 = vmul.f32 %v1922_v18, %v3823_v30 }
 0x6cc   : > { %v1928_v16 = vadd.f32 1e-05, %v1925_v4 }
 0x6ce   : > { %3025 = vrsqrt.f32 %v1928_v16  ;;  %vm1955_vm3 = vweird.f32 %v1928_v16 }
 0x6d4   : > { %v3026_v19 = vpop.eup %3025 }
 0x6d5   : > { %v1950_v12 = vmul.f32 %v3026_v19, %v1928_v16  ;;  %vm1956_vm2 = vweird.f32 %v3026_v19 }
 0x6d6   : > { %vm1957_vm4 = vmor %vm1955_vm3, %vm1956_vm2 }
 0x6d7   : > { %v1951_v20 = vmul.f32 %v3026_v19, %v1950_v12 }
 0x6d9   : > { %v1952_v21 = vmul.f32 0.5, %v1951_v20 }
 0x6db   : > { %v1953_v46 = vsub.f32 1.5, %v1952_v21 }
 0x6dd   : > { %v1954_v23 = vmul.f32 %v3026_v19, %v1953_v46 }
 0x6df   : > { %v1958_v24 = vsel %vm1957_vm4, %v3026_v19, %v1954_v23 }
 0x6e0   : > { %v1961_v25 = vmul.f32 %v1958_v24, %v3830_v41 }
 0x6e2   : > { %v1967_v26 = vmul.f32 %v2964_v6, %v1961_v25 }
 0x6e4   : > { %v3852_v28 = vadd.f32 %v2965_v9, %v1967_v26 }
 0x6e6   : > { %v1975_v29 = vpack.c.bf16 %v3852_v28, %v3852_v28 }
 0x6e8   : > { %2728 = vmatmul.msk.bf16.gmra.mxu2 %vm799_vm0, %v1975_v29 }
 0x734   : > { %v2027_v22 = vpop.f32.mrf.mxu2 }
 0x735   : > { %v3863_v31 = vadd.f32 %v3860_v10, %v2027_v22 }
 0x737   : > { %v3866_v32 = vmul.f32 0.70710677, %v3863_v31 }
 0x739   : > { %v2042_v34 = vand.u32 2147483647, %v3866_v32  ;;  %vm2141_vm13 = vcmp.lt.f32.partialorder %v3866_v32, 0.0 }
 0x73b   : > { %v2045_v35 = vmul.f32 0.3275911, %v2042_v34  ;;  %v2123_v43 = vsub.f32 0.0, %v2042_v34 }
 0x73c   : > { %v2029_v36 = vpop.f32.mrf.mxu2 }
 0x73d   : > { %v2048_v38 = vadd.f32 1.0, %v2045_v35  ;;  %v3876_v40 = vadd.f32 %v3860_v10, %v2029_v36  ;;  %v2126_v60 = vmul.f32 %v2123_v43, %v2042_v34 }
 0x73f   : > { %3027 = vrcp.f32 %v2048_v38  ;;  %v3879_v33 = vmul.f32 0.70710677, %v3876_v40  ;;  %v2062_v55 = vand.u32 2147483648, %v2048_v38  ;;  %v2060_v56 = vand.u32 2147483647, %v2048_v38 }
 0x740   : > { %vm2056_vm6 = vweird.f32 %v2048_v38  ;;  %v2129_v13 = vmul.f32 1.442695, %v2126_v60 }
 0x741   : > { %v2043_v41 = vand.u32 2147483647, %v3879_v33  ;;  %v2063_v58 = vor.u32 1.1754944e-38, %v2062_v55  ;;  %vm2061_vm8 = vcmp.eq.f32.partialorder %v2060_v56, 8.507059e+37  ;;  %vm2142_vm14 = vcmp.lt.f32.partialorder %v3879_v33, 0.0 }
 0x743   : > { %v2046_v45 = vmul.f32 0.3275911, %v2043_v41  ;;  %v2124_v16 = vsub.f32 0.0, %v2043_v41 }
 0x745   : > { %v3028_v49 = vpop.eup %3027  ;;  %v2049_v51 = vadd.f32 1.0, %v2046_v45  ;;  %v2127_v46 = vmul.f32 %v2124_v16, %v2043_v41 }
 0x746   : > { %v2052_v50 = vmul.f32 %v3028_v49, %v2048_v38  ;;  %vm2057_vm5 = vweird.f32 %v3028_v49 }
 0x747   : > { %3029 = vrcp.f32 %v2049_v51  ;;  %vm2058_vm7 = vmor %vm2056_vm6, %vm2057_vm5  ;;  %v2077_v48 = vand.u32 2147483648, %v2049_v51  ;;  %v2075_v7 = vand.u32 2147483647, %v2049_v51  ;;  %vm2071_vm10 = vweird.f32 %v2049_v51 }
 0x748   : > { %v2053_v52 = vsub.f32 1.0, %v2052_v50  ;;  %3031 = vpow2.f32 %v2129_v13  ;;  %v2131_v29 = vmul.f32 1.442695, %v2127_v46 }
 0x749   : > { %v2078_v11 = vor.u32 1.1754944e-38, %v2077_v48  ;;  %vm2076_vm12 = vcmp.eq.f32.partialorder %v2075_v7, 8.507059e+37 }
 0x74a   : > { %v2054_v39 = vmul.f32 %v3028_v49, %v2053_v52  ;;  %3033 = vpow2.f32 %v2131_v29 }
 0x74c   : > { %v2055_v57 = vadd.f32 %v3028_v49, %v2054_v39 }
 0x74d   : > { %v3030_v61 = vpop.eup %3029 }
 0x74e   : > { %v2059_v59 = vsel %vm2058_vm7, %v3028_v49, %v2055_v57  ;;  %v2067_v63 = vmul.f32 %v3030_v61, %v2049_v51  ;;  %vm2072_vm9 = vweird.f32 %v3030_v61  ;;  %v3032_v22 = vpop.eup %3031 }
 0x74f   : > { %v2064_v62 = vsel %vm2061_vm8, %v2063_v58, %v2059_v59  ;;  %vm2073_vm11 = vmor %vm2071_vm10, %vm2072_vm9  ;;  %v2036_v58 = vmul.f32 0.5, %v3863_v31 }
 0x750   : > { %v2096_v1 = vmul.f32 1.0614054, %v2064_v62  ;;  %v2068_v3 = vsub.f32 1.0, %v2067_v63  ;;  %v3034_v47 = vpop.eup %3033 }
 0x752   : > { %v2099_v5 = vadd.f32 -1.4531521, %v2096_v1  ;;  %v2069_v6 = vmul.f32 %v3030_v61, %v2068_v3 }
 0x754   : > { %v2102_v0 = vmul.f32 %v2099_v5, %v2064_v62  ;;  %v2070_v9 = vadd.f32 %v3030_v61, %v2069_v6 }
 0x756   : > { %v2105_v42 = vadd.f32 1.4214138, %v2102_v0  ;;  %v2074_v17 = vsel %vm2073_vm11, %v3030_v61, %v2070_v9  ;;  %v2037_v61 = vmul.f32 0.5, %v3876_v40 }
 0x757   : > { %v2079_v4 = vsel %vm2076_vm12, %v2078_v11, %v2074_v17 }
 0x758   : > { %v2108_v18 = vmul.f32 %v2105_v42, %v2064_v62  ;;  %v2097_v19 = vmul.f32 1.0614054, %v2079_v4 }
 0x75a   : > { %v2111_v12 = vadd.f32 -0.28449672, %v2108_v18  ;;  %v2100_v20 = vadd.f32 -1.4531521, %v2097_v19 }
 0x75c   : > { %v2114_v21 = vmul.f32 %v2111_v12, %v2064_v62  ;;  %v2103_v23 = vmul.f32 %v2100_v20, %v2079_v4 }
 0x75e   : > { %v2117_v24 = vadd.f32 0.2548296, %v2114_v21  ;;  %v2106_v25 = vadd.f32 1.4214138, %v2103_v23 }
 0x760   : > { %v2120_v26 = vmul.f32 %v2117_v24, %v2064_v62  ;;  %v2109_v27 = vmul.f32 %v2106_v25, %v2079_v4 }
 0x762   : > { %v2135_v34 = vmul.f32 %v3032_v22, %v2120_v26  ;;  %v2112_v35 = vadd.f32 -0.28449672, %v2109_v27  ;;  %v2967_v22 = vld [vmem:[%s3992_s16] ss:$0 sm:$0xff] }
 0x764   : > { %v2138_v36 = vsub.f32 1.0, %v2135_v34  ;;  %v2115_v37 = vmul.f32 %v2112_v35, %v2079_v4 }
 0x766   : > { %v2118_v38 = vadd.f32 0.2548296, %v2115_v37  ;;  %v2144_v44 = vsub.f32 0.0, %v2138_v36 }
 0x768   : > { %v2121_v45 = vmul.f32 %v2118_v38, %v2079_v4  ;;  %v2147_v51 = vsel %vm2141_vm13, %v2144_v44, %v2138_v36 }
 0x769   : > { %v2150_v56 = vadd.f32 1.0, %v2147_v51 }
 0x76a   : > { %v2136_v50 = vmul.f32 %v3034_v47, %v2121_v45 }
 0x76b   : > { %v2032_v49 = vpop.f32.mrf.mxu2 }
 0x76c   : > { %v2033_v41 = vadd.f32 %v3860_v10, %v2032_v49  ;;  %v2139_v52 = vsub.f32 1.0, %v2136_v50  ;;  %v2153_v10 = vmul.f32 %v2150_v56, %v2036_v58 }
 0x76e   : > { %v2041_v53 = vmul.f32 0.70710677, %v2033_v41  ;;  %v2145_v55 = vsub.f32 0.0, %v2139_v52  ;;  %v2038_v24 = vmul.f32 0.5, %v2033_v41 }
 0x770   : > { %v2044_v39 = vand.u32 2147483647, %v2041_v53  ;;  %v2148_v57 = vsel %vm2142_vm14, %v2145_v55, %v2139_v52  ;;  %vm2143_vm4 = vcmp.lt.f32.partialorder %v2041_v53, 0.0 }
 0x771   : > { %v2151_v59 = vadd.f32 1.0, %v2148_v57 }
 0x772   : > { %v2047_v54 = vmul.f32 0.3275911, %v2044_v39  ;;  %v2125_v6 = vsub.f32 0.0, %v2044_v39 }
 0x773   : > { %v2034_v62 = vpop.f32.mrf.mxu2  ;;  %v2154_v63 = vmul.f32 %v2151_v59, %v2037_v61 }
 0x774   : > { %v2050_v43 = vadd.f32 1.0, %v2047_v54  ;;  %v2128_v9 = vmul.f32 %v2125_v6, %v2044_v39 }
 0x775   : > { %v2156_v32 = vpack.c.bf16 %v2154_v63, %v2153_v10  ;;  %v2830_v10 = vld [vmem:[#allocation15 + $0x18] sm:$0xff]  ;;  %v2829_v63 = vld [vmem:[#allocation15 + $0x10] sm:$0xff] }
 0x776   : > { %3035 = vrcp.f32 %v2050_v43  ;;  %v2092_v5 = vand.u32 2147483648, %v2050_v43  ;;  %v2090_v33 = vand.u32 2147483647, %v2050_v43  ;;  %vm2086_vm1 = vweird.f32 %v2050_v43  ;;  %2375 = vmatpush.bf16.msra.mxu0 %v2830_v10 }
 0x777   : > { %2234 = vmatmul.bf16.vlgmr.msrb.gmra.mxu3 %v2156_v32  ;;  %v2133_v13 = vmul.f32 1.442695, %v2128_v9  ;;  %v2828_v32 = vld [vmem:[#allocation15 + $0x8] sm:$0xff] }
 0x778   : > { %v2093_v31 = vor.u32 1.1754944e-38, %v2092_v5  ;;  %vm2091_vm3 = vcmp.eq.f32.partialorder %v2090_v33, 8.507059e+37  ;;  %v2827_v5 = vld [vmem:[#allocation15] sm:$0xff] }
 0x779   : > { %3037 = vpow2.f32 %v2133_v13 }
 0x77a   : > { %2376 = vmatpush.bf16.msra.mxu0 %v2829_v63 }
 0x77c   : > { %v3036_v1 = vpop.eup %3035 }
 0x77d   : > { %v2082_v2 = vmul.f32 %v3036_v1, %v2050_v43  ;;  %vm2087_vm15 = vweird.f32 %v3036_v1 }
 0x77e   : > { %vm2088_vm2 = vmor %vm2086_vm1, %vm2087_vm15  ;;  %2377 = vmatpush.bf16.msra.mxu0 %v2828_v32 }
 0x77f   : > { %v2083_v3 = vsub.f32 1.0, %v2082_v2  ;;  %v3038_v12 = vpop.eup %3037 }
 0x781   : > { %v2084_v48 = vmul.f32 %v3036_v1, %v2083_v3 }
 0x782   : > { %2378 = vmatpush.bf16.msra.mxu0 %v2827_v5 }
 0x783   : > { %v2085_v60 = vadd.f32 %v3036_v1, %v2084_v48 }
 0x785   : > { %v2089_v40 = vsel %vm2088_vm2, %v3036_v1, %v2085_v60 }
 0x786   : > { %v2094_v7 = vsel %vm2091_vm3, %v2093_v31, %v2089_v40 }
 0x787   : > { %v2098_v0 = vmul.f32 1.0614054, %v2094_v7 }
 0x789   : > { %v2101_v8 = vadd.f32 -1.4531521, %v2098_v0 }
 0x78b   : > { %v2104_v42 = vmul.f32 %v2101_v8, %v2094_v7 }
 0x78d   : > { %v2107_v11 = vadd.f32 1.4214138, %v2104_v42 }
 0x78f   : > { %v2110_v17 = vmul.f32 %v2107_v11, %v2094_v7 }
 0x791   : > { %v2113_v18 = vadd.f32 -0.28449672, %v2110_v17 }
 0x793   : > { %v2116_v4 = vmul.f32 %v2113_v18, %v2094_v7 }
 0x795   : > { %v2119_v16 = vadd.f32 0.2548296, %v2116_v4  ;;  %v2968_v4 = vld [vmem:[%s3993_s17] ss:$0 sm:$0xff] }
 0x797   : > { %v2122_v19 = vmul.f32 %v2119_v16, %v2094_v7 }
 0x799   : > { %v2137_v20 = vmul.f32 %v3038_v12, %v2122_v19 }
 0x79b   : > { %v2140_v21 = vsub.f32 1.0, %v2137_v20  ;;  %v2969_v20 = vld [vmem:[%s4045_s20] ss:$0 sm:$0xff]  ;;  %s3212_s20 = sshra.s32 %s2410_s22, 4  ;;  %s3213_s20 = int_to_ptr.hbm [resolvable:$true] %s3212_s20 }
 0x79c   : > { %s3214_s7 = scalar_lea.hbm %s3213_s20, 24  ;;  %p3219_p5 = scmp.lt.s32.totalorder %s3213_s20, %s4049_s1 }
 0x79d   : > { %v2146_v46 = vsub.f32 0.0, %v2140_v21  ;;  %p3215_p1 = scmp.ne.s32.totalorder %s3213_s20, %s3214_s7  ;;  %p3220_p6 = scmp.lt.s32.totalorder %s3218_s25, %s3214_s7 }
 0x79f   : > { %v2149_v23 = vsel %vm2143_vm4, %v2146_v46, %v2140_v21  ;;  %p3216_p2 = pnand %p3215_p1, %p3457_p4  ;;  %p3221_p7 = por %p3220_p6, %p3219_p5 }
 0x7a0   : > { %v2152_v25 = vadd.f32 1.0, %v2149_v23 }
 0x7a1   : > { %p3217_p3 = pneg %p3216_p2 }
 0x7a2   : > { %v2155_v26 = vmul.f32 %v2152_v25, %v2038_v24 }
 0x7a3   : > { %p3222_p9 = pnand %p3221_p7, %p3217_p3 }
 0x7a4   : > { %v2157_v29 = vpack.c.bf16 %v2155_v26, %v2155_v26 }
 0x7a6   : > { %2239 = vmatmul.bf16.gmra.mxu3 %v2157_v29 }
 0x7fa   : > { %v2235_v27 = vpop.f32.mrf.mxu3 }
 0x7fb   : > { %v2236_v34 = vadd.f32 %v2967_v22, %v2235_v27 }
 0x7fd   : > { %v2244_v35 = vadd.f32 %v2236_v34, %v3843_v14 }
 0x7ff   : > { %v2249_v36 = vsel %vm799_vm0, %v2244_v35, 0.0 }
 0x800   : > { %2250 = vadd.xlane.f32.xlu2 %v2249_v36 }
 0x802   : > { %v2237_v37 = vpop.f32.mrf.mxu3 }
 0x803   : > { %v2238_v38 = vadd.f32 %v2967_v22, %v2237_v37 }
 0x805   : > { %v2245_v44 = vadd.f32 %v2238_v38, %v3845_v15 }
 0x807   : > { %v2252_v45 = vsel %vm799_vm0, %v2245_v44, 0.0 }
 0x808   : > { %2253 = vadd.xlane.f32.xlu1 %v2252_v45 }
 0x829   : > { %v2240_v47 = vpop.f32.mrf.mxu3 }
 0x82a   : > { %v2241_v49 = vadd.f32 %v2967_v22, %v2240_v47 }
 0x82c   : > { %v2246_v50 = vadd.f32 %v2241_v49, %v3852_v28 }
 0x82e   : > { %v2255_v41 = vsel %vm799_vm0, %v2246_v50, 0.0 }
 0x82f   : > { %2256 = vadd.xlane.f32.xlu0 %v2255_v41 }
 0x831   : > { %v2242_v51 = vpop.f32.mrf.mxu3 }
 0x873   : > { %v2251_v52 = vpop.xlane.xlu2 %2250 }
 0x874   : > { %v2258_v14 = vmul.f32 %v2251_v52, %v3823_v30 }
 0x876   : > { %v2261_v53 = vsub.f32 %v2244_v35, %v2258_v14 }
 0x878   : > { %v2264_v55 = vmul.f32 %v2261_v53, %v2261_v53 }
 0x87a   : > { %v2267_v39 = vsel %vm799_vm0, %v2264_v55, 0.0 }
 0x87b   : > { %v2254_v56 = vpop.xlane.xlu1 %2253  ;;  %2268 = vadd.xlane.f32.xlu2 %v2267_v39 }
 0x87c   : > { %v2259_v15 = vmul.f32 %v2254_v56, %v3823_v30 }
 0x87e   : > { %v2262_v57 = vsub.f32 %v2245_v44, %v2259_v15 }
 0x880   : > { %v2265_v54 = vmul.f32 %v2262_v57, %v2262_v57 }
 0x882   : > { %v2270_v58 = vsel %vm799_vm0, %v2265_v54, 0.0 }
 0x883   : > { %2271 = vadd.xlane.f32.xlu1 %v2270_v58 }
 0x8a2   : > { %v2257_v28 = vpop.xlane.xlu0 %2256 }
 0x8a3   : > { %v2260_v61 = vmul.f32 %v2257_v28, %v3823_v30 }
 0x8a5   : > { %v3919_v59 = vsub.f32 %v2246_v50, %v2260_v61 }
 0x8a7   : > { %v2266_v62 = vmul.f32 %v3919_v59, %v3919_v59 }
 0x8a9   : > { %v2273_v43 = vsel %vm799_vm0, %v2266_v62, 0.0 }
 0x8aa   : > { %2274 = vadd.xlane.f32.xlu0 %v2273_v43 }
 0x8ee   : > { %v2269_v1 = vpop.xlane.xlu2 %2268 }
 0x8ef   : > { %v2276_v2 = vmul.f32 %v2269_v1, %v3823_v30 }
 0x8f1   : > { %v2279_v3 = vadd.f32 1e-05, %v2276_v2 }
 0x8f3   : > { %3039 = vrsqrt.f32 %v2279_v3  ;;  %vm2288_vm6 = vweird.f32 %v2279_v3 }
 0x8f6   : > { %v2272_v48 = vpop.xlane.xlu1 %2271 }
 0x8f7   : > { %v2277_v33 = vmul.f32 %v2272_v48, %v3823_v30 }
 0x8f9   : > { %v3040_v60 = vpop.eup %3039  ;;  %v2280_v31 = vadd.f32 1e-05, %v2277_v33 }
 0x8fa   : > { %v2283_v40 = vmul.f32 %v3040_v60, %v2279_v3  ;;  %vm2289_vm5 = vweird.f32 %v3040_v60 }
 0x8fb   : > { %3041 = vrsqrt.f32 %v2280_v31  ;;  %vm2290_vm7 = vmor %vm2288_vm6, %vm2289_vm5  ;;  %vm2298_vm9 = vweird.f32 %v2280_v31 }
 0x8fc   : > { %v2284_v6 = vmul.f32 %v3040_v60, %v2283_v40 }
 0x8fe   : > { %v2285_v7 = vmul.f32 0.5, %v2284_v6 }
 0x900   : > { %v2286_v0 = vsub.f32 1.5, %v2285_v7 }
 0x901   : > { %v3042_v8 = vpop.eup %3041 }
 0x902   : > { %v2287_v9 = vmul.f32 %v3040_v60, %v2286_v0  ;;  %v2293_v42 = vmul.f32 %v3042_v8, %v2280_v31  ;;  %vm2299_vm8 = vweird.f32 %v3042_v8 }
 0x903   : > { %vm2300_vm10 = vmor %vm2298_vm9, %vm2299_vm8 }
 0x904   : > { %v2294_v11 = vmul.f32 %v3042_v8, %v2293_v42  ;;  %v2291_v13 = vsel %vm2290_vm7, %v3040_v60, %v2287_v9 }
 0x905   : > { %v2312_v16 = vmul.f32 %v2291_v13, %v2261_v53 }
 0x906   : > { %v2295_v17 = vmul.f32 0.5, %v2294_v11 }
 0x907   : > { %v2318_v21 = vmul.f32 %v2968_v4, %v2312_v16 }
 0x908   : > { %v2296_v18 = vsub.f32 1.5, %v2295_v17 }
 0x909   : > { %v2324_v24 = vadd.f32 %v2969_v20, %v2318_v21 }
 0x90a   : > { %v2297_v19 = vmul.f32 %v3042_v8, %v2296_v18 }
 0x90c   : > { %v2301_v12 = vsel %vm2300_vm10, %v3042_v8, %v2297_v19 }
 0x90d   : > { %v2313_v46 = vmul.f32 %v2301_v12, %v2262_v57 }
 0x90f   : > { %v2319_v23 = vmul.f32 %v2968_v4, %v2313_v46 }
 0x911   : > { %v2325_v25 = vadd.f32 %v2969_v20, %v2319_v23 }
 0x913   : > { %v2327_v26 = vpack.c.bf16 %v2325_v25, %v2324_v24 }
 0x915   : > { %2777 = vmatmul.msk.bf16.vlgmr.msra.gmra.mxu0 %vm799_vm0, %v2327_v26 }
 0x91d   : > { %v2275_v29 = vpop.xlane.xlu0 %2274 }
 0x91e   : > { %v2278_v22 = vmul.f32 %v2275_v29, %v3823_v30  ;;  %v2970_v30 = vld [vmem:[%s4047_s24] ss:$0 sm:$0xff] }
 0x920   : > { %v2281_v27 = vadd.f32 1e-05, %v2278_v22 }
 0x922   : > { %3043 = vrsqrt.f32 %v2281_v27  ;;  %vm2308_vm12 = vweird.f32 %v2281_v27 }
 0x928   : > { %v3044_v34 = vpop.eup %3043 }
 0x929   : > { %v2303_v35 = vmul.f32 %v3044_v34, %v2281_v27  ;;  %vm2309_vm11 = vweird.f32 %v3044_v34 }
 0x92a   : > { %vm2310_vm13 = vmor %vm2308_vm12, %vm2309_vm11 }
 0x92b   : > { %v2304_v36 = vmul.f32 %v3044_v34, %v2303_v35 }
 0x92d   : > { %v2305_v37 = vmul.f32 0.5, %v2304_v36 }
 0x92f   : > { %v2306_v38 = vsub.f32 1.5, %v2305_v37 }
 0x931   : > { %v2307_v44 = vmul.f32 %v3044_v34, %v2306_v38 }
 0x933   : > { %v2311_v45 = vsel %vm2310_vm13, %v3044_v34, %v2307_v44 }
 0x934   : > { %v2314_v47 = vmul.f32 %v2311_v45, %v3919_v59 }
 0x936   : > { %v2320_v49 = vmul.f32 %v2968_v4, %v2314_v47 }
 0x938   : > { %v2326_v50 = vadd.f32 %v2969_v20, %v2320_v49 }
 0x93a   : > { %v2328_v41 = vpack.c.bf16 %v2326_v50, %v2326_v50 }
 0x93c   : > { %2778 = vmatmul.msk.bf16.gmra.mxu0 %vm799_vm0, %v2328_v41 }
 0x992   : > { %v2380_v51 = vpop.f32.mrf.mxu0 }
 0x993   : > { %v2381_v52 = vadd.f32 %v2970_v30, %v2380_v51 }
 0x995   : > { %2389 = vst [vmem:[%s746_s30] sm:$0xff] %v2381_v52 }
 0x99a   : > { %v2382_v14 = vpop.f32.mrf.mxu0 }
 0x99b   : > { %v2383_v53 = vadd.f32 %v2970_v30, %v2382_v14 }
 0x99d   : > { %2390 = vst [vmem:[%s746_s30 + $0x8] sm:$0xff] %v2383_v53 }
 0x9b9   : > { %v2385_v55 = vpop.f32.mrf.mxu0 }
 0x9ba   : > { %v2386_v39 = vadd.f32 %v2970_v30, %v2385_v55 }
 0x9bc   : > { %2391 = vst [vmem:[%s746_s30 + $0x10] sm:$0xff] %v2386_v39 }
 0x9bd   : > { %3225 = shalt.err (!%p3222_p9)
}
 0x9be   : > { %s3305_s13 = smov 128   ;;  %s3306_s30 = smov 8  }
 0x9bf   : > { %2858 = dma.vmem_to_hbm [thread:$0]  (%p3457_p4), %s2408_s29, 384, %s2410_s22, %s2393_s21, %s3305_s13, %s3305_s13, %s3306_s30  }
 0x9c1   : > { %v2387_v56 = vpop.f32.mrf.mxu0 }
 0x9c2 PF: > { %s4050_s2 = sld [smem:[#allocation25_spill]] }
 0x9c3   : > { %s4051_s26 = sld [smem:[#allocation21_spill]] }
 0x9c8   : > { %p2890_p10 = scmp.ge.s32.totalorder %s4050_s2, 2 }
 0x9c9   : > { %s2424_s4 = sand.u32 1, %s4051_s26  }
 0x9ca   : > { %p2877_p11 = pnand %p2890_p10, %p3464_p8  ;;  %s2425_s20 = scalar_lea.sflag [#allocation9], %s2424_s4 }
 0x9cc   : > { %p2878_p12 = pneg %p2877_p11 }
 0x9ce   : > { %3263 = dma.done.wait (%p2878_p12), %s2425_s20, 384  }
 0x9cf   : > { %3265 = vsyncadd (%p2878_p12), %s2425_s20, 4294966912  ;;  %s37_s28 = sadd.s32 1, %s4050_s2   ;;  %s4053_s2 = sld [smem:[#allocation22_spill]] }
 0x9d0   : > { %p34_p13 = scmp.ge.s32.totalorder %s37_s28, 4   ;;  %s4054_s25 = sld [smem:[#allocation23_spill]] }
 0x9d1   : > { %s4055_s26 = sld [smem:[#allocation29_spill]] }
 0x9d2   : > { %s4056_s27 = sld [smem:[#allocation24_spill]]  ;;  %36 = sbr.rel (!%p34_p13) target bundleno = 19 (0x13), region = 174 }
 0x9d3   : > { %s4057_s3 = sld [smem:[#allocation26_spill]] }
 0x9d7   :  { %2431 = vsyncpa [#allocation8], 1 }
 0x9d8   :  { %2433 = vsyncpa [#allocation8 + $0x1], 1 }
 0x9d9   :  { %2434 = vsyncpa [#allocation11], 1 }
 0x9da   :  { %2435 = vsyncpa [#allocation14], 1 }
 0x9db   :  { %2436 = vsyncpa [#allocation9], 1 }
 0x9dc   :  { %2438 = vsyncpa [#allocation9 + $0x1], 1 }

</bundles_post_ra>
